<compile_context>
chip_gen: v5e
topology: v5e:2x2
jax: 0.10.0
libtpu: 0.0.40
codegen_flags: <defaults>
</compile_context>

<pallas_src>
import jax
import jax.numpy as jnp
from jax.experimental import pallas as pl
from jax.experimental.pallas import tpu as pltpu

EMBED = 64
LANE = 128


def _round_up(x, m):
    return (x + m - 1) // m * m


# --------------------------------------------------------------------------
# Pallas kernel: one fused GCN layer  O = tanh( (A_hat @ V) @ W + b )
# --------------------------------------------------------------------------
def gcn_layer_kernel(a_ref, v_ref, w_ref, b_ref, o_ref, acc_ref):
    k = pl.program_id(1)

    @pl.when(k == 0)
    def _():
        acc_ref[...] = jnp.zeros_like(acc_ref)

    # bf16 x bf16 -> f32 accumulation on the MXU (A_hat stream dominates).
    acc_ref[...] += jnp.dot(a_ref[...], v_ref[...],
                            preferred_element_type=jnp.float32)

    @pl.when(k == pl.num_programs(1) - 1)
    def _():
        # Epilogue once per row tile: small W matmul, bias and tanh in f32,
        # then cast to the layer's output dtype.
        z = jnp.dot(acc_ref[...], w_ref[...],
                    preferred_element_type=jnp.float32) + b_ref[...]
        o_ref[...] = jnp.tanh(z).astype(o_ref.dtype)


def gcn_layer(a_bf16, v, w, b, *, tm, tk, out_dtype):
    """tanh(A_hat @ V @ W + b) with A tiled (tm, tk) over a (rows, k) grid."""
    n_pad = a_bf16.shape[0]
    f = v.shape[1]
    d = w.shape[1]
    grid = (n_pad // tm, n_pad // tk)
    return pl.pallas_call(
        gcn_layer_kernel,
        out_shape=jax.ShapeDtypeStruct((n_pad, d), out_dtype),
        grid=grid,
        in_specs=[
            pl.BlockSpec((tm, tk), lambda i, k: (i, k)),   # A_hat tile stream
            pl.BlockSpec((tk, f), lambda i, k: (k, 0)),    # V (X or H) tiles
            pl.BlockSpec((f, d), lambda i, k: (0, 0)),     # W (resident)
            pl.BlockSpec((1, d), lambda i, k: (0, 0)),     # bias (resident)
        ],
        out_specs=pl.BlockSpec((tm, d), lambda i, k: (i, 0)),
        scratch_shapes=[pltpu.VMEM((tm, f), jnp.float32)],
        compiler_params=pltpu.CompilerParams(
            dimension_semantics=("parallel", "arbitrary"),
            vmem_limit_bytes=32 * 1024 * 1024,   # modest tiles: fits v5e/v6e/v7x
        ),
    )(a_bf16, v.astype(jnp.bfloat16), w, b.reshape(1, d))


# --------------------------------------------------------------------------
# Pallas kernel: global max-pool + mean-pool per graph (segment offsets)
# --------------------------------------------------------------------------
def pool_kernel(off_ref, inv_ref, h_ref, gmp_ref, gap_ref):
    g = pl.program_id(0)
    start = off_ref[g]
    end = off_ref[g + 1]

    h = h_ref[...]                                          # (Npad, D), resident
    row = jax.lax.broadcasted_iota(jnp.int32, h.shape, 0)   # sublane row ids
    in_seg = (row >= start) & (row < end)

    neg = jnp.float32(-1e30)
    gmp_ref[pl.ds(g, 1), :] = jnp.max(jnp.where(in_seg, h, neg),
                                      axis=0, keepdims=True)
    seg_sum = jnp.sum(jnp.where(in_seg, h, 0.0), axis=0, keepdims=True)
    gap_ref[pl.ds(g, 1), :] = seg_sum * inv_ref[g]          # multiply, no divide


def pool(h_pad, offsets, inv_counts, num_graphs):
    n_pad, d = h_pad.shape
    grid_spec = pltpu.PrefetchScalarGridSpec(
        num_scalar_prefetch=2,
        grid=(num_graphs,),
        in_specs=[pl.BlockSpec((n_pad, d), lambda g, off, inv: (0, 0))],
        out_specs=(
            pl.BlockSpec((num_graphs, d), lambda g, off, inv: (0, 0)),
            pl.BlockSpec((num_graphs, d), lambda g, off, inv: (0, 0)),
        ),
    )
    return pl.pallas_call(
        pool_kernel,
        out_shape=(
            jax.ShapeDtypeStruct((num_graphs, d), jnp.float32),
            jax.ShapeDtypeStruct((num_graphs, d), jnp.float32),
        ),
        grid_spec=grid_spec,
        compiler_params=pltpu.CompilerParams(
            dimension_semantics=("arbitrary",),
        ),
    )(offsets, inv_counts, h_pad)


# --------------------------------------------------------------------------
# Glue: graph preprocessing + parameter init
# --------------------------------------------------------------------------
def build_norm_adj(edge_index, num_nodes):
    """Dense A_hat = D^{-1/2} (A + I) D^{-1/2} (GCNConv normalization)."""
    src = edge_index[0]
    dst = edge_index[1]
    a = jnp.zeros((num_nodes, num_nodes), jnp.float32)
    a = a.at[dst, src].set(1.0)                     # message j -> i in row i
    a = a + jnp.eye(num_nodes, dtype=jnp.float32)   # self loops
    deg = jnp.sum(a, axis=1)
    d_inv_sqrt = 1.0 / jnp.sqrt(deg)
    return a * d_inv_sqrt[:, None] * d_inv_sqrt[None, :]


def init_params(num_features, key):
    ks = jax.random.split(key, 10)

    def glorot(k, shape):
        limit = jnp.sqrt(6.0 / (shape[0] + shape[1]))
        return jax.random.uniform(k, shape, jnp.float32, -limit, limit)

    return {
        "w0": glorot(ks[0], (num_features, EMBED)),
        "b0": jnp.zeros((EMBED,), jnp.float32),
        "w1": glorot(ks[1], (EMBED, EMBED)),
        "b1": jnp.zeros((EMBED,), jnp.float32),
        "w2": glorot(ks[2], (EMBED, EMBED)),
        "b2": jnp.zeros((EMBED,), jnp.float32),
        "w3": glorot(ks[3], (EMBED, EMBED)),
        "b3": jnp.zeros((EMBED,), jnp.float32),
        # nn.Linear(2*EMBED, 1): weight stored transposed as (2E, 1)
        "w_out": glorot(ks[4], (2 * EMBED, 1)),
        "b_out": jnp.zeros((1, 1), jnp.float32),
    }


def gcn_forward(params, x, edge_index, batch_index, num_graphs):
    n, f = x.shape

    a_hat = build_norm_adj(edge_index, n)

    # Pad nodes to a lane-friendly multiple of 128 so the layer kernel can
    # tile with (8,128)-aligned blocks.  Zero A rows/cols and zero X rows keep
    # real-node outputs exact; padded rows never enter any pooling segment.
    n_pad = _round_up(max(n, LANE), LANE)
    tm = 256 if n_pad % 256 == 0 else 128
    tk = next(t for t in (512, 256, 128) if n_pad % t == 0)

    a_pad = jnp.zeros((n_pad, n_pad), jnp.float32).at[:n, :n].set(a_hat)
    a_bf16 = a_pad.astype(jnp.bfloat16)     # halve HBM bytes of the A stream
    x_pad = jnp.zeros((n_pad, f), jnp.float32).at[:n, :].set(x)

    h = gcn_layer(a_bf16, x_pad, params["w0"], params["b0"],
                  tm=tm, tk=tk, out_dtype=jnp.bfloat16)
    h = gcn_layer(a_bf16, h, params["w1"], params["b1"],
                  tm=tm, tk=tk, out_dtype=jnp.bfloat16)
    h = gcn_layer(a_bf16, h, params["w2"], params["b2"],
                  tm=tm, tk=tk, out_dtype=jnp.bfloat16)
    h = gcn_layer(a_bf16, h, params["w3"], params["b3"],
                  tm=tm, tk=tk, out_dtype=jnp.float32)

    # Pooling: assumes batch_index is sorted / contiguous per graph
    # (PyG Batch convention).
    counts = jnp.bincount(batch_index, length=num_graphs)
    offsets = jnp.concatenate(
        [jnp.zeros((1,), jnp.int32), jnp.cumsum(counts).astype(jnp.int32)])
    inv_counts = 1.0 / jnp.maximum(counts.astype(jnp.float32), 1.0)  # empty-graph guard

    gmp_out, gap_out = pool(h, offsets, inv_counts, num_graphs)
    hidden = jnp.concatenate([gmp_out, gap_out], axis=1)        # (G, 2D)

    # Final Linear(2*emb -> 1): tiny, 1-wide output -> plain JAX (lane-dense).
    out = hidden @ params["w_out"] + params["b_out"]
    return out, hidden


# --------------------------------------------------------------------------
# Pure-JAX reference (f32, dense) for correctness checking
# --------------------------------------------------------------------------
def gcn_reference(params, x, edge_index, batch_index, num_graphs):
    a_hat = build_norm_adj(edge_index, x.shape[0])
    h = x
    for i in range(4):
        h = jnp.tanh(a_hat @ h @ params[f"w{i}"] + params[f"b{i}"])
    mask = batch_index[None, :] == jnp.arange(num_graphs)[:, None]
    gmp = jnp.max(jnp.where(mask[:, :, None], h[None, :, :], -jnp.inf), axis=1)
    cnt = jnp.sum(mask, axis=1, keepdims=True).astype(h.dtype)
    gap = (mask.astype(h.dtype) @ h) / jnp.maximum(cnt, 1.0)
    hidden = jnp.concatenate([gmp, gap], axis=1)
    out = hidden @ params["w_out"] + params["b_out"]
    return out, hidden


# --------------------------------------------------------------------------
# Demo
# --------------------------------------------------------------------------
if __name__ == "__main__":
    key = jax.random.PRNGKey(0)
    k_feat, k_par = jax.random.split(key)

    nodes_per_graph = 150
    num_graphs = 2
    num_nodes = nodes_per_graph * num_graphs   # 300 -> padded 384, 3x3 grid
    num_features = 8

    # node features (N, F)
    x = jax.random.normal(k_feat, (num_nodes, num_features), jnp.float32)

    # two ring graphs, edges in both directions: edge_index (2, E)
    edges = []
    for g in range(num_graphs):
        base = g * nodes_per_graph
        for i in range(nodes_per_graph):
            a, b = base + i, base + (i + 1) % nodes_per_graph
            edges.append((a, b))
            edges.append((b, a))
    edge_index = jnp.array(list(zip(*edges)), dtype=jnp.int32)

    # contiguous batch assignment (PyG convention)
    batch_index = jnp.array(
        sum([[g] * nodes_per_graph for g in range(num_graphs)], []),
        dtype=jnp.int32)

    params = init_params(num_features, k_par)

    fwd = jax.jit(gcn_forward, static_argnums=(4,))
    out, hidden = fwd(params, x, edge_index, batch_index, num_graphs)
    jax.block_until_ready((out, hidden))

    assert out.shape == (num_graphs, 1)
    assert hidden.shape == (num_graphs, 2 * EMBED)
    assert bool(jnp.all(jnp.isfinite(out))) and bool(jnp.all(jnp.isfinite(hidden)))

    # loose tolerance: kernels use bf16 operands with f32 accumulation
    ref_out, ref_hidden = gcn_reference(params, x, edge_index, batch_index,
                                        num_graphs)
    assert bool(jnp.allclose(hidden, ref_hidden, atol=0.1)), (
        float(jnp.max(jnp.abs(hidden - ref_hidden))))

    print("KERNEL_OK")
</pallas_src>

<mosaic_0001>
module attributes {stable_mosaic.version = 11 : i64} {
  func.func @gcn_layer_kernel(%arg0: i32, %arg1: i32, %arg2: memref<128x128xbf16, #tpu.memory_space<vmem>>, %arg3: memref<128x8xbf16, #tpu.memory_space<vmem>>, %arg4: memref<8x64xf32, #tpu.memory_space<vmem>>, %arg5: memref<1x64xf32, #tpu.memory_space<vmem>>, %arg6: memref<128x64xbf16, #tpu.memory_space<vmem>>, %arg7: memref<128x8xf32, #tpu.memory_space<vmem>>) attributes {dimension_semantics = [#tpu.dimension_semantics<parallel>, #tpu.dimension_semantics<arbitrary>], iteration_bounds = array<i64: 3, 3>, scalar_prefetch = 0 : i64, scratch_operands = 1 : i64, tpu.core_type = #tpu.core_type<tc>, window_params = [{transform_indices = @transform_0, window_bounds = array<i64: 128, 128>}, {transform_indices = @transform_1, window_bounds = array<i64: 128, 8>}, {pipeline_mode = #tpu.pipeline_mode<synchronous>, transform_indices = @transform_2, window_bounds = array<i64: 8, 64>}, {pipeline_mode = #tpu.pipeline_mode<synchronous>, transform_indices = @transform_3, window_bounds = array<i64: 1, 64>}, {transform_indices = @transform_4, window_bounds = array<i64: 128, 64>}]} {
    %c0_i32 = arith.constant 0 : i32
    %0 = arith.cmpi eq, %arg1, %c0_i32 : i32
    %1 = arith.extui %0 : i1 to i32
    %c0_i32_0 = arith.constant 0 : i32
    %2 = arith.cmpi ne, %1, %c0_i32_0 : i32
    scf.if %2 {
      %cst_9 = arith.constant 0.000000e+00 : f32
      %12 = vector.broadcast %cst_9 : f32 to vector<128x8xf32>
      %c0_10 = arith.constant 0 : index
      %c0_11 = arith.constant 0 : index
      %13 = vector.load %arg7[%c0_10, %c0_11] : memref<128x8xf32, #tpu.memory_space<vmem>>, vector<128x8xf32>
      tpu.vector_store %arg7[%c0_10, %c0_11], %12 {strides = array<i32>} : memref<128x8xf32, #tpu.memory_space<vmem>>, vector<128x8xf32>,
    } else {
    }
    %c0 = arith.constant 0 : index
    %c0_1 = arith.constant 0 : index
    %3 = vector.load %arg7[%c0, %c0_1] : memref<128x8xf32, #tpu.memory_space<vmem>>, vector<128x8xf32>
    %c0_2 = arith.constant 0 : index
    %c0_3 = arith.constant 0 : index
    %4 = vector.load %arg2[%c0_2, %c0_3] : memref<128x128xbf16, #tpu.memory_space<vmem>>, vector<128x128xbf16>
    %c0_4 = arith.constant 0 : index
    %c0_5 = arith.constant 0 : index
    %5 = vector.load %arg3[%c0_4, %c0_5] : memref<128x8xbf16, #tpu.memory_space<vmem>>, vector<128x8xbf16>
    %cst = arith.constant dense<0.000000e+00> : vector<128x8xf32>
    %6 = tpu.matmul %4, %5, %cst {dimension_numbers = #tpu.dot_dimension_numbers<[1], [0], [0], [1], [0, 0, 1, 1], [], []>} : vector<128x128xbf16>, vector<128x8xbf16>, vector<128x8xf32> -> vector<128x8xf32>
    %7 = arith.addf %3, %6 : vector<128x8xf32>
    %c0_6 = arith.constant 0 : index
    %c0_7 = arith.constant 0 : index
    %8 = vector.load %arg7[%c0_6, %c0_7] : memref<128x8xf32, #tpu.memory_space<vmem>>, vector<128x8xf32>
    tpu.vector_store %arg7[%c0_6, %c0_7], %7 {strides = array<i32>} : memref<128x8xf32, #tpu.memory_space<vmem>>, vector<128x8xf32>,
    %c2_i32 = arith.constant 2 : i32
    %9 = arith.cmpi eq, %arg1, %c2_i32 : i32
    %10 = arith.extui %9 : i1 to i32
    %c0_i32_8 = arith.constant 0 : i32
    %11 = arith.cmpi ne, %10, %c0_i32_8 : i32
    scf.if %11 {
      %c0_9 = arith.constant 0 : index
      %c0_10 = arith.constant 0 : index
      %12 = vector.load %arg7[%c0_9, %c0_10] : memref<128x8xf32, #tpu.memory_space<vmem>>, vector<128x8xf32>
      %c0_11 = arith.constant 0 : index
      %c0_12 = arith.constant 0 : index
      %13 = vector.load %arg4[%c0_11, %c0_12] : memref<8x64xf32, #tpu.memory_space<vmem>>, vector<8x64xf32>
      %cst_13 = arith.constant dense<0.000000e+00> : vector<128x64xf32>
      %14 = tpu.matmul %12, %13, %cst_13 {dimension_numbers = #tpu.dot_dimension_numbers<[1], [0], [0], [1], [0, 0, 1, 1], [], []>} : vector<128x8xf32>, vector<8x64xf32>, vector<128x64xf32> -> vector<128x64xf32>
      %c0_14 = arith.constant 0 : index
      %c0_15 = arith.constant 0 : index
      %15 = vector.load %arg5[%c0_14, %c0_15] : memref<1x64xf32, #tpu.memory_space<vmem>>, vector<1x64xf32>
      %16 = vector.broadcast %15 : vector<1x64xf32> to vector<128x64xf32>
      %17 = arith.addf %14, %16 : vector<128x64xf32>
      %18 = math.tanh %17 : vector<128x64xf32>
      %19 = arith.truncf %18 : vector<128x64xf32> to vector<128x64xbf16>
      %c0_16 = arith.constant 0 : index
      %c0_17 = arith.constant 0 : index
      %20 = vector.load %arg6[%c0_16, %c0_17] : memref<128x64xbf16, #tpu.memory_space<vmem>>, vector<128x64xbf16>
      tpu.vector_store %arg6[%c0_16, %c0_17], %19 {strides = array<i32>} : memref<128x64xbf16, #tpu.memory_space<vmem>>, vector<128x64xbf16>,
    } else {
    }
    return
  }
  func.func @transform_0(%arg0: i32, %arg1: i32) -> (i32, i32) {
    %c0_i32 = arith.constant 0 : i32
    return %arg0, %arg1 : i32, i32
  }
  func.func @transform_1(%arg0: i32, %arg1: i32) -> (i32, i32) {
    %c0_i32 = arith.constant 0 : i32
    %c0_i32_0 = arith.constant 0 : i32
    return %arg1, %c0_i32 : i32, i32
  }
  func.func @transform_2(%arg0: i32, %arg1: i32) -> (i32, i32) {
    %c0_i32 = arith.constant 0 : i32
    %c0_i32_0 = arith.constant 0 : i32
    %c0_i32_1 = arith.constant 0 : i32
    return %c0_i32, %c0_i32_0 : i32, i32
  }
  func.func @transform_3(%arg0: i32, %arg1: i32) -> (i32, i32) {
    %c0_i32 = arith.constant 0 : i32
    %c0_i32_0 = arith.constant 0 : i32
    %c0_i32_1 = arith.constant 0 : i32
    return %c0_i32, %c0_i32_0 : i32, i32
  }
  func.func @transform_4(%arg0: i32, %arg1: i32) -> (i32, i32) {
    %c0_i32 = arith.constant 0 : i32
    %c0_i32_0 = arith.constant 0 : i32
    return %arg0, %c0_i32 : i32, i32
  }
}

module attributes {stable_mosaic.version = 11 : i64} {
  func.func @gcn_layer_kernel(%arg0: i32, %arg1: i32, %arg2: memref<128x128xbf16, #tpu.memory_space<vmem>>, %arg3: memref<128x64xbf16, #tpu.memory_space<vmem>>, %arg4: memref<64x64xf32, #tpu.memory_space<vmem>>, %arg5: memref<1x64xf32, #tpu.memory_space<vmem>>, %arg6: memref<128x64xf32, #tpu.memory_space<vmem>>, %arg7: memref<128x64xf32, #tpu.memory_space<vmem>>) attributes {dimension_semantics = [#tpu.dimension_semantics<parallel>, #tpu.dimension_semantics<arbitrary>], iteration_bounds = array<i64: 3, 3>, scalar_prefetch = 0 : i64, scratch_operands = 1 : i64, tpu.core_type = #tpu.core_type<tc>, window_params = [{transform_indices = @transform_0, window_bounds = array<i64: 128, 128>}, {transform_indices = @transform_1, window_bounds = array<i64: 128, 64>}, {pipeline_mode = #tpu.pipeline_mode<synchronous>, transform_indices = @transform_2, window_bounds = array<i64: 64, 64>}, {pipeline_mode = #tpu.pipeline_mode<synchronous>, transform_indices = @transform_3, window_bounds = array<i64: 1, 64>}, {transform_indices = @transform_4, window_bounds = array<i64: 128, 64>}]} {
    %c0_i32 = arith.constant 0 : i32
    %0 = arith.cmpi eq, %arg1, %c0_i32 : i32
    %1 = arith.extui %0 : i1 to i32
    %c0_i32_0 = arith.constant 0 : i32
    %2 = arith.cmpi ne, %1, %c0_i32_0 : i32
    scf.if %2 {
      %cst_9 = arith.constant 0.000000e+00 : f32
      %12 = vector.broadcast %cst_9 : f32 to vector<128x64xf32>
      %c0_10 = arith.constant 0 : index
      %c0_11 = arith.constant 0 : index
      %13 = vector.load %arg7[%c0_10, %c0_11] : memref<128x64xf32, #tpu.memory_space<vmem>>, vector<128x64xf32>
      tpu.vector_store %arg7[%c0_10, %c0_11], %12 {strides = array<i32>} : memref<128x64xf32, #tpu.memory_space<vmem>>, vector<128x64xf32>,
    } else {
    }
    %c0 = arith.constant 0 : index
    %c0_1 = arith.constant 0 : index
    %3 = vector.load %arg7[%c0, %c0_1] : memref<128x64xf32, #tpu.memory_space<vmem>>, vector<128x64xf32>
    %c0_2 = arith.constant 0 : index
    %c0_3 = arith.constant 0 : index
    %4 = vector.load %arg2[%c0_2, %c0_3] : memref<128x128xbf16, #tpu.memory_space<vmem>>, vector<128x128xbf16>
    %c0_4 = arith.constant 0 : index
    %c0_5 = arith.constant 0 : index
    %5 = vector.load %arg3[%c0_4, %c0_5] : memref<128x64xbf16, #tpu.memory_space<vmem>>, vector<128x64xbf16>
    %cst = arith.constant dense<0.000000e+00> : vector<128x64xf32>
    %6 = tpu.matmul %4, %5, %cst {dimension_numbers = #tpu.dot_dimension_numbers<[1], [0], [0], [1], [0, 0, 1, 1], [], []>} : vector<128x128xbf16>, vector<128x64xbf16>, vector<128x64xf32> -> vector<128x64xf32>
    %7 = arith.addf %3, %6 : vector<128x64xf32>
    %c0_6 = arith.constant 0 : index
    %c0_7 = arith.constant 0 : index
    %8 = vector.load %arg7[%c0_6, %c0_7] : memref<128x64xf32, #tpu.memory_space<vmem>>, vector<128x64xf32>
    tpu.vector_store %arg7[%c0_6, %c0_7], %7 {strides = array<i32>} : memref<128x64xf32, #tpu.memory_space<vmem>>, vector<128x64xf32>,
    %c2_i32 = arith.constant 2 : i32
    %9 = arith.cmpi eq, %arg1, %c2_i32 : i32
    %10 = arith.extui %9 : i1 to i32
    %c0_i32_8 = arith.constant 0 : i32
    %11 = arith.cmpi ne, %10, %c0_i32_8 : i32
    scf.if %11 {
      %c0_9 = arith.constant 0 : index
      %c0_10 = arith.constant 0 : index
      %12 = vector.load %arg7[%c0_9, %c0_10] : memref<128x64xf32, #tpu.memory_space<vmem>>, vector<128x64xf32>
      %c0_11 = arith.constant 0 : index
      %c0_12 = arith.constant 0 : index
      %13 = vector.load %arg4[%c0_11, %c0_12] : memref<64x64xf32, #tpu.memory_space<vmem>>, vector<64x64xf32>
      %cst_13 = arith.constant dense<0.000000e+00> : vector<128x64xf32>
      %14 = tpu.matmul %12, %13, %cst_13 {dimension_numbers = #tpu.dot_dimension_numbers<[1], [0], [0], [1], [0, 0, 1, 1], [], []>} : vector<128x64xf32>, vector<64x64xf32>, vector<128x64xf32> -> vector<128x64xf32>
      %c0_14 = arith.constant 0 : index
      %c0_15 = arith.constant 0 : index
      %15 = vector.load %arg5[%c0_14, %c0_15] : memref<1x64xf32, #tpu.memory_space<vmem>>, vector<1x64xf32>
      %16 = vector.broadcast %15 : vector<1x64xf32> to vector<128x64xf32>
      %17 = arith.addf %14, %16 : vector<128x64xf32>
      %18 = math.tanh %17 : vector<128x64xf32>
      %c0_16 = arith.constant 0 : index
      %c0_17 = arith.constant 0 : index
      %19 = vector.load %arg6[%c0_16, %c0_17] : memref<128x64xf32, #tpu.memory_space<vmem>>, vector<128x64xf32>
      tpu.vector_store %arg6[%c0_16, %c0_17], %18 {strides = array<i32>} : memref<128x64xf32, #tpu.memory_space<vmem>>, vector<128x64xf32>,
    } else {
    }
    return
  }
  func.func @transform_0(%arg0: i32, %arg1: i32) -> (i32, i32) {
    %c0_i32 = arith.constant 0 : i32
    return %arg0, %arg1 : i32, i32
  }
  func.func @transform_1(%arg0: i32, %arg1: i32) -> (i32, i32) {
    %c0_i32 = arith.constant 0 : i32
    %c0_i32_0 = arith.constant 0 : i32
    return %arg1, %c0_i32 : i32, i32
  }
  func.func @transform_2(%arg0: i32, %arg1: i32) -> (i32, i32) {
    %c0_i32 = arith.constant 0 : i32
    %c0_i32_0 = arith.constant 0 : i32
    %c0_i32_1 = arith.constant 0 : i32
    return %c0_i32, %c0_i32_0 : i32, i32
  }
  func.func @transform_3(%arg0: i32, %arg1: i32) -> (i32, i32) {
    %c0_i32 = arith.constant 0 : i32
    %c0_i32_0 = arith.constant 0 : i32
    %c0_i32_1 = arith.constant 0 : i32
    return %c0_i32, %c0_i32_0 : i32, i32
  }
  func.func @transform_4(%arg0: i32, %arg1: i32) -> (i32, i32) {
    %c0_i32 = arith.constant 0 : i32
    %c0_i32_0 = arith.constant 0 : i32
    return %arg0, %c0_i32 : i32, i32
  }
}

module attributes {stable_mosaic.version = 11 : i64} {
  func.func @gcn_layer_kernel(%arg0: i32, %arg1: i32, %arg2: memref<128x128xbf16, #tpu.memory_space<vmem>>, %arg3: memref<128x64xbf16, #tpu.memory_space<vmem>>, %arg4: memref<64x64xf32, #tpu.memory_space<vmem>>, %arg5: memref<1x64xf32, #tpu.memory_space<vmem>>, %arg6: memref<128x64xbf16, #tpu.memory_space<vmem>>, %arg7: memref<128x64xf32, #tpu.memory_space<vmem>>) attributes {dimension_semantics = [#tpu.dimension_semantics<parallel>, #tpu.dimension_semantics<arbitrary>], iteration_bounds = array<i64: 3, 3>, scalar_prefetch = 0 : i64, scratch_operands = 1 : i64, tpu.core_type = #tpu.core_type<tc>, window_params = [{transform_indices = @transform_0, window_bounds = array<i64: 128, 128>}, {transform_indices = @transform_1, window_bounds = array<i64: 128, 64>}, {pipeline_mode = #tpu.pipeline_mode<synchronous>, transform_indices = @transform_2, window_bounds = array<i64: 64, 64>}, {pipeline_mode = #tpu.pipeline_mode<synchronous>, transform_indices = @transform_3, window_bounds = array<i64: 1, 64>}, {transform_indices = @transform_4, window_bounds = array<i64: 128, 64>}]} {
    %c0_i32 = arith.constant 0 : i32
    %0 = arith.cmpi eq, %arg1, %c0_i32 : i32
    %1 = arith.extui %0 : i1 to i32
    %c0_i32_0 = arith.constant 0 : i32
    %2 = arith.cmpi ne, %1, %c0_i32_0 : i32
    scf.if %2 {
      %cst_9 = arith.constant 0.000000e+00 : f32
      %12 = vector.broadcast %cst_9 : f32 to vector<128x64xf32>
      %c0_10 = arith.constant 0 : index
      %c0_11 = arith.constant 0 : index
      %13 = vector.load %arg7[%c0_10, %c0_11] : memref<128x64xf32, #tpu.memory_space<vmem>>, vector<128x64xf32>
      tpu.vector_store %arg7[%c0_10, %c0_11], %12 {strides = array<i32>} : memref<128x64xf32, #tpu.memory_space<vmem>>, vector<128x64xf32>,
    } else {
    }
    %c0 = arith.constant 0 : index
    %c0_1 = arith.constant 0 : index
    %3 = vector.load %arg7[%c0, %c0_1] : memref<128x64xf32, #tpu.memory_space<vmem>>, vector<128x64xf32>
    %c0_2 = arith.constant 0 : index
    %c0_3 = arith.constant 0 : index
    %4 = vector.load %arg2[%c0_2, %c0_3] : memref<128x128xbf16, #tpu.memory_space<vmem>>, vector<128x128xbf16>
    %c0_4 = arith.constant 0 : index
    %c0_5 = arith.constant 0 : index
    %5 = vector.load %arg3[%c0_4, %c0_5] : memref<128x64xbf16, #tpu.memory_space<vmem>>, vector<128x64xbf16>
    %cst = arith.constant dense<0.000000e+00> : vector<128x64xf32>
    %6 = tpu.matmul %4, %5, %cst {dimension_numbers = #tpu.dot_dimension_numbers<[1], [0], [0], [1], [0, 0, 1, 1], [], []>} : vector<128x128xbf16>, vector<128x64xbf16>, vector<128x64xf32> -> vector<128x64xf32>
    %7 = arith.addf %3, %6 : vector<128x64xf32>
    %c0_6 = arith.constant 0 : index
    %c0_7 = arith.constant 0 : index
    %8 = vector.load %arg7[%c0_6, %c0_7] : memref<128x64xf32, #tpu.memory_space<vmem>>, vector<128x64xf32>
    tpu.vector_store %arg7[%c0_6, %c0_7], %7 {strides = array<i32>} : memref<128x64xf32, #tpu.memory_space<vmem>>, vector<128x64xf32>,
    %c2_i32 = arith.constant 2 : i32
    %9 = arith.cmpi eq, %arg1, %c2_i32 : i32
    %10 = arith.extui %9 : i1 to i32
    %c0_i32_8 = arith.constant 0 : i32
    %11 = arith.cmpi ne, %10, %c0_i32_8 : i32
    scf.if %11 {
      %c0_9 = arith.constant 0 : index
      %c0_10 = arith.constant 0 : index
      %12 = vector.load %arg7[%c0_9, %c0_10] : memref<128x64xf32, #tpu.memory_space<vmem>>, vector<128x64xf32>
      %c0_11 = arith.constant 0 : index
      %c0_12 = arith.constant 0 : index
      %13 = vector.load %arg4[%c0_11, %c0_12] : memref<64x64xf32, #tpu.memory_space<vmem>>, vector<64x64xf32>
      %cst_13 = arith.constant dense<0.000000e+00> : vector<128x64xf32>
      %14 = tpu.matmul %12, %13, %cst_13 {dimension_numbers = #tpu.dot_dimension_numbers<[1], [0], [0], [1], [0, 0, 1, 1], [], []>} : vector<128x64xf32>, vector<64x64xf32>, vector<128x64xf32> -> vector<128x64xf32>
      %c0_14 = arith.constant 0 : index
      %c0_15 = arith.constant 0 : index
      %15 = vector.load %arg5[%c0_14, %c0_15] : memref<1x64xf32, #tpu.memory_space<vmem>>, vector<1x64xf32>
      %16 = vector.broadcast %15 : vector<1x64xf32> to vector<128x64xf32>
      %17 = arith.addf %14, %16 : vector<128x64xf32>
      %18 = math.tanh %17 : vector<128x64xf32>
      %19 = arith.truncf %18 : vector<128x64xf32> to vector<128x64xbf16>
      %c0_16 = arith.constant 0 : index
      %c0_17 = arith.constant 0 : index
      %20 = vector.load %arg6[%c0_16, %c0_17] : memref<128x64xbf16, #tpu.memory_space<vmem>>, vector<128x64xbf16>
      tpu.vector_store %arg6[%c0_16, %c0_17], %19 {strides = array<i32>} : memref<128x64xbf16, #tpu.memory_space<vmem>>, vector<128x64xbf16>,
    } else {
    }
    return
  }
  func.func @transform_0(%arg0: i32, %arg1: i32) -> (i32, i32) {
    %c0_i32 = arith.constant 0 : i32
    return %arg0, %arg1 : i32, i32
  }
  func.func @transform_1(%arg0: i32, %arg1: i32) -> (i32, i32) {
    %c0_i32 = arith.constant 0 : i32
    %c0_i32_0 = arith.constant 0 : i32
    return %arg1, %c0_i32 : i32, i32
  }
  func.func @transform_2(%arg0: i32, %arg1: i32) -> (i32, i32) {
    %c0_i32 = arith.constant 0 : i32
    %c0_i32_0 = arith.constant 0 : i32
    %c0_i32_1 = arith.constant 0 : i32
    return %c0_i32, %c0_i32_0 : i32, i32
  }
  func.func @transform_3(%arg0: i32, %arg1: i32) -> (i32, i32) {
    %c0_i32 = arith.constant 0 : i32
    %c0_i32_0 = arith.constant 0 : i32
    %c0_i32_1 = arith.constant 0 : i32
    return %c0_i32, %c0_i32_0 : i32, i32
  }
  func.func @transform_4(%arg0: i32, %arg1: i32) -> (i32, i32) {
    %c0_i32 = arith.constant 0 : i32
    %c0_i32_0 = arith.constant 0 : i32
    return %arg0, %c0_i32 : i32, i32
  }
}

module attributes {stable_mosaic.version = 11 : i64} {
  func.func @pool_kernel(%arg0: i32, %arg1: memref<3xi32, #tpu.memory_space<smem>>, %arg2: memref<2xf32, #tpu.memory_space<smem>>, %arg3: memref<384x64xf32, #tpu.memory_space<vmem>>, %arg4: memref<2x64xf32, #tpu.memory_space<vmem>>, %arg5: memref<2x64xf32, #tpu.memory_space<vmem>>) attributes {dimension_semantics = [#tpu.dimension_semantics<arbitrary>], iteration_bounds = array<i64: 2>, scalar_prefetch = 2 : i64, scratch_operands = 0 : i64, tpu.core_type = #tpu.core_type<tc>, window_params = [{pipeline_mode = #tpu.pipeline_mode<synchronous>, transform_indices = @transform_0, window_bounds = array<i64: 384, 64>}, {pipeline_mode = #tpu.pipeline_mode<synchronous>, transform_indices = @transform_1, window_bounds = array<i64: 2, 64>}, {pipeline_mode = #tpu.pipeline_mode<synchronous>, transform_indices = @transform_2, window_bounds = array<i64: 2, 64>}]} {
    %0 = arith.index_cast %arg0 : i32 to index
    %1 = memref.load %arg1[%0] : memref<3xi32, #tpu.memory_space<smem>>
    %c1_i32 = arith.constant 1 : i32
    %2 = arith.addi %arg0, %c1_i32 : i32
    %3 = arith.index_cast %2 : i32 to index
    %4 = memref.load %arg1[%3] : memref<3xi32, #tpu.memory_space<smem>>
    %c0 = arith.constant 0 : index
    %c0_0 = arith.constant 0 : index
    %5 = vector.load %arg3[%c0, %c0_0] : memref<384x64xf32, #tpu.memory_space<vmem>>, vector<384x64xf32>
    %6 = tpu.iota {dimensions = array<i32: 0>} : vector<384x64xi32>
    %7 = vector.broadcast %1 : i32 to vector<384x64xi32>
    %8 = arith.cmpi sge, %6, %7 : vector<384x64xi32>
    %9 = vector.broadcast %4 : i32 to vector<384x64xi32>
    %10 = arith.cmpi slt, %6, %9 : vector<384x64xi32>
    %11 = arith.andi %8, %10 : vector<384x64xi1>
    %cst = arith.constant -1.000000e+30 : f32
    %12 = vector.broadcast %cst : f32 to vector<384x64xf32>
    %13 = arith.select %11, %5, %12 : vector<384x64xi1>, vector<384x64xf32>
    %cst_1 = arith.constant dense<0xFF800000> : vector<64xf32>
    %14 = vector.multi_reduction <maximumf>, %13, %cst_1 [0] : vector<384x64xf32> to vector<64xf32>
    %15 = vector.shape_cast %14 : vector<64xf32> to vector<1x64xf32>
    %16 = arith.index_cast %arg0 : i32 to index
    %c0_2 = arith.constant 0 : index
    %17 = vector.load %arg4[%16, %c0_2] : memref<2x64xf32, #tpu.memory_space<vmem>>, vector<1x64xf32>
    tpu.vector_store %arg4[%16, %c0_2], %15 {strides = array<i32>} : memref<2x64xf32, #tpu.memory_space<vmem>>, vector<1x64xf32>,
    %cst_3 = arith.constant 0.000000e+00 : f32
    %18 = vector.broadcast %cst_3 : f32 to vector<384x64xf32>
    %19 = arith.select %11, %5, %18 : vector<384x64xi1>, vector<384x64xf32>
    %cst_4 = arith.constant dense<0.000000e+00> : vector<64xf32>
    %20 = vector.multi_reduction <add>, %19, %cst_4 [0] : vector<384x64xf32> to vector<64xf32>
    %21 = vector.shape_cast %20 : vector<64xf32> to vector<1x64xf32>
    %22 = arith.index_cast %arg0 : i32 to index
    %23 = memref.load %arg2[%22] : memref<2xf32, #tpu.memory_space<smem>>
    %24 = vector.broadcast %23 : f32 to vector<1x64xf32>
    %25 = arith.mulf %21, %24 : vector<1x64xf32>
    %26 = arith.index_cast %arg0 : i32 to index
    %c0_5 = arith.constant 0 : index
    %27 = vector.load %arg5[%26, %c0_5] : memref<2x64xf32, #tpu.memory_space<vmem>>, vector<1x64xf32>
    tpu.vector_store %arg5[%26, %c0_5], %25 {strides = array<i32>} : memref<2x64xf32, #tpu.memory_space<vmem>>, vector<1x64xf32>,
    return
  }
  func.func @transform_0(%arg0: i32, %arg1: memref<3xi32, #tpu.memory_space<smem>>, %arg2: memref<2xf32, #tpu.memory_space<smem>>) -> (i32, i32) {
    %c0_i32 = arith.constant 0 : i32
    %c0_i32_0 = arith.constant 0 : i32
    %c0_i32_1 = arith.constant 0 : i32
    return %c0_i32, %c0_i32_0 : i32, i32
  }
  func.func @transform_1(%arg0: i32, %arg1: memref<3xi32, #tpu.memory_space<smem>>, %arg2: memref<2xf32, #tpu.memory_space<smem>>) -> (i32, i32) {
    %c0_i32 = arith.constant 0 : i32
    %c0_i32_0 = arith.constant 0 : i32
    %c0_i32_1 = arith.constant 0 : i32
    return %c0_i32, %c0_i32_0 : i32, i32
  }
  func.func @transform_2(%arg0: i32, %arg1: memref<3xi32, #tpu.memory_space<smem>>, %arg2: memref<2xf32, #tpu.memory_space<smem>>) -> (i32, i32) {
    %c0_i32 = arith.constant 0 : i32
    %c0_i32_0 = arith.constant 0 : i32
    %c0_i32_1 = arith.constant 0 : i32
    return %c0_i32, %c0_i32_0 : i32, i32
  }
}

</mosaic_0001>

<bundles_post_ra>
// kernel: gcn_forward.5
= control target key start
LH: loop header
LB: loop body
LE: loop exit
PB: predicated region body
PF: predicated region fallthrough
CT: control target
= control target key end

     0   :  { %s1178_s15 = smov 0   ;;  %s1180_s16 = smov 0   ;;  %s1416_s0 = inlined_call_operand.vmem [shape: bf16[384,384], index: 0, kind: input, shape index: {}]   ;;  %s1417_s1 = inlined_call_operand.vmem [shape: bf16[384,8], index: 1, kind: input, shape index: {}]   ;;  %s1418_s2 = inlined_call_operand.vmem [shape: f32[8,64], index: 2, kind: input, shape index: {}]   ;;  %s1419_s3 = inlined_call_operand.vmem [shape: f32[1,64], index: 3, kind: input, shape index: {}]   ;;  %s1420_s4 = inlined_call_operand.vmem [shape: bf16[384,64], index: 4, kind: output, shape index: {}]  }
   0x1   :  { %s1182_s17 = smov 0   ;;  %s1184_s18 = smov 0  }
   0x2   :  { %s1186_s19 = smov 0   ;;  %s1188_s20 = smov 0  }
   0x3   :  { %s1190_s21 = smov 0  }
   0x4 LB: > { %s23_s22 = sadd.s32 1, %s1142_s19  ;;  %s26_s23 = sadd.s32 1, %s1146_s20  ;;  %s1150_s21 = sphi %s1190_s21, %s14_s21   ;;  %s1146_s20 = sphi %s1188_s20, %s1426_s20   ;;  %s1142_s19 = sphi %s1186_s19, %s1425_s19   ;;  %s1138_s18 = sphi %s1184_s18, %s1424_s18   ;;  %s1134_s17 = sphi %s1182_s17, %s1423_s17   ;;  %s1130_s16 = sphi %s1180_s16, %s1422_s16   ;;  %s1126_s15 = sphi %s1178_s15, %s1421_s15  }
   0x5   : > { %p24_p0 = scmp.ge.s32.totalorder %s23_s22, 3  ;;  %p42_p1 = scmp.ne.s32.totalorder %s1130_s16, %s1126_s15 }
   0x6   : > { %p43_p2 = scmp.eq.s32.totalorder %s1150_s21, 0  ;;  %s35_s27 = sadd.s32 1, %s1130_s16 }
   0x7   : > { %s1428_s22 = smov (%p24_p0, %s23_s22), 0  ;;  %s1430_s23 = smov (!%p24_p0, %s26_s23), %s1146_s20 }
   0x8   : > { %p44_p3 = por %p43_p2, %p42_p1  ;;  %p28_p4 = scmp.ge.s32.totalorder %s1430_s23, 3 }
   0x9   : > { %s31_s24 = ssub.s32 %s1142_s19, %s1428_s22  ;;  %p867_p6 = scmp.ge.s32.totalorder %s1150_s21, 9 }
   0xa   : > { %s1432_s23 = smov (%p28_p4, %s1430_s23), 0 }
   0xb   : > { %s30_s25 = ssub.s32 %s1146_s20, %s1432_s23  ;;  %168 = sbr.rel (%p867_p6) target bundleno = 39 (0x27), region = 24 }
   0xc   : > { %s32_s26 = sor.u32 %s31_s24, %s30_s25 }
   0xd   : > { %p33_p5 = scmp.eq.s32.totalorder %s32_s26, 0 }
   0xf   : > { %s1229_s28 = scalar_select %p33_p5, %s1130_s16, %s35_s27  }
  0x10   : > { %171 = sbr.rel (!%p44_p3) target bundleno = 39 (0x27), region = 28  ;;  %s173_s29 = sand.u32 (%p44_p3), 1, %s1130_s16  }
  0x11   : > { %s1005_s30 = smul.u32 (%p44_p3), 48, %s1146_s20  ;;  %s868_s5 = sshll.u32 (%p44_p3), %s173_s29, 6 }
  0x12   : > { %s175_s11 = scalar_lea.vmem (%p44_p3), [#allocation3], %s868_s5 }
  0x13   : > { %s178_s6 = sadd.s32 (%p44_p3), %s1142_s19, %s1005_s30 }
  0x14   : > { %s871_s7 = sshll.u32 (%p44_p3), %s178_s6, 2 }
  0x15   : > { %s1238_s10 = scalar_lea.vmem %s1416_s0, %s871_s7 }
  0x16   : > { %v197_v0 = vld [vmem:[%s1238_s10] sm:$0xf]  ;;  %v199_v1 = vld [vmem:[%s1238_s10 + $0xc] sm:$0xf]  ;;  %v201_v2 = vld [vmem:[%s1238_s10 + $0x18] sm:$0xf] }
  0x17   : > { %198 = vst [vmem:[%s175_s11] sm:$0xf] %v197_v0  ;;  %v203_v3 = vld [vmem:[%s1238_s10 + $0x24] sm:$0xf]  ;;  %v205_v4 = vld [vmem:[%s1238_s10 + $0x30] sm:$0xf] }
  0x18   : > { %200 = vst [vmem:[%s175_s11 + $0x4] sm:$0xf] %v199_v1  ;;  %v207_v5 = vld [vmem:[%s1238_s10 + $0x3c] sm:$0xf]  ;;  %v209_v6 = vld [vmem:[%s1238_s10 + $0x48] sm:$0xf] }
  0x19   : > { %202 = vst [vmem:[%s175_s11 + $0x8] sm:$0xf] %v201_v2  ;;  %v211_v7 = vld [vmem:[%s1238_s10 + $0x54] sm:$0xf]  ;;  %v213_v8 = vld [vmem:[%s1238_s10 + $0x60] sm:$0xf] }
  0x1a   : > { %204 = vst [vmem:[%s175_s11 + $0xc] sm:$0xf] %v203_v3  ;;  %v215_v9 = vld [vmem:[%s1238_s10 + $0x6c] sm:$0xf]  ;;  %v217_v10 = vld [vmem:[%s1238_s10 + $0x78] sm:$0xf] }
  0x1b   : > { %206 = vst [vmem:[%s175_s11 + $0x10] sm:$0xf] %v205_v4  ;;  %v219_v11 = vld [vmem:[%s1238_s10 + $0x84] sm:$0xf]  ;;  %v221_v12 = vld [vmem:[%s1238_s10 + $0x90] sm:$0xf] }
  0x1c   : > { %208 = vst [vmem:[%s175_s11 + $0x14] sm:$0xf] %v207_v5  ;;  %v223_v13 = vld [vmem:[%s1238_s10 + $0x9c] sm:$0xf]  ;;  %v225_v14 = vld [vmem:[%s1238_s10 + $0xa8] sm:$0xf] }
  0x1d   : > { %210 = vst [vmem:[%s175_s11 + $0x18] sm:$0xf] %v209_v6  ;;  %v227_v15 = vld [vmem:[%s1238_s10 + $0xb4] sm:$0xf] }
  0x1e   : > { %212 = vst [vmem:[%s175_s11 + $0x1c] sm:$0xf] %v211_v7 }
  0x1f   : > { %214 = vst [vmem:[%s175_s11 + $0x20] sm:$0xf] %v213_v8 }
  0x20   : > { %216 = vst [vmem:[%s175_s11 + $0x24] sm:$0xf] %v215_v9 }
  0x21   : > { %218 = vst [vmem:[%s175_s11 + $0x28] sm:$0xf] %v217_v10 }
  0x22   : > { %220 = vst [vmem:[%s175_s11 + $0x2c] sm:$0xf] %v219_v11 }
  0x23   : > { %222 = vst [vmem:[%s175_s11 + $0x30] sm:$0xf] %v221_v12 }
  0x24   : > { %224 = vst [vmem:[%s175_s11 + $0x34] sm:$0xf] %v223_v13 }
  0x25   : > { %226 = vst [vmem:[%s175_s11 + $0x38] sm:$0xf] %v225_v14 }
  0x26   : > { %228 = vst [vmem:[%s175_s11 + $0x3c] sm:$0xf] %v227_v15 }
  0x27 PF: > { %p872_p7 = scmp.ge.s32.totalorder %s1150_s21, 1  ;;  %p292_p8 = scmp.lt.s32.totalorder %s1150_s21, 10 }
  0x29   : > { %p293_p9 = pnand %p872_p7, %p292_p8 }
  0x2a   : > { %s299_s12 = sand.u32 (!%p293_p9), 1, %s1126_s15   ;;  %s874_s13 = sshll.u32 (!%p293_p9), %s1134_s17, 4 }
  0x2b   : > { %296 = sbr.rel (%p293_p9) target bundleno = 437 (0x1b5), region = 73  ;;  %s873_s14 = sshll.u32 (!%p293_p9), %s299_s12, 6 }
  0x2c   : > { %p331_p10 = scmp.lt.s32.totalorder (!%p293_p9), %s874_s13, 47  ;;  %s876_s24 = sshll.u32 (!%p293_p9), %s1138_s18, 4 }
  0x2d   : > { %p337_p11 = scmp.lt.s32.totalorder (!%p293_p9), %s876_s24, 47  ;;  %s1271_s15 = scalar_lea.vmem (!%p293_p9), [#allocation3], %s873_s14 }
  0x2e   : > { %p878_p12 = scmp.ne.s32.totalorder (!%p293_p9), %s1134_s17, 0 }
  0x30   : > { %s1434_s13 = smov (!%p331_p10, %s874_s13), 47  ;;  %s1436_s24 = smov (!%p337_p11, %s876_s24), 47 }
  0x31   : > { %s875_s25 = sshll.u32 %s1434_s13, 2  ;;  %s877_s30 = sshll.u32 %s1436_s24, 2 }
  0x32   : > { %s1264_s29 = scalar_lea.vmem %s1417_s1, %s875_s25  ;;  %s1269_s7 = scalar_lea.vmem %s1420_s4, %s877_s30 }
  0x33   : > { %345 = sbr.rel (%p878_p12) target bundleno = 73 (0x49), region = 81 }
  0x38   : > { %vm346_vm0 = vcmask 64512   ;;  %v1152_v16 = vmov 0.0  }
  0x39   : > { %347 = vst.msk [vmem:[#allocation2] sm:$0xff] %vm346_vm0, %v1152_v16 }
  0x3a   : > { %348 = vst.msk [vmem:[#allocation2 + $0x8] sm:$0xff] %vm346_vm0, %v1152_v16 }
  0x3b   : > { %349 = vst.msk [vmem:[#allocation2 + $0x10] sm:$0xff] %vm346_vm0, %v1152_v16 }
  0x3c   : > { %350 = vst.msk [vmem:[#allocation2 + $0x18] sm:$0xff] %vm346_vm0, %v1152_v16 }
  0x3d   : > { %351 = vst.msk [vmem:[#allocation2 + $0x20] sm:$0xff] %vm346_vm0, %v1152_v16 }
  0x3e   : > { %352 = vst.msk [vmem:[#allocation2 + $0x28] sm:$0xff] %vm346_vm0, %v1152_v16 }
  0x3f   : > { %353 = vst.msk [vmem:[#allocation2 + $0x30] sm:$0xff] %vm346_vm0, %v1152_v16 }
  0x40   : > { %354 = vst.msk [vmem:[#allocation2 + $0x38] sm:$0xff] %vm346_vm0, %v1152_v16 }
  0x41   : > { %355 = vst.msk [vmem:[#allocation2 + $0x40] sm:$0xff] %vm346_vm0, %v1152_v16 }
  0x42   : > { %356 = vst.msk [vmem:[#allocation2 + $0x48] sm:$0xff] %vm346_vm0, %v1152_v16 }
  0x43   : > { %357 = vst.msk [vmem:[#allocation2 + $0x50] sm:$0xff] %vm346_vm0, %v1152_v16 }
  0x44   : > { %358 = vst.msk [vmem:[#allocation2 + $0x58] sm:$0xff] %vm346_vm0, %v1152_v16 }
  0x45   : > { %359 = vst.msk [vmem:[#allocation2 + $0x60] sm:$0xff] %vm346_vm0, %v1152_v16 }
  0x46   : > { %360 = vst.msk [vmem:[#allocation2 + $0x68] sm:$0xff] %vm346_vm0, %v1152_v16 }
  0x47   : > { %361 = vst.msk [vmem:[#allocation2 + $0x70] sm:$0xff] %vm346_vm0, %v1152_v16 }
  0x48   : > { %362 = vst.msk [vmem:[#allocation2 + $0x78] sm:$0xff] %vm346_vm0, %v1152_v16 }
  0x49 PF: > { %v977_v17 = vld [vmem:[%s1264_s29 + $0x38] sm:$0xff]  ;;  %v976_v18 = vld [vmem:[%s1264_s29 + $0x30] sm:$0xff]  ;;  %v975_v19 = vld [vmem:[%s1264_s29 + $0x28] sm:$0xff]  ;;  %vm572_vm1 = vcmask 64512   ;;  %p943_p13 = scmp.ne.s32.totalorder %s1134_s17, 2 }
  0x4a   : > { %507 = vmatpush.bf16.msra.mxu0 %v977_v17  ;;  %978 = vmatpush.bf16.msra.mxu1 %v977_v17  ;;  %v974_v20 = vld [vmem:[%s1264_s29 + $0x20] sm:$0xff]  ;;  %v973_v21 = vld [vmem:[%s1264_s29 + $0x18] sm:$0xff]  ;;  %v972_v22 = vld [vmem:[%s1264_s29 + $0x10] sm:$0xff] }
  0x4b   : > { %979 = vmatpush.bf16.msra.mxu2 %v977_v17  ;;  %980 = vmatpush.bf16.msra.mxu3 %v977_v17  ;;  %v971_v23 = vld [vmem:[%s1264_s29 + $0x8] sm:$0xff]  ;;  %v970_v24 = vld [vmem:[%s1264_s29] sm:$0xff]  ;;  %v964_v26 = vld [vmem:[%s1271_s15 + $0x10] sm:$0xff] }
  0x4c   : > { %v962_v25 = vld [vmem:[%s1271_s15] sm:$0xff]  ;;  %v968_v28 = vld [vmem:[%s1271_s15 + $0x30] sm:$0xff]  ;;  %v963_v29 = vld [vmem:[%s1271_s15 + $0x8] sm:$0xff] }
  0x4d   : > { %v966_v27 = vld [vmem:[%s1271_s15 + $0x20] sm:$0xff]  ;;  %v965_v30 = vld [vmem:[%s1271_s15 + $0x18] sm:$0xff]  ;;  %v967_v31 = vld [vmem:[%s1271_s15 + $0x28] sm:$0xff] }
  0x4e   : > { %508 = vmatpush.bf16.msra.mxu0 %v976_v18  ;;  %981 = vmatpush.bf16.msra.mxu1 %v976_v18  ;;  %v969_v32 = vld [vmem:[%s1271_s15 + $0x38] sm:$0xff]  ;;  %v363_v33 = vld [vmem:[#allocation2] sm:$0xff]  ;;  %v364_v41 = vld [vmem:[#allocation2 + $0x8] sm:$0xff] }
  0x4f   : > { %982 = vmatpush.bf16.msra.mxu2 %v976_v18  ;;  %983 = vmatpush.bf16.msra.mxu3 %v976_v18  ;;  %v367_v34 = vld [vmem:[#allocation2 + $0x20] sm:$0xff]  ;;  %v368_v42 = vld [vmem:[#allocation2 + $0x28] sm:$0xff]  ;;  %v365_v53 = vld [vmem:[#allocation2 + $0x10] sm:$0xff] }
  0x50   : > { %v371_v39 = vld [vmem:[#allocation2 + $0x40] sm:$0xff]  ;;  %v372_v51 = vld [vmem:[#allocation2 + $0x48] sm:$0xff]  ;;  %v369_v54 = vld [vmem:[#allocation2 + $0x30] sm:$0xff] }
  0x51   : > { %v375_v40 = vld [vmem:[#allocation2 + $0x60] sm:$0xff]  ;;  %v376_v52 = vld [vmem:[#allocation2 + $0x68] sm:$0xff]  ;;  %v373_v63 = vld [vmem:[#allocation2 + $0x50] sm:$0xff] }
  0x52   : > { %509 = vmatpush.bf16.msra.mxu0 %v975_v19  ;;  %984 = vmatpush.bf16.msra.mxu1 %v975_v19  ;;  %v377_v0 = vld [vmem:[#allocation2 + $0x70] sm:$0xff]  ;;  %v366_v1 = vld [vmem:[#allocation2 + $0x18] sm:$0xff] }
  0x53   : > { %985 = vmatpush.bf16.msra.mxu2 %v975_v19  ;;  %986 = vmatpush.bf16.msra.mxu3 %v975_v19  ;;  %v370_v2 = vld [vmem:[#allocation2 + $0x38] sm:$0xff] }
  0x54   : > { %v374_v11 = vld [vmem:[#allocation2 + $0x58] sm:$0xff] }
  0x55   : > { %v378_v12 = vld [vmem:[#allocation2 + $0x78] sm:$0xff] }
  0x56   : > { %510 = vmatpush.bf16.msra.mxu0 %v974_v20  ;;  %987 = vmatpush.bf16.msra.mxu1 %v974_v20 }
  0x57   : > { %988 = vmatpush.bf16.msra.mxu2 %v974_v20  ;;  %989 = vmatpush.bf16.msra.mxu3 %v974_v20 }
  0x5a   : > { %511 = vmatpush.bf16.msra.mxu0 %v973_v21  ;;  %990 = vmatpush.bf16.msra.mxu1 %v973_v21 }
  0x5b   : > { %991 = vmatpush.bf16.msra.mxu2 %v973_v21  ;;  %992 = vmatpush.bf16.msra.mxu3 %v973_v21 }
  0x5e   : > { %512 = vmatpush.bf16.msra.mxu0 %v972_v22  ;;  %993 = vmatpush.bf16.msra.mxu1 %v972_v22 }
  0x5f   : > { %994 = vmatpush.bf16.msra.mxu2 %v972_v22  ;;  %995 = vmatpush.bf16.msra.mxu3 %v972_v22 }
  0x62   : > { %513 = vmatpush.bf16.msra.mxu0 %v971_v23  ;;  %996 = vmatpush.bf16.msra.mxu1 %v971_v23 }
  0x63   : > { %997 = vmatpush.bf16.msra.mxu2 %v971_v23  ;;  %998 = vmatpush.bf16.msra.mxu3 %v971_v23 }
  0x66   : > { %514 = vmatpush.bf16.msra.mxu0 %v970_v24  ;;  %999 = vmatpush.bf16.msra.mxu1 %v970_v24 }
  0x67   : > { %1000 = vmatpush.bf16.msra.mxu2 %v970_v24  ;;  %1001 = vmatpush.bf16.msra.mxu3 %v970_v24 }
  0x69   : > { %515 = vmatmul.bf16.vlgmr.msra.gmra.mxu0 %v962_v25  ;;  %525 = vmatmul.bf16.vlgmr.msra.gmra.mxu1 %v964_v26 }
  0x6a   : > { %535 = vmatmul.bf16.vlgmr.msra.gmra.mxu2 %v966_v27  ;;  %545 = vmatmul.bf16.vlgmr.msra.gmra.mxu3 %v968_v28 }
  0x79   : > { %520 = vmatmul.bf16.gmra.mxu0 %v963_v29  ;;  %530 = vmatmul.bf16.gmra.mxu1 %v965_v30 }
  0x7a   : > { %540 = vmatmul.bf16.gmra.mxu2 %v967_v31  ;;  %550 = vmatmul.bf16.gmra.mxu3 %v969_v32 }
  0xe6   : > { %v516_v35 = vpop.f32.mrf.mxu0  ;;  %v526_v36 = vpop.f32.mrf.mxu1 }
  0xe7   : > { %v556_v37 = vadd.f32 %v516_v35, %v363_v33  ;;  %v560_v38 = vadd.f32 %v526_v36, %v367_v34 }
  0xe9   : > { %573 = vst.msk [vmem:[#allocation2] sm:$0xff] %vm572_vm1, %v556_v37 }
  0xea   : > { %577 = vst.msk [vmem:[#allocation2 + $0x20] sm:$0xff] %vm572_vm1, %v560_v38 }
  0xed   : > { %v536_v43 = vpop.f32.mrf.mxu2  ;;  %v546_v44 = vpop.f32.mrf.mxu3 }
  0xee   : > { %v564_v45 = vadd.f32 %v536_v43, %v371_v39  ;;  %v568_v46 = vadd.f32 %v546_v44, %v375_v40  ;;  %v518_v47 = vpop.f32.mrf.mxu0  ;;  %v528_v48 = vpop.f32.mrf.mxu1 }
  0xef   : > { %v557_v49 = vadd.f32 %v518_v47, %v364_v41  ;;  %v561_v50 = vadd.f32 %v528_v48, %v368_v42 }
  0xf0   : > { %581 = vst.msk [vmem:[#allocation2 + $0x40] sm:$0xff] %vm572_vm1, %v564_v45 }
  0xf1   : > { %585 = vst.msk [vmem:[#allocation2 + $0x60] sm:$0xff] %vm572_vm1, %v568_v46 }
  0xf2   : > { %574 = vst.msk [vmem:[#allocation2 + $0x8] sm:$0xff] %vm572_vm1, %v557_v49 }
  0xf3   : > { %578 = vst.msk [vmem:[#allocation2 + $0x28] sm:$0xff] %vm572_vm1, %v561_v50 }
  0xf5   : > { %v538_v55 = vpop.f32.mrf.mxu2  ;;  %v548_v56 = vpop.f32.mrf.mxu3 }
  0xf6   : > { %v565_v57 = vadd.f32 %v538_v55, %v372_v51  ;;  %v569_v58 = vadd.f32 %v548_v56, %v376_v52  ;;  %v521_v59 = vpop.f32.mrf.mxu0  ;;  %v531_v60 = vpop.f32.mrf.mxu1 }
  0xf7   : > { %v558_v61 = vadd.f32 %v521_v59, %v365_v53  ;;  %v562_v62 = vadd.f32 %v531_v60, %v369_v54 }
  0xf8   : > { %582 = vst.msk [vmem:[#allocation2 + $0x48] sm:$0xff] %vm572_vm1, %v565_v57 }
  0xf9   : > { %586 = vst.msk [vmem:[#allocation2 + $0x68] sm:$0xff] %vm572_vm1, %v569_v58 }
  0xfa   : > { %575 = vst.msk [vmem:[#allocation2 + $0x10] sm:$0xff] %vm572_vm1, %v558_v61 }
  0xfb   : > { %579 = vst.msk [vmem:[#allocation2 + $0x30] sm:$0xff] %vm572_vm1, %v562_v62 }
  0xfd   : > { %v541_v3 = vpop.f32.mrf.mxu2  ;;  %v551_v4 = vpop.f32.mrf.mxu3 }
  0xfe   : > { %v566_v5 = vadd.f32 %v541_v3, %v373_v63  ;;  %v570_v6 = vadd.f32 %v551_v4, %v377_v0  ;;  %v523_v7 = vpop.f32.mrf.mxu0  ;;  %v533_v8 = vpop.f32.mrf.mxu1 }
  0xff   : > { %v559_v9 = vadd.f32 %v523_v7, %v366_v1  ;;  %v563_v10 = vadd.f32 %v533_v8, %v370_v2 }
 0x100   : > { %583 = vst.msk [vmem:[#allocation2 + $0x50] sm:$0xff] %vm572_vm1, %v566_v5 }
 0x101   : > { %587 = vst.msk [vmem:[#allocation2 + $0x70] sm:$0xff] %vm572_vm1, %v570_v6 }
 0x102   : > { %576 = vst.msk [vmem:[#allocation2 + $0x18] sm:$0xff] %vm572_vm1, %v559_v9 }
 0x103   : > { %580 = vst.msk [vmem:[#allocation2 + $0x38] sm:$0xff] %vm572_vm1, %v563_v10 }
 0x105   : > { %v543_v13 = vpop.f32.mrf.mxu2  ;;  %v553_v14 = vpop.f32.mrf.mxu3  ;;  %592 = sbr.rel (%p943_p13) target bundleno = 437 (0x1b5), region = 85 }
 0x106   : > { %v567_v15 = vadd.f32 %v543_v13, %v374_v11  ;;  %v571_v16 = vadd.f32 %v553_v14, %v378_v12 }
 0x108   : > { %584 = vst.msk [vmem:[#allocation2 + $0x58] sm:$0xff] %vm572_vm1, %v567_v15 }
 0x109   : > { %588 = vst.msk [vmem:[#allocation2 + $0x78] sm:$0xff] %vm572_vm1, %v571_v16 }
 0x10a   : > { %v609_v17 = vld [vmem:[%s1418_s2] sm:$0xff]  ;;  %v602_v22 = vld [vmem:[#allocation2 + $0x48] sm:$0xff]  ;;  %v603_v26 = vld [vmem:[#allocation2 + $0x50] sm:$0xff]  ;;  %vm759_vm2 = vcmask 519168  }
 0x10b   : > { %v601_v18 = vld [vmem:[#allocation2 + $0x40] sm:$0xff]  ;;  %1003 = vmatpush.msra.mxu2 %v609_v17  ;;  %1004 = vmatpush.msra.mxu3 %v609_v17  ;;  %v606_v23 = vld [vmem:[#allocation2 + $0x68] sm:$0xff]  ;;  %v607_v27 = vld [vmem:[#allocation2 + $0x70] sm:$0xff] }
 0x10c   : > { %v605_v19 = vld [vmem:[#allocation2 + $0x60] sm:$0xff]  ;;  %952 = vmatmul.msk.f32.vlgmr.msra.gmra.mxu2 %vm572_vm1, %v601_v18  ;;  %677 = vmatpush.msra.mxu0 %v609_v17  ;;  %v594_v24 = vld [vmem:[#allocation2 + $0x8] sm:$0xff]  ;;  %v595_v28 = vld [vmem:[#allocation2 + $0x10] sm:$0xff] }
 0x10d   : > { %v593_v20 = vld [vmem:[#allocation2] sm:$0xff]  ;;  %956 = vmatmul.msk.f32.vlgmr.msra.gmra.mxu3 %vm572_vm1, %v605_v19  ;;  %1002 = vmatpush.msra.mxu1 %v609_v17  ;;  %v598_v25 = vld [vmem:[#allocation2 + $0x28] sm:$0xff]  ;;  %v599_v29 = vld [vmem:[#allocation2 + $0x30] sm:$0xff] }
 0x10e   : > { %v597_v21 = vld [vmem:[#allocation2 + $0x20] sm:$0xff]  ;;  %944 = vmatmul.msk.f32.vlgmr.msra.gmra.mxu0 %vm572_vm1, %v593_v20  ;;  %v596_v32 = vld [vmem:[#allocation2 + $0x18] sm:$0xff] }
 0x10f   : > { %948 = vmatmul.msk.f32.vlgmr.msra.gmra.mxu1 %vm572_vm1, %v597_v21  ;;  %v604_v30 = vld [vmem:[#allocation2 + $0x58] sm:$0xff]  ;;  %v1345_v34 = vld [vmem:[%s1419_s3] ss:$0 sm:$0xff] }
 0x110   : > { %v608_v31 = vld [vmem:[#allocation2 + $0x78] sm:$0xff] }
 0x111   : > { %v600_v33 = vld [vmem:[#allocation2 + $0x38] sm:$0xff] }
 0x114   : > { %953 = vmatmul.msk.f32.gmra.mxu2 %vm572_vm1, %v602_v22 }
 0x115   : > { %957 = vmatmul.msk.f32.gmra.mxu3 %vm572_vm1, %v606_v23 }
 0x116   : > { %945 = vmatmul.msk.f32.gmra.mxu0 %vm572_vm1, %v594_v24 }
 0x117   : > { %949 = vmatmul.msk.f32.gmra.mxu1 %vm572_vm1, %v598_v25 }
 0x11c   : > { %954 = vmatmul.msk.f32.gmra.mxu2 %vm572_vm1, %v603_v26 }
 0x11d   : > { %958 = vmatmul.msk.f32.gmra.mxu3 %vm572_vm1, %v607_v27 }
 0x11e   : > { %946 = vmatmul.msk.f32.gmra.mxu0 %vm572_vm1, %v595_v28 }
 0x11f   : > { %950 = vmatmul.msk.f32.gmra.mxu1 %vm572_vm1, %v599_v29 }
 0x124   : > { %955 = vmatmul.msk.f32.gmra.mxu2 %vm572_vm1, %v604_v30 }
 0x125   : > { %959 = vmatmul.msk.f32.gmra.mxu3 %vm572_vm1, %v608_v31 }
 0x126   : > { %947 = vmatmul.msk.f32.gmra.mxu0 %vm572_vm1, %v596_v32 }
 0x127   : > { %951 = vmatmul.msk.f32.gmra.mxu1 %vm572_vm1, %v600_v33 }
 0x18b   : > { %v679_v35 = vpop.f32.mrf.mxu0 }
 0x18c   : > { %v691_v36 = vpop.f32.mrf.mxu1  ;;  %v680_v37 = vadd.f32 %v1345_v34, %v679_v35 }
 0x18d   : > { %v692_v38 = vadd.f32 %v1345_v34, %v691_v36 }
 0x18e   : > { %1064 = vtanh.f32 %v680_v37 }
 0x18f   : > { %1066 = vtanh.f32 %v692_v38  ;;  %v703_v39 = vpop.f32.mrf.mxu2 }
 0x190   : > { %v715_v40 = vpop.f32.mrf.mxu3  ;;  %v704_v41 = vadd.f32 %v1345_v34, %v703_v39 }
 0x191   : > { %v716_v42 = vadd.f32 %v1345_v34, %v715_v40 }
 0x192   : > { %1068 = vtanh.f32 %v704_v41 }
 0x193   : > { %1070 = vtanh.f32 %v716_v42  ;;  %v682_v43 = vpop.f32.mrf.mxu0 }
 0x194   : > { %v694_v44 = vpop.f32.mrf.mxu1  ;;  %v1065_v45 = vpop.eup %1064  ;;  %v683_v46 = vadd.f32 %v1345_v34, %v682_v43 }
 0x195   : > { %v695_v47 = vadd.f32 %v1345_v34, %v694_v44  ;;  %v1067_v48 = vpop.eup %1066  ;;  %v743_v49 = vpack.c.bf16 %v1065_v45, %v1065_v45 }
 0x196   : > { %v747_v50 = vpack.c.bf16 %v1067_v48, %v1067_v48  ;;  %1072 = vtanh.f32 %v683_v46 }
 0x197   : > { %760 = vst.msk [vmem:[%s1269_s7] sm:$0xf] %vm759_vm2, %v743_v49  ;;  %1074 = vtanh.f32 %v695_v47  ;;  %v706_v51 = vpop.f32.mrf.mxu2 }
 0x198   : > { %v718_v52 = vpop.f32.mrf.mxu3  ;;  %v1069_v53 = vpop.eup %1068  ;;  %764 = vst.msk [vmem:[%s1269_s7 + $0x10] sm:$0xf] %vm759_vm2, %v747_v50  ;;  %v707_v54 = vadd.f32 %v1345_v34, %v706_v51 }
 0x199   : > { %v719_v55 = vadd.f32 %v1345_v34, %v718_v52  ;;  %v1071_v56 = vpop.eup %1070  ;;  %v751_v57 = vpack.c.bf16 %v1069_v53, %v1069_v53 }
 0x19a   : > { %v755_v58 = vpack.c.bf16 %v1071_v56, %v1071_v56  ;;  %1076 = vtanh.f32 %v707_v54 }
 0x19b   : > { %768 = vst.msk [vmem:[%s1269_s7 + $0x20] sm:$0xf] %vm759_vm2, %v751_v57  ;;  %1078 = vtanh.f32 %v719_v55  ;;  %v685_v59 = vpop.f32.mrf.mxu0 }
 0x19c   : > { %v697_v60 = vpop.f32.mrf.mxu1  ;;  %v1073_v61 = vpop.eup %1072  ;;  %772 = vst.msk [vmem:[%s1269_s7 + $0x30] sm:$0xf] %vm759_vm2, %v755_v58  ;;  %v686_v62 = vadd.f32 %v1345_v34, %v685_v59 }
 0x19d   : > { %v698_v63 = vadd.f32 %v1345_v34, %v697_v60  ;;  %v1075_v0 = vpop.eup %1074  ;;  %v744_v1 = vpack.c.bf16 %v1073_v61, %v1073_v61 }
 0x19e   : > { %v748_v2 = vpack.c.bf16 %v1075_v0, %v1075_v0  ;;  %1080 = vtanh.f32 %v686_v62 }
 0x19f   : > { %761 = vst.msk [vmem:[%s1269_s7 + $0x4] sm:$0xf] %vm759_vm2, %v744_v1  ;;  %1082 = vtanh.f32 %v698_v63  ;;  %v709_v3 = vpop.f32.mrf.mxu2 }
 0x1a0   : > { %v721_v4 = vpop.f32.mrf.mxu3  ;;  %v1077_v5 = vpop.eup %1076  ;;  %765 = vst.msk [vmem:[%s1269_s7 + $0x14] sm:$0xf] %vm759_vm2, %v748_v2  ;;  %v710_v6 = vadd.f32 %v1345_v34, %v709_v3 }
 0x1a1   : > { %v722_v7 = vadd.f32 %v1345_v34, %v721_v4  ;;  %v1079_v8 = vpop.eup %1078  ;;  %v752_v9 = vpack.c.bf16 %v1077_v5, %v1077_v5 }
 0x1a2   : > { %v756_v10 = vpack.c.bf16 %v1079_v8, %v1079_v8  ;;  %1084 = vtanh.f32 %v710_v6 }
 0x1a3   : > { %769 = vst.msk [vmem:[%s1269_s7 + $0x24] sm:$0xf] %vm759_vm2, %v752_v9  ;;  %1086 = vtanh.f32 %v722_v7  ;;  %v688_v11 = vpop.f32.mrf.mxu0 }
 0x1a4   : > { %v700_v12 = vpop.f32.mrf.mxu1  ;;  %v1081_v13 = vpop.eup %1080  ;;  %773 = vst.msk [vmem:[%s1269_s7 + $0x34] sm:$0xf] %vm759_vm2, %v756_v10  ;;  %v689_v14 = vadd.f32 %v1345_v34, %v688_v11 }
 0x1a5   : > { %v701_v15 = vadd.f32 %v1345_v34, %v700_v12  ;;  %v1083_v16 = vpop.eup %1082  ;;  %v745_v17 = vpack.c.bf16 %v1081_v13, %v1081_v13 }
 0x1a6   : > { %v749_v18 = vpack.c.bf16 %v1083_v16, %v1083_v16  ;;  %1088 = vtanh.f32 %v689_v14 }
 0x1a7   : > { %762 = vst.msk [vmem:[%s1269_s7 + $0x8] sm:$0xf] %vm759_vm2, %v745_v17  ;;  %1090 = vtanh.f32 %v701_v15  ;;  %v712_v19 = vpop.f32.mrf.mxu2 }
 0x1a8   : > { %v724_v20 = vpop.f32.mrf.mxu3  ;;  %v1085_v21 = vpop.eup %1084  ;;  %766 = vst.msk [vmem:[%s1269_s7 + $0x18] sm:$0xf] %vm759_vm2, %v749_v18  ;;  %v713_v22 = vadd.f32 %v1345_v34, %v712_v19 }
 0x1a9   : > { %v725_v23 = vadd.f32 %v1345_v34, %v724_v20  ;;  %v1087_v24 = vpop.eup %1086  ;;  %v753_v25 = vpack.c.bf16 %v1085_v21, %v1085_v21 }
 0x1aa   : > { %v757_v26 = vpack.c.bf16 %v1087_v24, %v1087_v24  ;;  %1092 = vtanh.f32 %v713_v22 }
 0x1ab   : > { %770 = vst.msk [vmem:[%s1269_s7 + $0x28] sm:$0xf] %vm759_vm2, %v753_v25  ;;  %1094 = vtanh.f32 %v725_v23 }
 0x1ac   : > { %v1089_v27 = vpop.eup %1088  ;;  %774 = vst.msk [vmem:[%s1269_s7 + $0x38] sm:$0xf] %vm759_vm2, %v757_v26 }
 0x1ad   : > { %v1091_v28 = vpop.eup %1090  ;;  %v746_v29 = vpack.c.bf16 %v1089_v27, %v1089_v27 }
 0x1ae   : > { %v750_v30 = vpack.c.bf16 %v1091_v28, %v1091_v28 }
 0x1af   : > { %763 = vst.msk [vmem:[%s1269_s7 + $0xc] sm:$0xf] %vm759_vm2, %v746_v29 }
 0x1b0   : > { %v1093_v31 = vpop.eup %1092  ;;  %767 = vst.msk [vmem:[%s1269_s7 + $0x1c] sm:$0xf] %vm759_vm2, %v750_v30 }
 0x1b1   : > { %v1095_v32 = vpop.eup %1094  ;;  %v754_v33 = vpack.c.bf16 %v1093_v31, %v1093_v31 }
 0x1b2   : > { %v758_v34 = vpack.c.bf16 %v1095_v32, %v1095_v32 }
 0x1b3   : > { %771 = vst.msk [vmem:[%s1269_s7 + $0x2c] sm:$0xf] %vm759_vm2, %v754_v33 }
 0x1b4   : > { %775 = vst.msk [vmem:[%s1269_s7 + $0x3c] sm:$0xf] %vm759_vm2, %v758_v34 }
 0x1b5 PF: > { %s14_s21 = sadd.s32 1, %s1150_s21   ;;  %s1421_s15 = smov %s1130_s16 }
 0x1b6   : > { %p11_p0 = scmp.ge.s32.totalorder %s14_s21, 11   ;;  %s1422_s16 = smov %s1229_s28 }
 0x1b7   : > { %s1423_s17 = smov %s1142_s19  ;;  %s1424_s18 = smov %s1146_s20 }
 0x1b8   : > { %s1425_s19 = smov %s1428_s22  ;;  %s1426_s20 = smov %s1432_s23 }
 0x1b9   :  { %13 = sbr.rel (!%p11_p0) target bundleno = 4 (0x4), region = 123 }

// kernel: gcn_forward.6
= control target key start
LH: loop header
LB: loop body
LE: loop exit
PB: predicated region body
PF: predicated region fallthrough
CT: control target
= control target key end

     0   :  { %s1206_s15 = smov 0   ;;  %s1208_s16 = smov 0   ;;  %s1465_s0 = inlined_call_operand.vmem [shape: bf16[384,384], index: 0, kind: input, shape index: {}]   ;;  %s1466_s1 = inlined_call_operand.vmem [shape: bf16[384,64], index: 1, kind: input, shape index: {}]   ;;  %s1467_s2 = inlined_call_operand.vmem [shape: f32[64,64], index: 2, kind: input, shape index: {}]   ;;  %s1468_s3 = inlined_call_operand.vmem [shape: f32[1,64], index: 3, kind: input, shape index: {}]   ;;  %s1469_s4 = inlined_call_operand.vmem [shape: bf16[384,64], index: 4, kind: output, shape index: {}]  }
   0x1   :  { %s1210_s17 = smov 0   ;;  %s1212_s18 = smov 0  }
   0x2   :  { %s1214_s19 = smov 0   ;;  %s1216_s20 = smov 0  }
   0x3   :  { %s1218_s21 = smov 0  }
   0x4 LB: > { %s23_s22 = sadd.s32 1, %s1170_s19  ;;  %s26_s23 = sadd.s32 1, %s1174_s20  ;;  %s1178_s21 = sphi %s1218_s21, %s14_s21   ;;  %s1174_s20 = sphi %s1216_s20, %s1475_s20   ;;  %s1170_s19 = sphi %s1214_s19, %s1474_s19   ;;  %s1166_s18 = sphi %s1212_s18, %s1473_s18   ;;  %s1162_s17 = sphi %s1210_s17, %s1472_s17   ;;  %s1158_s16 = sphi %s1208_s16, %s1471_s16   ;;  %s1154_s15 = sphi %s1206_s15, %s1470_s15  }
   0x5   : > { %p24_p0 = scmp.ge.s32.totalorder %s23_s22, 3  ;;  %p42_p1 = scmp.ne.s32.totalorder %s1158_s16, %s1154_s15 }
   0x6   : > { %p43_p2 = scmp.eq.s32.totalorder %s1178_s21, 0  ;;  %s35_s27 = sadd.s32 1, %s1158_s16 }
   0x7   : > { %s1477_s22 = smov (%p24_p0, %s23_s22), 0  ;;  %s1479_s23 = smov (!%p24_p0, %s26_s23), %s1174_s20 }
   0x8   : > { %p44_p3 = por %p43_p2, %p42_p1  ;;  %p28_p4 = scmp.ge.s32.totalorder %s1479_s23, 3 }
   0x9   : > { %s31_s24 = ssub.s32 %s1170_s19, %s1477_s22  ;;  %p874_p6 = scmp.ge.s32.totalorder %s1178_s21, 9 }
   0xa   : > { %s1481_s23 = smov (%p28_p4, %s1479_s23), 0 }
   0xb   : > { %s30_s25 = ssub.s32 %s1174_s20, %s1481_s23  ;;  %168 = sbr.rel (%p874_p6) target bundleno = 39 (0x27), region = 24 }
   0xc   : > { %s32_s26 = sor.u32 %s31_s24, %s30_s25 }
   0xd   : > { %p33_p5 = scmp.eq.s32.totalorder %s32_s26, 0 }
   0xf   : > { %s1257_s28 = scalar_select %p33_p5, %s1158_s16, %s35_s27  }
  0x10   : > { %171 = sbr.rel (!%p44_p3) target bundleno = 39 (0x27), region = 28  ;;  %s173_s29 = sand.u32 (%p44_p3), 1, %s1158_s16  }
  0x11   : > { %s1033_s30 = smul.u32 (%p44_p3), 48, %s1174_s20  ;;  %s875_s5 = sshll.u32 (%p44_p3), %s173_s29, 6 }
  0x12   : > { %s175_s11 = scalar_lea.vmem (%p44_p3), [#allocation3], %s875_s5 }
  0x13   : > { %s178_s6 = sadd.s32 (%p44_p3), %s1170_s19, %s1033_s30 }
  0x14   : > { %s878_s7 = sshll.u32 (%p44_p3), %s178_s6, 2 }
  0x15   : > { %s1266_s10 = scalar_lea.vmem %s1465_s0, %s878_s7 }
  0x16   : > { %v197_v0 = vld [vmem:[%s1266_s10] sm:$0xf]  ;;  %v199_v1 = vld [vmem:[%s1266_s10 + $0xc] sm:$0xf]  ;;  %v201_v2 = vld [vmem:[%s1266_s10 + $0x18] sm:$0xf] }
  0x17   : > { %198 = vst [vmem:[%s175_s11] sm:$0xf] %v197_v0  ;;  %v203_v3 = vld [vmem:[%s1266_s10 + $0x24] sm:$0xf]  ;;  %v205_v4 = vld [vmem:[%s1266_s10 + $0x30] sm:$0xf] }
  0x18   : > { %200 = vst [vmem:[%s175_s11 + $0x4] sm:$0xf] %v199_v1  ;;  %v207_v5 = vld [vmem:[%s1266_s10 + $0x3c] sm:$0xf]  ;;  %v209_v6 = vld [vmem:[%s1266_s10 + $0x48] sm:$0xf] }
  0x19   : > { %202 = vst [vmem:[%s175_s11 + $0x8] sm:$0xf] %v201_v2  ;;  %v211_v7 = vld [vmem:[%s1266_s10 + $0x54] sm:$0xf]  ;;  %v213_v8 = vld [vmem:[%s1266_s10 + $0x60] sm:$0xf] }
  0x1a   : > { %204 = vst [vmem:[%s175_s11 + $0xc] sm:$0xf] %v203_v3  ;;  %v215_v9 = vld [vmem:[%s1266_s10 + $0x6c] sm:$0xf]  ;;  %v217_v10 = vld [vmem:[%s1266_s10 + $0x78] sm:$0xf] }
  0x1b   : > { %206 = vst [vmem:[%s175_s11 + $0x10] sm:$0xf] %v205_v4  ;;  %v219_v11 = vld [vmem:[%s1266_s10 + $0x84] sm:$0xf]  ;;  %v221_v12 = vld [vmem:[%s1266_s10 + $0x90] sm:$0xf] }
  0x1c   : > { %208 = vst [vmem:[%s175_s11 + $0x14] sm:$0xf] %v207_v5  ;;  %v223_v13 = vld [vmem:[%s1266_s10 + $0x9c] sm:$0xf]  ;;  %v225_v14 = vld [vmem:[%s1266_s10 + $0xa8] sm:$0xf] }
  0x1d   : > { %210 = vst [vmem:[%s175_s11 + $0x18] sm:$0xf] %v209_v6  ;;  %v227_v15 = vld [vmem:[%s1266_s10 + $0xb4] sm:$0xf] }
  0x1e   : > { %212 = vst [vmem:[%s175_s11 + $0x1c] sm:$0xf] %v211_v7 }
  0x1f   : > { %214 = vst [vmem:[%s175_s11 + $0x20] sm:$0xf] %v213_v8 }
  0x20   : > { %216 = vst [vmem:[%s175_s11 + $0x24] sm:$0xf] %v215_v9 }
  0x21   : > { %218 = vst [vmem:[%s175_s11 + $0x28] sm:$0xf] %v217_v10 }
  0x22   : > { %220 = vst [vmem:[%s175_s11 + $0x2c] sm:$0xf] %v219_v11 }
  0x23   : > { %222 = vst [vmem:[%s175_s11 + $0x30] sm:$0xf] %v221_v12 }
  0x24   : > { %224 = vst [vmem:[%s175_s11 + $0x34] sm:$0xf] %v223_v13 }
  0x25   : > { %226 = vst [vmem:[%s175_s11 + $0x38] sm:$0xf] %v225_v14 }
  0x26   : > { %228 = vst [vmem:[%s175_s11 + $0x3c] sm:$0xf] %v227_v15 }
  0x27 PF: > { %p879_p7 = scmp.ge.s32.totalorder %s1178_s21, 1  ;;  %p292_p8 = scmp.lt.s32.totalorder %s1178_s21, 10 }
  0x29   : > { %p293_p9 = pnand %p879_p7, %p292_p8 }
  0x2a   : > { %s299_s12 = sand.u32 (!%p293_p9), 1, %s1154_s15   ;;  %s881_s13 = sshll.u32 (!%p293_p9), %s1162_s17, 4 }
  0x2b   : > { %296 = sbr.rel (%p293_p9) target bundleno = 451 (0x1c3), region = 73  ;;  %s880_s14 = sshll.u32 (!%p293_p9), %s299_s12, 6 }
  0x2c   : > { %p331_p10 = scmp.lt.s32.totalorder (!%p293_p9), %s881_s13, 47  ;;  %s883_s24 = sshll.u32 (!%p293_p9), %s1166_s18, 4 }
  0x2d   : > { %p337_p11 = scmp.lt.s32.totalorder (!%p293_p9), %s883_s24, 47  ;;  %s1299_s15 = scalar_lea.vmem (!%p293_p9), [#allocation3], %s880_s14 }
  0x2e   : > { %p885_p12 = scmp.ne.s32.totalorder (!%p293_p9), %s1162_s17, 0 }
  0x30   : > { %s1483_s13 = smov (!%p331_p10, %s881_s13), 47  ;;  %s1485_s24 = smov (!%p337_p11, %s883_s24), 47 }
  0x31   : > { %s882_s25 = sshll.u32 %s1483_s13, 2  ;;  %s884_s30 = sshll.u32 %s1485_s24, 2 }
  0x32   : > { %s1292_s29 = scalar_lea.vmem %s1466_s1, %s882_s25  ;;  %s1297_s7 = scalar_lea.vmem %s1469_s4, %s884_s30 }
  0x33   : > { %345 = sbr.rel (%p885_p12) target bundleno = 73 (0x49), region = 81 }
  0x38   : > { %vm346_vm0 = vcmask 523264   ;;  %v1180_v16 = vmov 0.0  }
  0x39   : > { %347 = vst.msk [vmem:[#allocation2] sm:$0xff] %vm346_vm0, %v1180_v16 }
  0x3a   : > { %348 = vst.msk [vmem:[#allocation2 + $0x8] sm:$0xff] %vm346_vm0, %v1180_v16 }
  0x3b   : > { %349 = vst.msk [vmem:[#allocation2 + $0x10] sm:$0xff] %vm346_vm0, %v1180_v16 }
  0x3c   : > { %350 = vst.msk [vmem:[#allocation2 + $0x18] sm:$0xff] %vm346_vm0, %v1180_v16 }
  0x3d   : > { %351 = vst.msk [vmem:[#allocation2 + $0x20] sm:$0xff] %vm346_vm0, %v1180_v16 }
  0x3e   : > { %352 = vst.msk [vmem:[#allocation2 + $0x28] sm:$0xff] %vm346_vm0, %v1180_v16 }
  0x3f   : > { %353 = vst.msk [vmem:[#allocation2 + $0x30] sm:$0xff] %vm346_vm0, %v1180_v16 }
  0x40   : > { %354 = vst.msk [vmem:[#allocation2 + $0x38] sm:$0xff] %vm346_vm0, %v1180_v16 }
  0x41   : > { %355 = vst.msk [vmem:[#allocation2 + $0x40] sm:$0xff] %vm346_vm0, %v1180_v16 }
  0x42   : > { %356 = vst.msk [vmem:[#allocation2 + $0x48] sm:$0xff] %vm346_vm0, %v1180_v16 }
  0x43   : > { %357 = vst.msk [vmem:[#allocation2 + $0x50] sm:$0xff] %vm346_vm0, %v1180_v16 }
  0x44   : > { %358 = vst.msk [vmem:[#allocation2 + $0x58] sm:$0xff] %vm346_vm0, %v1180_v16 }
  0x45   : > { %359 = vst.msk [vmem:[#allocation2 + $0x60] sm:$0xff] %vm346_vm0, %v1180_v16 }
  0x46   : > { %360 = vst.msk [vmem:[#allocation2 + $0x68] sm:$0xff] %vm346_vm0, %v1180_v16 }
  0x47   : > { %361 = vst.msk [vmem:[#allocation2 + $0x70] sm:$0xff] %vm346_vm0, %v1180_v16 }
  0x48   : > { %362 = vst.msk [vmem:[#allocation2 + $0x78] sm:$0xff] %vm346_vm0, %v1180_v16 }
  0x49 PF: > { %v984_v17 = vld [vmem:[%s1292_s29 + $0x38] sm:$0xff]  ;;  %v983_v18 = vld [vmem:[%s1292_s29 + $0x30] sm:$0xff]  ;;  %v982_v19 = vld [vmem:[%s1292_s29 + $0x28] sm:$0xff]  ;;  %vm572_vm1 = vcmask 523264   ;;  %p950_p13 = scmp.ne.s32.totalorder %s1162_s17, 2 }
  0x4a   : > { %507 = vmatpush.bf16.msra.mxu0 %v984_v17  ;;  %985 = vmatpush.bf16.msra.mxu1 %v984_v17  ;;  %v981_v20 = vld [vmem:[%s1292_s29 + $0x20] sm:$0xff]  ;;  %v980_v21 = vld [vmem:[%s1292_s29 + $0x18] sm:$0xff]  ;;  %v979_v22 = vld [vmem:[%s1292_s29 + $0x10] sm:$0xff] }
  0x4b   : > { %986 = vmatpush.bf16.msra.mxu2 %v984_v17  ;;  %987 = vmatpush.bf16.msra.mxu3 %v984_v17  ;;  %v978_v23 = vld [vmem:[%s1292_s29 + $0x8] sm:$0xff]  ;;  %v977_v24 = vld [vmem:[%s1292_s29] sm:$0xff]  ;;  %v971_v26 = vld [vmem:[%s1299_s15 + $0x10] sm:$0xff] }
  0x4c   : > { %v969_v25 = vld [vmem:[%s1299_s15] sm:$0xff]  ;;  %v975_v28 = vld [vmem:[%s1299_s15 + $0x30] sm:$0xff]  ;;  %v970_v29 = vld [vmem:[%s1299_s15 + $0x8] sm:$0xff] }
  0x4d   : > { %v973_v27 = vld [vmem:[%s1299_s15 + $0x20] sm:$0xff]  ;;  %v972_v30 = vld [vmem:[%s1299_s15 + $0x18] sm:$0xff]  ;;  %v974_v31 = vld [vmem:[%s1299_s15 + $0x28] sm:$0xff] }
  0x4e   : > { %508 = vmatpush.bf16.msra.mxu0 %v983_v18  ;;  %988 = vmatpush.bf16.msra.mxu1 %v983_v18  ;;  %v976_v32 = vld [vmem:[%s1299_s15 + $0x38] sm:$0xff]  ;;  %v363_v33 = vld [vmem:[#allocation2] sm:$0xff]  ;;  %v364_v41 = vld [vmem:[#allocation2 + $0x8] sm:$0xff] }
  0x4f   : > { %989 = vmatpush.bf16.msra.mxu2 %v983_v18  ;;  %990 = vmatpush.bf16.msra.mxu3 %v983_v18  ;;  %v367_v34 = vld [vmem:[#allocation2 + $0x20] sm:$0xff]  ;;  %v368_v42 = vld [vmem:[#allocation2 + $0x28] sm:$0xff]  ;;  %v365_v53 = vld [vmem:[#allocation2 + $0x10] sm:$0xff] }
  0x50   : > { %v371_v39 = vld [vmem:[#allocation2 + $0x40] sm:$0xff]  ;;  %v372_v51 = vld [vmem:[#allocation2 + $0x48] sm:$0xff]  ;;  %v369_v54 = vld [vmem:[#allocation2 + $0x30] sm:$0xff] }
  0x51   : > { %v375_v40 = vld [vmem:[#allocation2 + $0x60] sm:$0xff]  ;;  %v376_v52 = vld [vmem:[#allocation2 + $0x68] sm:$0xff]  ;;  %v373_v63 = vld [vmem:[#allocation2 + $0x50] sm:$0xff] }
  0x52   : > { %509 = vmatpush.bf16.msra.mxu0 %v982_v19  ;;  %991 = vmatpush.bf16.msra.mxu1 %v982_v19  ;;  %v377_v0 = vld [vmem:[#allocation2 + $0x70] sm:$0xff]  ;;  %v366_v1 = vld [vmem:[#allocation2 + $0x18] sm:$0xff] }
  0x53   : > { %992 = vmatpush.bf16.msra.mxu2 %v982_v19  ;;  %993 = vmatpush.bf16.msra.mxu3 %v982_v19  ;;  %v370_v2 = vld [vmem:[#allocation2 + $0x38] sm:$0xff] }
  0x54   : > { %v374_v11 = vld [vmem:[#allocation2 + $0x58] sm:$0xff] }
  0x55   : > { %v378_v12 = vld [vmem:[#allocation2 + $0x78] sm:$0xff] }
  0x56   : > { %510 = vmatpush.bf16.msra.mxu0 %v981_v20  ;;  %994 = vmatpush.bf16.msra.mxu1 %v981_v20 }
  0x57   : > { %995 = vmatpush.bf16.msra.mxu2 %v981_v20  ;;  %996 = vmatpush.bf16.msra.mxu3 %v981_v20 }
  0x5a   : > { %511 = vmatpush.bf16.msra.mxu0 %v980_v21  ;;  %997 = vmatpush.bf16.msra.mxu1 %v980_v21 }
  0x5b   : > { %998 = vmatpush.bf16.msra.mxu2 %v980_v21  ;;  %999 = vmatpush.bf16.msra.mxu3 %v980_v21 }
  0x5e   : > { %512 = vmatpush.bf16.msra.mxu0 %v979_v22  ;;  %1000 = vmatpush.bf16.msra.mxu1 %v979_v22 }
  0x5f   : > { %1001 = vmatpush.bf16.msra.mxu2 %v979_v22  ;;  %1002 = vmatpush.bf16.msra.mxu3 %v979_v22 }
  0x62   : > { %513 = vmatpush.bf16.msra.mxu0 %v978_v23  ;;  %1003 = vmatpush.bf16.msra.mxu1 %v978_v23 }
  0x63   : > { %1004 = vmatpush.bf16.msra.mxu2 %v978_v23  ;;  %1005 = vmatpush.bf16.msra.mxu3 %v978_v23 }
  0x66   : > { %514 = vmatpush.bf16.msra.mxu0 %v977_v24  ;;  %1006 = vmatpush.bf16.msra.mxu1 %v977_v24 }
  0x67   : > { %1007 = vmatpush.bf16.msra.mxu2 %v977_v24  ;;  %1008 = vmatpush.bf16.msra.mxu3 %v977_v24 }
  0x69   : > { %515 = vmatmul.bf16.vlgmr.msra.gmra.mxu0 %v969_v25  ;;  %525 = vmatmul.bf16.vlgmr.msra.gmra.mxu1 %v971_v26 }
  0x6a   : > { %535 = vmatmul.bf16.vlgmr.msra.gmra.mxu2 %v973_v27  ;;  %545 = vmatmul.bf16.vlgmr.msra.gmra.mxu3 %v975_v28 }
  0x79   : > { %520 = vmatmul.bf16.gmra.mxu0 %v970_v29  ;;  %530 = vmatmul.bf16.gmra.mxu1 %v972_v30 }
  0x7a   : > { %540 = vmatmul.bf16.gmra.mxu2 %v974_v31  ;;  %550 = vmatmul.bf16.gmra.mxu3 %v976_v32 }
  0xe6   : > { %v516_v35 = vpop.f32.mrf.mxu0  ;;  %v526_v36 = vpop.f32.mrf.mxu1 }
  0xe7   : > { %v556_v37 = vadd.f32 %v516_v35, %v363_v33  ;;  %v560_v38 = vadd.f32 %v526_v36, %v367_v34 }
  0xe9   : > { %573 = vst.msk [vmem:[#allocation2] sm:$0xff] %vm572_vm1, %v556_v37 }
  0xea   : > { %577 = vst.msk [vmem:[#allocation2 + $0x20] sm:$0xff] %vm572_vm1, %v560_v38 }
  0xed   : > { %v536_v43 = vpop.f32.mrf.mxu2  ;;  %v546_v44 = vpop.f32.mrf.mxu3 }
  0xee   : > { %v564_v45 = vadd.f32 %v536_v43, %v371_v39  ;;  %v568_v46 = vadd.f32 %v546_v44, %v375_v40  ;;  %v518_v47 = vpop.f32.mrf.mxu0  ;;  %v528_v48 = vpop.f32.mrf.mxu1 }
  0xef   : > { %v557_v49 = vadd.f32 %v518_v47, %v364_v41  ;;  %v561_v50 = vadd.f32 %v528_v48, %v368_v42 }
  0xf0   : > { %581 = vst.msk [vmem:[#allocation2 + $0x40] sm:$0xff] %vm572_vm1, %v564_v45 }
  0xf1   : > { %585 = vst.msk [vmem:[#allocation2 + $0x60] sm:$0xff] %vm572_vm1, %v568_v46 }
  0xf2   : > { %574 = vst.msk [vmem:[#allocation2 + $0x8] sm:$0xff] %vm572_vm1, %v557_v49 }
  0xf3   : > { %578 = vst.msk [vmem:[#allocation2 + $0x28] sm:$0xff] %vm572_vm1, %v561_v50 }
  0xf5   : > { %v538_v55 = vpop.f32.mrf.mxu2  ;;  %v548_v56 = vpop.f32.mrf.mxu3 }
  0xf6   : > { %v565_v57 = vadd.f32 %v538_v55, %v372_v51  ;;  %v569_v58 = vadd.f32 %v548_v56, %v376_v52  ;;  %v521_v59 = vpop.f32.mrf.mxu0  ;;  %v531_v60 = vpop.f32.mrf.mxu1 }
  0xf7   : > { %v558_v61 = vadd.f32 %v521_v59, %v365_v53  ;;  %v562_v62 = vadd.f32 %v531_v60, %v369_v54 }
  0xf8   : > { %582 = vst.msk [vmem:[#allocation2 + $0x48] sm:$0xff] %vm572_vm1, %v565_v57 }
  0xf9   : > { %586 = vst.msk [vmem:[#allocation2 + $0x68] sm:$0xff] %vm572_vm1, %v569_v58 }
  0xfa   : > { %575 = vst.msk [vmem:[#allocation2 + $0x10] sm:$0xff] %vm572_vm1, %v558_v61 }
  0xfb   : > { %579 = vst.msk [vmem:[#allocation2 + $0x30] sm:$0xff] %vm572_vm1, %v562_v62 }
  0xfd   : > { %v541_v3 = vpop.f32.mrf.mxu2  ;;  %v551_v4 = vpop.f32.mrf.mxu3 }
  0xfe   : > { %v566_v5 = vadd.f32 %v541_v3, %v373_v63  ;;  %v570_v6 = vadd.f32 %v551_v4, %v377_v0  ;;  %v523_v7 = vpop.f32.mrf.mxu0  ;;  %v533_v8 = vpop.f32.mrf.mxu1 }
  0xff   : > { %v559_v9 = vadd.f32 %v523_v7, %v366_v1  ;;  %v563_v10 = vadd.f32 %v533_v8, %v370_v2 }
 0x100   : > { %583 = vst.msk [vmem:[#allocation2 + $0x50] sm:$0xff] %vm572_vm1, %v566_v5 }
 0x101   : > { %587 = vst.msk [vmem:[#allocation2 + $0x70] sm:$0xff] %vm572_vm1, %v570_v6 }
 0x102   : > { %576 = vst.msk [vmem:[#allocation2 + $0x18] sm:$0xff] %vm572_vm1, %v559_v9 }
 0x103   : > { %580 = vst.msk [vmem:[#allocation2 + $0x38] sm:$0xff] %vm572_vm1, %v563_v10 }
 0x105   : > { %v543_v13 = vpop.f32.mrf.mxu2  ;;  %v553_v14 = vpop.f32.mrf.mxu3  ;;  %592 = sbr.rel (%p950_p13) target bundleno = 451 (0x1c3), region = 85 }
 0x106   : > { %v567_v15 = vadd.f32 %v543_v13, %v374_v11  ;;  %v571_v16 = vadd.f32 %v553_v14, %v378_v12 }
 0x108   : > { %584 = vst.msk [vmem:[#allocation2 + $0x58] sm:$0xff] %vm572_vm1, %v567_v15 }
 0x109   : > { %588 = vst.msk [vmem:[#allocation2 + $0x78] sm:$0xff] %vm572_vm1, %v571_v16 }
 0x10a   : > { %v616_v17 = vld [vmem:[%s1467_s2 + $0x38] sm:$0xff]  ;;  %v615_v18 = vld [vmem:[%s1467_s2 + $0x30] sm:$0xff]  ;;  %v614_v19 = vld [vmem:[%s1467_s2 + $0x28] sm:$0xff]  ;;  %vm766_vm2 = vcmask 519168  }
 0x10b   : > { %1010 = vmatpush.msra.mxu2 %v616_v17  ;;  %1011 = vmatpush.msra.mxu3 %v616_v17  ;;  %v613_v20 = vld [vmem:[%s1467_s2 + $0x20] sm:$0xff]  ;;  %v612_v21 = vld [vmem:[%s1467_s2 + $0x18] sm:$0xff]  ;;  %v611_v22 = vld [vmem:[%s1467_s2 + $0x10] sm:$0xff] }
 0x10c   : > { %677 = vmatpush.msra.mxu0 %v616_v17  ;;  %1009 = vmatpush.msra.mxu1 %v616_v17  ;;  %v610_v23 = vld [vmem:[%s1467_s2 + $0x8] sm:$0xff]  ;;  %v609_v24 = vld [vmem:[%s1467_s2] sm:$0xff]  ;;  %v603_v33 = vld [vmem:[#allocation2 + $0x50] sm:$0xff] }
 0x10d   : > { %1013 = vmatpush.msra.mxu2 %v615_v18  ;;  %1014 = vmatpush.msra.mxu3 %v615_v18  ;;  %v601_v25 = vld [vmem:[#allocation2 + $0x40] sm:$0xff]  ;;  %v602_v29 = vld [vmem:[#allocation2 + $0x48] sm:$0xff]  ;;  %v607_v34 = vld [vmem:[#allocation2 + $0x70] sm:$0xff] }
 0x10e   : > { %678 = vmatpush.msra.mxu0 %v615_v18  ;;  %1012 = vmatpush.msra.mxu1 %v615_v18  ;;  %v605_v26 = vld [vmem:[#allocation2 + $0x60] sm:$0xff]  ;;  %v606_v30 = vld [vmem:[#allocation2 + $0x68] sm:$0xff]  ;;  %v595_v35 = vld [vmem:[#allocation2 + $0x10] sm:$0xff] }
 0x10f   : > { %1016 = vmatpush.msra.mxu2 %v614_v19  ;;  %1017 = vmatpush.msra.mxu3 %v614_v19  ;;  %v593_v27 = vld [vmem:[#allocation2] sm:$0xff]  ;;  %v594_v31 = vld [vmem:[#allocation2 + $0x8] sm:$0xff]  ;;  %v599_v36 = vld [vmem:[#allocation2 + $0x30] sm:$0xff] }
 0x110   : > { %679 = vmatpush.msra.mxu0 %v614_v19  ;;  %1015 = vmatpush.msra.mxu1 %v614_v19  ;;  %v597_v28 = vld [vmem:[#allocation2 + $0x20] sm:$0xff]  ;;  %v598_v32 = vld [vmem:[#allocation2 + $0x28] sm:$0xff]  ;;  %v604_v37 = vld [vmem:[#allocation2 + $0x58] sm:$0xff] }
 0x111   : > { %1019 = vmatpush.msra.mxu2 %v613_v20  ;;  %1020 = vmatpush.msra.mxu3 %v613_v20  ;;  %v608_v38 = vld [vmem:[#allocation2 + $0x78] sm:$0xff]  ;;  %v1394_v41 = vld [vmem:[%s1468_s3] ss:$0 sm:$0xff] }
 0x112   : > { %680 = vmatpush.msra.mxu0 %v613_v20  ;;  %1018 = vmatpush.msra.mxu1 %v613_v20  ;;  %v596_v39 = vld [vmem:[#allocation2 + $0x18] sm:$0xff] }
 0x113   : > { %1022 = vmatpush.msra.mxu2 %v612_v21  ;;  %1023 = vmatpush.msra.mxu3 %v612_v21  ;;  %v600_v40 = vld [vmem:[#allocation2 + $0x38] sm:$0xff] }
 0x114   : > { %681 = vmatpush.msra.mxu0 %v612_v21  ;;  %1021 = vmatpush.msra.mxu1 %v612_v21 }
 0x115   : > { %1025 = vmatpush.msra.mxu2 %v611_v22  ;;  %1026 = vmatpush.msra.mxu3 %v611_v22 }
 0x116   : > { %682 = vmatpush.msra.mxu0 %v611_v22  ;;  %1024 = vmatpush.msra.mxu1 %v611_v22 }
 0x117   : > { %1028 = vmatpush.msra.mxu2 %v610_v23  ;;  %1029 = vmatpush.msra.mxu3 %v610_v23 }
 0x118   : > { %683 = vmatpush.msra.mxu0 %v610_v23  ;;  %1027 = vmatpush.msra.mxu1 %v610_v23 }
 0x119   : > { %1031 = vmatpush.msra.mxu2 %v609_v24  ;;  %1032 = vmatpush.msra.mxu3 %v609_v24 }
 0x11a   : > { %959 = vmatmul.msk.f32.vlgmr.msra.gmra.mxu2 %vm572_vm1, %v601_v25  ;;  %963 = vmatmul.msk.f32.vlgmr.msra.gmra.mxu3 %vm572_vm1, %v605_v26 }
 0x11b   : > { %684 = vmatpush.msra.mxu0 %v609_v24  ;;  %1030 = vmatpush.msra.mxu1 %v609_v24 }
 0x11c   : > { %951 = vmatmul.msk.f32.vlgmr.msra.gmra.mxu0 %vm572_vm1, %v593_v27  ;;  %955 = vmatmul.msk.f32.vlgmr.msra.gmra.mxu1 %vm572_vm1, %v597_v28 }
 0x122   : > { %960 = vmatmul.msk.f32.gmra.mxu2 %vm572_vm1, %v602_v29  ;;  %964 = vmatmul.msk.f32.gmra.mxu3 %vm572_vm1, %v606_v30 }
 0x124   : > { %952 = vmatmul.msk.f32.gmra.mxu0 %vm572_vm1, %v594_v31  ;;  %956 = vmatmul.msk.f32.gmra.mxu1 %vm572_vm1, %v598_v32 }
 0x12a   : > { %961 = vmatmul.msk.f32.gmra.mxu2 %vm572_vm1, %v603_v33  ;;  %965 = vmatmul.msk.f32.gmra.mxu3 %vm572_vm1, %v607_v34 }
 0x12c   : > { %953 = vmatmul.msk.f32.gmra.mxu0 %vm572_vm1, %v595_v35  ;;  %957 = vmatmul.msk.f32.gmra.mxu1 %vm572_vm1, %v599_v36 }
 0x132   : > { %962 = vmatmul.msk.f32.gmra.mxu2 %vm572_vm1, %v604_v37  ;;  %966 = vmatmul.msk.f32.gmra.mxu3 %vm572_vm1, %v608_v38 }
 0x134   : > { %954 = vmatmul.msk.f32.gmra.mxu0 %vm572_vm1, %v596_v39  ;;  %958 = vmatmul.msk.f32.gmra.mxu1 %vm572_vm1, %v600_v40 }
 0x199   : > { %v686_v42 = vpop.f32.mrf.mxu0  ;;  %v698_v43 = vpop.f32.mrf.mxu1 }
 0x19a   : > { %v687_v44 = vadd.f32 %v1394_v41, %v686_v42  ;;  %v699_v45 = vadd.f32 %v1394_v41, %v698_v43 }
 0x19c   : > { %1092 = vtanh.f32 %v687_v44 }
 0x19d   : > { %1094 = vtanh.f32 %v699_v45  ;;  %v710_v46 = vpop.f32.mrf.mxu2  ;;  %v722_v47 = vpop.f32.mrf.mxu3 }
 0x19e   : > { %v711_v48 = vadd.f32 %v1394_v41, %v710_v46  ;;  %v723_v49 = vadd.f32 %v1394_v41, %v722_v47 }
 0x1a0   : > { %1096 = vtanh.f32 %v711_v48 }
 0x1a1   : > { %1098 = vtanh.f32 %v723_v49  ;;  %v689_v50 = vpop.f32.mrf.mxu0  ;;  %v701_v51 = vpop.f32.mrf.mxu1 }
 0x1a2   : > { %v1093_v52 = vpop.eup %1092  ;;  %v690_v53 = vadd.f32 %v1394_v41, %v689_v50  ;;  %v702_v54 = vadd.f32 %v1394_v41, %v701_v51 }
 0x1a3   : > { %v1095_v55 = vpop.eup %1094  ;;  %v750_v56 = vpack.c.bf16 %v1093_v52, %v1093_v52 }
 0x1a4   : > { %v754_v57 = vpack.c.bf16 %v1095_v55, %v1095_v55  ;;  %1100 = vtanh.f32 %v690_v53 }
 0x1a5   : > { %767 = vst.msk [vmem:[%s1297_s7] sm:$0xf] %vm766_vm2, %v750_v56  ;;  %1102 = vtanh.f32 %v702_v54  ;;  %v713_v58 = vpop.f32.mrf.mxu2  ;;  %v725_v59 = vpop.f32.mrf.mxu3 }
 0x1a6   : > { %v1097_v60 = vpop.eup %1096  ;;  %771 = vst.msk [vmem:[%s1297_s7 + $0x10] sm:$0xf] %vm766_vm2, %v754_v57  ;;  %v714_v61 = vadd.f32 %v1394_v41, %v713_v58  ;;  %v726_v62 = vadd.f32 %v1394_v41, %v725_v59 }
 0x1a7   : > { %v1099_v63 = vpop.eup %1098  ;;  %v758_v0 = vpack.c.bf16 %v1097_v60, %v1097_v60 }
 0x1a8   : > { %v762_v1 = vpack.c.bf16 %v1099_v63, %v1099_v63  ;;  %1104 = vtanh.f32 %v714_v61 }
 0x1a9   : > { %775 = vst.msk [vmem:[%s1297_s7 + $0x20] sm:$0xf] %vm766_vm2, %v758_v0  ;;  %1106 = vtanh.f32 %v726_v62  ;;  %v692_v2 = vpop.f32.mrf.mxu0  ;;  %v704_v3 = vpop.f32.mrf.mxu1 }
 0x1aa   : > { %v1101_v4 = vpop.eup %1100  ;;  %779 = vst.msk [vmem:[%s1297_s7 + $0x30] sm:$0xf] %vm766_vm2, %v762_v1  ;;  %v693_v5 = vadd.f32 %v1394_v41, %v692_v2  ;;  %v705_v6 = vadd.f32 %v1394_v41, %v704_v3 }
 0x1ab   : > { %v1103_v7 = vpop.eup %1102  ;;  %v751_v8 = vpack.c.bf16 %v1101_v4, %v1101_v4 }
 0x1ac   : > { %v755_v9 = vpack.c.bf16 %v1103_v7, %v1103_v7  ;;  %1108 = vtanh.f32 %v693_v5 }
 0x1ad   : > { %768 = vst.msk [vmem:[%s1297_s7 + $0x4] sm:$0xf] %vm766_vm2, %v751_v8  ;;  %1110 = vtanh.f32 %v705_v6  ;;  %v716_v10 = vpop.f32.mrf.mxu2  ;;  %v728_v11 = vpop.f32.mrf.mxu3 }
 0x1ae   : > { %v1105_v12 = vpop.eup %1104  ;;  %772 = vst.msk [vmem:[%s1297_s7 + $0x14] sm:$0xf] %vm766_vm2, %v755_v9  ;;  %v717_v13 = vadd.f32 %v1394_v41, %v716_v10  ;;  %v729_v14 = vadd.f32 %v1394_v41, %v728_v11 }
 0x1af   : > { %v1107_v15 = vpop.eup %1106  ;;  %v759_v16 = vpack.c.bf16 %v1105_v12, %v1105_v12 }
 0x1b0   : > { %v763_v17 = vpack.c.bf16 %v1107_v15, %v1107_v15  ;;  %1112 = vtanh.f32 %v717_v13 }
 0x1b1   : > { %776 = vst.msk [vmem:[%s1297_s7 + $0x24] sm:$0xf] %vm766_vm2, %v759_v16  ;;  %1114 = vtanh.f32 %v729_v14  ;;  %v695_v18 = vpop.f32.mrf.mxu0  ;;  %v707_v19 = vpop.f32.mrf.mxu1 }
 0x1b2   : > { %v1109_v20 = vpop.eup %1108  ;;  %780 = vst.msk [vmem:[%s1297_s7 + $0x34] sm:$0xf] %vm766_vm2, %v763_v17  ;;  %v696_v21 = vadd.f32 %v1394_v41, %v695_v18  ;;  %v708_v22 = vadd.f32 %v1394_v41, %v707_v19 }
 0x1b3   : > { %v1111_v23 = vpop.eup %1110  ;;  %v752_v24 = vpack.c.bf16 %v1109_v20, %v1109_v20 }
 0x1b4   : > { %v756_v25 = vpack.c.bf16 %v1111_v23, %v1111_v23  ;;  %1116 = vtanh.f32 %v696_v21 }
 0x1b5   : > { %769 = vst.msk [vmem:[%s1297_s7 + $0x8] sm:$0xf] %vm766_vm2, %v752_v24  ;;  %1118 = vtanh.f32 %v708_v22  ;;  %v719_v26 = vpop.f32.mrf.mxu2  ;;  %v731_v27 = vpop.f32.mrf.mxu3 }
 0x1b6   : > { %v1113_v28 = vpop.eup %1112  ;;  %773 = vst.msk [vmem:[%s1297_s7 + $0x18] sm:$0xf] %vm766_vm2, %v756_v25  ;;  %v720_v29 = vadd.f32 %v1394_v41, %v719_v26  ;;  %v732_v30 = vadd.f32 %v1394_v41, %v731_v27 }
 0x1b7   : > { %v1115_v31 = vpop.eup %1114  ;;  %v760_v32 = vpack.c.bf16 %v1113_v28, %v1113_v28 }
 0x1b8   : > { %v764_v33 = vpack.c.bf16 %v1115_v31, %v1115_v31  ;;  %1120 = vtanh.f32 %v720_v29 }
 0x1b9   : > { %777 = vst.msk [vmem:[%s1297_s7 + $0x28] sm:$0xf] %vm766_vm2, %v760_v32  ;;  %1122 = vtanh.f32 %v732_v30 }
 0x1ba   : > { %v1117_v34 = vpop.eup %1116  ;;  %781 = vst.msk [vmem:[%s1297_s7 + $0x38] sm:$0xf] %vm766_vm2, %v764_v33 }
 0x1bb   : > { %v1119_v35 = vpop.eup %1118  ;;  %v753_v36 = vpack.c.bf16 %v1117_v34, %v1117_v34 }
 0x1bc   : > { %v757_v37 = vpack.c.bf16 %v1119_v35, %v1119_v35 }
 0x1bd   : > { %770 = vst.msk [vmem:[%s1297_s7 + $0xc] sm:$0xf] %vm766_vm2, %v753_v36 }
 0x1be   : > { %v1121_v38 = vpop.eup %1120  ;;  %774 = vst.msk [vmem:[%s1297_s7 + $0x1c] sm:$0xf] %vm766_vm2, %v757_v37 }
 0x1bf   : > { %v1123_v39 = vpop.eup %1122  ;;  %v761_v40 = vpack.c.bf16 %v1121_v38, %v1121_v38 }
 0x1c0   : > { %v765_v41 = vpack.c.bf16 %v1123_v39, %v1123_v39 }
 0x1c1   : > { %778 = vst.msk [vmem:[%s1297_s7 + $0x2c] sm:$0xf] %vm766_vm2, %v761_v40 }
 0x1c2   : > { %782 = vst.msk [vmem:[%s1297_s7 + $0x3c] sm:$0xf] %vm766_vm2, %v765_v41 }
 0x1c3 PF: > { %s14_s21 = sadd.s32 1, %s1178_s21   ;;  %s1470_s15 = smov %s1158_s16 }
 0x1c4   : > { %p11_p0 = scmp.ge.s32.totalorder %s14_s21, 11   ;;  %s1471_s16 = smov %s1257_s28 }
 0x1c5   : > { %s1472_s17 = smov %s1170_s19  ;;  %s1473_s18 = smov %s1174_s20 }
 0x1c6   : > { %s1474_s19 = smov %s1477_s22  ;;  %s1475_s20 = smov %s1481_s23 }
 0x1c7   :  { %13 = sbr.rel (!%p11_p0) target bundleno = 4 (0x4), region = 123 }

// kernel: gcn_forward.8
= control target key start
LH: loop header
LB: loop body
LE: loop exit
PB: predicated region body
PF: predicated region fallthrough
CT: control target
= control target key end

     0   :  { %s1189_s15 = smov 0   ;;  %s1191_s16 = smov 0   ;;  %s1448_s0 = inlined_call_operand.vmem [shape: bf16[384,384], index: 0, kind: input, shape index: {}]   ;;  %s1449_s1 = inlined_call_operand.vmem [shape: bf16[384,64], index: 1, kind: input, shape index: {}]   ;;  %s1450_s2 = inlined_call_operand.vmem [shape: f32[64,64], index: 2, kind: input, shape index: {}]   ;;  %s1451_s3 = inlined_call_operand.vmem [shape: f32[1,64], index: 3, kind: input, shape index: {}]   ;;  %s1452_s4 = inlined_call_operand.vmem [shape: f32[384,64], index: 4, kind: output, shape index: {}]  }
   0x1   :  { %s1193_s17 = smov 0   ;;  %s1195_s18 = smov 0  }
   0x2   :  { %s1197_s19 = smov 0   ;;  %s1199_s20 = smov 0  }
   0x3   :  { %s1201_s21 = smov 0  }
   0x4 LB: > { %s23_s22 = sadd.s32 1, %s1153_s19  ;;  %s26_s23 = sadd.s32 1, %s1157_s20  ;;  %s1161_s21 = sphi %s1201_s21, %s14_s21   ;;  %s1157_s20 = sphi %s1199_s20, %s1458_s20   ;;  %s1153_s19 = sphi %s1197_s19, %s1457_s19   ;;  %s1149_s18 = sphi %s1195_s18, %s1456_s18   ;;  %s1145_s17 = sphi %s1193_s17, %s1455_s17   ;;  %s1141_s16 = sphi %s1191_s16, %s1454_s16   ;;  %s1137_s15 = sphi %s1189_s15, %s1453_s15  }
   0x5   : > { %p24_p0 = scmp.ge.s32.totalorder %s23_s22, 3  ;;  %p42_p1 = scmp.ne.s32.totalorder %s1141_s16, %s1137_s15 }
   0x6   : > { %p43_p2 = scmp.eq.s32.totalorder %s1161_s21, 0  ;;  %s35_s27 = sadd.s32 1, %s1141_s16 }
   0x7   : > { %s1460_s22 = smov (%p24_p0, %s23_s22), 0  ;;  %s1462_s23 = smov (!%p24_p0, %s26_s23), %s1157_s20 }
   0x8   : > { %p44_p3 = por %p43_p2, %p42_p1  ;;  %p28_p4 = scmp.ge.s32.totalorder %s1462_s23, 3 }
   0x9   : > { %s31_s24 = ssub.s32 %s1153_s19, %s1460_s22  ;;  %p857_p6 = scmp.ge.s32.totalorder %s1161_s21, 9 }
   0xa   : > { %s1464_s23 = smov (%p28_p4, %s1462_s23), 0 }
   0xb   : > { %s30_s25 = ssub.s32 %s1157_s20, %s1464_s23  ;;  %168 = sbr.rel (%p857_p6) target bundleno = 39 (0x27), region = 24 }
   0xc   : > { %s32_s26 = sor.u32 %s31_s24, %s30_s25 }
   0xd   : > { %p33_p5 = scmp.eq.s32.totalorder %s32_s26, 0 }
   0xf   : > { %s1240_s28 = scalar_select %p33_p5, %s1141_s16, %s35_s27  }
  0x10   : > { %171 = sbr.rel (!%p44_p3) target bundleno = 39 (0x27), region = 28  ;;  %s173_s29 = sand.u32 (%p44_p3), 1, %s1141_s16  }
  0x11   : > { %s1016_s30 = smul.u32 (%p44_p3), 48, %s1157_s20  ;;  %s858_s5 = sshll.u32 (%p44_p3), %s173_s29, 6 }
  0x12   : > { %s175_s11 = scalar_lea.vmem (%p44_p3), [#allocation3], %s858_s5 }
  0x13   : > { %s178_s6 = sadd.s32 (%p44_p3), %s1153_s19, %s1016_s30 }
  0x14   : > { %s861_s7 = sshll.u32 (%p44_p3), %s178_s6, 2 }
  0x15   : > { %s1249_s10 = scalar_lea.vmem %s1448_s0, %s861_s7 }
  0x16   : > { %v197_v0 = vld [vmem:[%s1249_s10] sm:$0xf]  ;;  %v199_v1 = vld [vmem:[%s1249_s10 + $0xc] sm:$0xf]  ;;  %v201_v2 = vld [vmem:[%s1249_s10 + $0x18] sm:$0xf] }
  0x17   : > { %198 = vst [vmem:[%s175_s11] sm:$0xf] %v197_v0  ;;  %v203_v3 = vld [vmem:[%s1249_s10 + $0x24] sm:$0xf]  ;;  %v205_v4 = vld [vmem:[%s1249_s10 + $0x30] sm:$0xf] }
  0x18   : > { %200 = vst [vmem:[%s175_s11 + $0x4] sm:$0xf] %v199_v1  ;;  %v207_v5 = vld [vmem:[%s1249_s10 + $0x3c] sm:$0xf]  ;;  %v209_v6 = vld [vmem:[%s1249_s10 + $0x48] sm:$0xf] }
  0x19   : > { %202 = vst [vmem:[%s175_s11 + $0x8] sm:$0xf] %v201_v2  ;;  %v211_v7 = vld [vmem:[%s1249_s10 + $0x54] sm:$0xf]  ;;  %v213_v8 = vld [vmem:[%s1249_s10 + $0x60] sm:$0xf] }
  0x1a   : > { %204 = vst [vmem:[%s175_s11 + $0xc] sm:$0xf] %v203_v3  ;;  %v215_v9 = vld [vmem:[%s1249_s10 + $0x6c] sm:$0xf]  ;;  %v217_v10 = vld [vmem:[%s1249_s10 + $0x78] sm:$0xf] }
  0x1b   : > { %206 = vst [vmem:[%s175_s11 + $0x10] sm:$0xf] %v205_v4  ;;  %v219_v11 = vld [vmem:[%s1249_s10 + $0x84] sm:$0xf]  ;;  %v221_v12 = vld [vmem:[%s1249_s10 + $0x90] sm:$0xf] }
  0x1c   : > { %208 = vst [vmem:[%s175_s11 + $0x14] sm:$0xf] %v207_v5  ;;  %v223_v13 = vld [vmem:[%s1249_s10 + $0x9c] sm:$0xf]  ;;  %v225_v14 = vld [vmem:[%s1249_s10 + $0xa8] sm:$0xf] }
  0x1d   : > { %210 = vst [vmem:[%s175_s11 + $0x18] sm:$0xf] %v209_v6  ;;  %v227_v15 = vld [vmem:[%s1249_s10 + $0xb4] sm:$0xf] }
  0x1e   : > { %212 = vst [vmem:[%s175_s11 + $0x1c] sm:$0xf] %v211_v7 }
  0x1f   : > { %214 = vst [vmem:[%s175_s11 + $0x20] sm:$0xf] %v213_v8 }
  0x20   : > { %216 = vst [vmem:[%s175_s11 + $0x24] sm:$0xf] %v215_v9 }
  0x21   : > { %218 = vst [vmem:[%s175_s11 + $0x28] sm:$0xf] %v217_v10 }
  0x22   : > { %220 = vst [vmem:[%s175_s11 + $0x2c] sm:$0xf] %v219_v11 }
  0x23   : > { %222 = vst [vmem:[%s175_s11 + $0x30] sm:$0xf] %v221_v12 }
  0x24   : > { %224 = vst [vmem:[%s175_s11 + $0x34] sm:$0xf] %v223_v13 }
  0x25   : > { %226 = vst [vmem:[%s175_s11 + $0x38] sm:$0xf] %v225_v14 }
  0x26   : > { %228 = vst [vmem:[%s175_s11 + $0x3c] sm:$0xf] %v227_v15 }
  0x27 PF: > { %p862_p7 = scmp.ge.s32.totalorder %s1161_s21, 1  ;;  %p292_p8 = scmp.lt.s32.totalorder %s1161_s21, 10 }
  0x29   : > { %p293_p9 = pnand %p862_p7, %p292_p8 }
  0x2a   : > { %s299_s12 = sand.u32 (!%p293_p9), 1, %s1137_s15   ;;  %s864_s13 = sshll.u32 (!%p293_p9), %s1145_s17, 4 }
  0x2b   : > { %296 = sbr.rel (%p293_p9) target bundleno = 449 (0x1c1), region = 73  ;;  %s863_s14 = sshll.u32 (!%p293_p9), %s299_s12, 6 }
  0x2c   : > { %p331_p10 = scmp.lt.s32.totalorder (!%p293_p9), %s864_s13, 47  ;;  %s866_s24 = sshll.u32 (!%p293_p9), %s1149_s18, 4 }
  0x2d   : > { %p337_p11 = scmp.lt.s32.totalorder (!%p293_p9), %s866_s24, 47  ;;  %s1282_s15 = scalar_lea.vmem (!%p293_p9), [#allocation3], %s863_s14 }
  0x2e   : > { %p868_p12 = scmp.ne.s32.totalorder (!%p293_p9), %s1145_s17, 0 }
  0x30   : > { %s1466_s13 = smov (!%p331_p10, %s864_s13), 47  ;;  %s1468_s24 = smov (!%p337_p11, %s866_s24), 47 }
  0x31   : > { %s865_s25 = sshll.u32 %s1466_s13, 2  ;;  %s867_s30 = sshll.u32 %s1468_s24, 3 }
  0x32   : > { %s1275_s29 = scalar_lea.vmem %s1449_s1, %s865_s25  ;;  %s1280_s7 = scalar_lea.vmem %s1452_s4, %s867_s30 }
  0x33   : > { %345 = sbr.rel (%p868_p12) target bundleno = 73 (0x49), region = 81 }
  0x38   : > { %vm346_vm0 = vcmask 523264   ;;  %v1163_v16 = vmov 0.0  }
  0x39   : > { %347 = vst.msk [vmem:[#allocation2] sm:$0xff] %vm346_vm0, %v1163_v16 }
  0x3a   : > { %348 = vst.msk [vmem:[#allocation2 + $0x8] sm:$0xff] %vm346_vm0, %v1163_v16 }
  0x3b   : > { %349 = vst.msk [vmem:[#allocation2 + $0x10] sm:$0xff] %vm346_vm0, %v1163_v16 }
  0x3c   : > { %350 = vst.msk [vmem:[#allocation2 + $0x18] sm:$0xff] %vm346_vm0, %v1163_v16 }
  0x3d   : > { %351 = vst.msk [vmem:[#allocation2 + $0x20] sm:$0xff] %vm346_vm0, %v1163_v16 }
  0x3e   : > { %352 = vst.msk [vmem:[#allocation2 + $0x28] sm:$0xff] %vm346_vm0, %v1163_v16 }
  0x3f   : > { %353 = vst.msk [vmem:[#allocation2 + $0x30] sm:$0xff] %vm346_vm0, %v1163_v16 }
  0x40   : > { %354 = vst.msk [vmem:[#allocation2 + $0x38] sm:$0xff] %vm346_vm0, %v1163_v16 }
  0x41   : > { %355 = vst.msk [vmem:[#allocation2 + $0x40] sm:$0xff] %vm346_vm0, %v1163_v16 }
  0x42   : > { %356 = vst.msk [vmem:[#allocation2 + $0x48] sm:$0xff] %vm346_vm0, %v1163_v16 }
  0x43   : > { %357 = vst.msk [vmem:[#allocation2 + $0x50] sm:$0xff] %vm346_vm0, %v1163_v16 }
  0x44   : > { %358 = vst.msk [vmem:[#allocation2 + $0x58] sm:$0xff] %vm346_vm0, %v1163_v16 }
  0x45   : > { %359 = vst.msk [vmem:[#allocation2 + $0x60] sm:$0xff] %vm346_vm0, %v1163_v16 }
  0x46   : > { %360 = vst.msk [vmem:[#allocation2 + $0x68] sm:$0xff] %vm346_vm0, %v1163_v16 }
  0x47   : > { %361 = vst.msk [vmem:[#allocation2 + $0x70] sm:$0xff] %vm346_vm0, %v1163_v16 }
  0x48   : > { %362 = vst.msk [vmem:[#allocation2 + $0x78] sm:$0xff] %vm346_vm0, %v1163_v16 }
  0x49 PF: > { %v967_v17 = vld [vmem:[%s1275_s29 + $0x38] sm:$0xff]  ;;  %v966_v18 = vld [vmem:[%s1275_s29 + $0x30] sm:$0xff]  ;;  %v965_v19 = vld [vmem:[%s1275_s29 + $0x28] sm:$0xff]  ;;  %vm572_vm1 = vcmask 523264   ;;  %p933_p13 = scmp.ne.s32.totalorder %s1145_s17, 2 }
  0x4a   : > { %507 = vmatpush.bf16.msra.mxu0 %v967_v17  ;;  %968 = vmatpush.bf16.msra.mxu1 %v967_v17  ;;  %v964_v20 = vld [vmem:[%s1275_s29 + $0x20] sm:$0xff]  ;;  %v963_v21 = vld [vmem:[%s1275_s29 + $0x18] sm:$0xff]  ;;  %v962_v22 = vld [vmem:[%s1275_s29 + $0x10] sm:$0xff] }
  0x4b   : > { %969 = vmatpush.bf16.msra.mxu2 %v967_v17  ;;  %970 = vmatpush.bf16.msra.mxu3 %v967_v17  ;;  %v961_v23 = vld [vmem:[%s1275_s29 + $0x8] sm:$0xff]  ;;  %v960_v24 = vld [vmem:[%s1275_s29] sm:$0xff]  ;;  %v954_v26 = vld [vmem:[%s1282_s15 + $0x10] sm:$0xff] }
  0x4c   : > { %v952_v25 = vld [vmem:[%s1282_s15] sm:$0xff]  ;;  %v958_v28 = vld [vmem:[%s1282_s15 + $0x30] sm:$0xff]  ;;  %v953_v29 = vld [vmem:[%s1282_s15 + $0x8] sm:$0xff] }
  0x4d   : > { %v956_v27 = vld [vmem:[%s1282_s15 + $0x20] sm:$0xff]  ;;  %v955_v30 = vld [vmem:[%s1282_s15 + $0x18] sm:$0xff]  ;;  %v957_v31 = vld [vmem:[%s1282_s15 + $0x28] sm:$0xff] }
  0x4e   : > { %508 = vmatpush.bf16.msra.mxu0 %v966_v18  ;;  %971 = vmatpush.bf16.msra.mxu1 %v966_v18  ;;  %v959_v32 = vld [vmem:[%s1282_s15 + $0x38] sm:$0xff]  ;;  %v363_v33 = vld [vmem:[#allocation2] sm:$0xff]  ;;  %v364_v41 = vld [vmem:[#allocation2 + $0x8] sm:$0xff] }
  0x4f   : > { %972 = vmatpush.bf16.msra.mxu2 %v966_v18  ;;  %973 = vmatpush.bf16.msra.mxu3 %v966_v18  ;;  %v367_v34 = vld [vmem:[#allocation2 + $0x20] sm:$0xff]  ;;  %v368_v42 = vld [vmem:[#allocation2 + $0x28] sm:$0xff]  ;;  %v365_v53 = vld [vmem:[#allocation2 + $0x10] sm:$0xff] }
  0x50   : > { %v371_v39 = vld [vmem:[#allocation2 + $0x40] sm:$0xff]  ;;  %v372_v51 = vld [vmem:[#allocation2 + $0x48] sm:$0xff]  ;;  %v369_v54 = vld [vmem:[#allocation2 + $0x30] sm:$0xff] }
  0x51   : > { %v375_v40 = vld [vmem:[#allocation2 + $0x60] sm:$0xff]  ;;  %v376_v52 = vld [vmem:[#allocation2 + $0x68] sm:$0xff]  ;;  %v373_v63 = vld [vmem:[#allocation2 + $0x50] sm:$0xff] }
  0x52   : > { %509 = vmatpush.bf16.msra.mxu0 %v965_v19  ;;  %974 = vmatpush.bf16.msra.mxu1 %v965_v19  ;;  %v377_v0 = vld [vmem:[#allocation2 + $0x70] sm:$0xff]  ;;  %v366_v1 = vld [vmem:[#allocation2 + $0x18] sm:$0xff] }
  0x53   : > { %975 = vmatpush.bf16.msra.mxu2 %v965_v19  ;;  %976 = vmatpush.bf16.msra.mxu3 %v965_v19  ;;  %v370_v2 = vld [vmem:[#allocation2 + $0x38] sm:$0xff] }
  0x54   : > { %v374_v11 = vld [vmem:[#allocation2 + $0x58] sm:$0xff] }
  0x55   : > { %v378_v12 = vld [vmem:[#allocation2 + $0x78] sm:$0xff] }
  0x56   : > { %510 = vmatpush.bf16.msra.mxu0 %v964_v20  ;;  %977 = vmatpush.bf16.msra.mxu1 %v964_v20 }
  0x57   : > { %978 = vmatpush.bf16.msra.mxu2 %v964_v20  ;;  %979 = vmatpush.bf16.msra.mxu3 %v964_v20 }
  0x5a   : > { %511 = vmatpush.bf16.msra.mxu0 %v963_v21  ;;  %980 = vmatpush.bf16.msra.mxu1 %v963_v21 }
  0x5b   : > { %981 = vmatpush.bf16.msra.mxu2 %v963_v21  ;;  %982 = vmatpush.bf16.msra.mxu3 %v963_v21 }
  0x5e   : > { %512 = vmatpush.bf16.msra.mxu0 %v962_v22  ;;  %983 = vmatpush.bf16.msra.mxu1 %v962_v22 }
  0x5f   : > { %984 = vmatpush.bf16.msra.mxu2 %v962_v22  ;;  %985 = vmatpush.bf16.msra.mxu3 %v962_v22 }
  0x62   : > { %513 = vmatpush.bf16.msra.mxu0 %v961_v23  ;;  %986 = vmatpush.bf16.msra.mxu1 %v961_v23 }
  0x63   : > { %987 = vmatpush.bf16.msra.mxu2 %v961_v23  ;;  %988 = vmatpush.bf16.msra.mxu3 %v961_v23 }
  0x66   : > { %514 = vmatpush.bf16.msra.mxu0 %v960_v24  ;;  %989 = vmatpush.bf16.msra.mxu1 %v960_v24 }
  0x67   : > { %990 = vmatpush.bf16.msra.mxu2 %v960_v24  ;;  %991 = vmatpush.bf16.msra.mxu3 %v960_v24 }
  0x69   : > { %515 = vmatmul.bf16.vlgmr.msra.gmra.mxu0 %v952_v25  ;;  %525 = vmatmul.bf16.vlgmr.msra.gmra.mxu1 %v954_v26 }
  0x6a   : > { %535 = vmatmul.bf16.vlgmr.msra.gmra.mxu2 %v956_v27  ;;  %545 = vmatmul.bf16.vlgmr.msra.gmra.mxu3 %v958_v28 }
  0x79   : > { %520 = vmatmul.bf16.gmra.mxu0 %v953_v29  ;;  %530 = vmatmul.bf16.gmra.mxu1 %v955_v30 }
  0x7a   : > { %540 = vmatmul.bf16.gmra.mxu2 %v957_v31  ;;  %550 = vmatmul.bf16.gmra.mxu3 %v959_v32 }
  0xe6   : > { %v516_v35 = vpop.f32.mrf.mxu0  ;;  %v526_v36 = vpop.f32.mrf.mxu1 }
  0xe7   : > { %v556_v37 = vadd.f32 %v516_v35, %v363_v33  ;;  %v560_v38 = vadd.f32 %v526_v36, %v367_v34 }
  0xe9   : > { %573 = vst.msk [vmem:[#allocation2] sm:$0xff] %vm572_vm1, %v556_v37 }
  0xea   : > { %577 = vst.msk [vmem:[#allocation2 + $0x20] sm:$0xff] %vm572_vm1, %v560_v38 }
  0xed   : > { %v536_v43 = vpop.f32.mrf.mxu2  ;;  %v546_v44 = vpop.f32.mrf.mxu3 }
  0xee   : > { %v564_v45 = vadd.f32 %v536_v43, %v371_v39  ;;  %v568_v46 = vadd.f32 %v546_v44, %v375_v40  ;;  %v518_v47 = vpop.f32.mrf.mxu0  ;;  %v528_v48 = vpop.f32.mrf.mxu1 }
  0xef   : > { %v557_v49 = vadd.f32 %v518_v47, %v364_v41  ;;  %v561_v50 = vadd.f32 %v528_v48, %v368_v42 }
  0xf0   : > { %581 = vst.msk [vmem:[#allocation2 + $0x40] sm:$0xff] %vm572_vm1, %v564_v45 }
  0xf1   : > { %585 = vst.msk [vmem:[#allocation2 + $0x60] sm:$0xff] %vm572_vm1, %v568_v46 }
  0xf2   : > { %574 = vst.msk [vmem:[#allocation2 + $0x8] sm:$0xff] %vm572_vm1, %v557_v49 }
  0xf3   : > { %578 = vst.msk [vmem:[#allocation2 + $0x28] sm:$0xff] %vm572_vm1, %v561_v50 }
  0xf5   : > { %v538_v55 = vpop.f32.mrf.mxu2  ;;  %v548_v56 = vpop.f32.mrf.mxu3 }
  0xf6   : > { %v565_v57 = vadd.f32 %v538_v55, %v372_v51  ;;  %v569_v58 = vadd.f32 %v548_v56, %v376_v52  ;;  %v521_v59 = vpop.f32.mrf.mxu0  ;;  %v531_v60 = vpop.f32.mrf.mxu1 }
  0xf7   : > { %v558_v61 = vadd.f32 %v521_v59, %v365_v53  ;;  %v562_v62 = vadd.f32 %v531_v60, %v369_v54 }
  0xf8   : > { %582 = vst.msk [vmem:[#allocation2 + $0x48] sm:$0xff] %vm572_vm1, %v565_v57 }
  0xf9   : > { %586 = vst.msk [vmem:[#allocation2 + $0x68] sm:$0xff] %vm572_vm1, %v569_v58 }
  0xfa   : > { %575 = vst.msk [vmem:[#allocation2 + $0x10] sm:$0xff] %vm572_vm1, %v558_v61 }
  0xfb   : > { %579 = vst.msk [vmem:[#allocation2 + $0x30] sm:$0xff] %vm572_vm1, %v562_v62 }
  0xfd   : > { %v541_v3 = vpop.f32.mrf.mxu2  ;;  %v551_v4 = vpop.f32.mrf.mxu3 }
  0xfe   : > { %v566_v5 = vadd.f32 %v541_v3, %v373_v63  ;;  %v570_v6 = vadd.f32 %v551_v4, %v377_v0  ;;  %v523_v7 = vpop.f32.mrf.mxu0  ;;  %v533_v8 = vpop.f32.mrf.mxu1 }
  0xff   : > { %v559_v9 = vadd.f32 %v523_v7, %v366_v1  ;;  %v563_v10 = vadd.f32 %v533_v8, %v370_v2 }
 0x100   : > { %583 = vst.msk [vmem:[#allocation2 + $0x50] sm:$0xff] %vm572_vm1, %v566_v5 }
 0x101   : > { %587 = vst.msk [vmem:[#allocation2 + $0x70] sm:$0xff] %vm572_vm1, %v570_v6 }
 0x102   : > { %576 = vst.msk [vmem:[#allocation2 + $0x18] sm:$0xff] %vm572_vm1, %v559_v9 }
 0x103   : > { %580 = vst.msk [vmem:[#allocation2 + $0x38] sm:$0xff] %vm572_vm1, %v563_v10 }
 0x105   : > { %v543_v13 = vpop.f32.mrf.mxu2  ;;  %v553_v14 = vpop.f32.mrf.mxu3  ;;  %592 = sbr.rel (%p933_p13) target bundleno = 449 (0x1c1), region = 85 }
 0x106   : > { %v567_v15 = vadd.f32 %v543_v13, %v374_v11  ;;  %v571_v16 = vadd.f32 %v553_v14, %v378_v12 }
 0x108   : > { %584 = vst.msk [vmem:[#allocation2 + $0x58] sm:$0xff] %vm572_vm1, %v567_v15 }
 0x109   : > { %588 = vst.msk [vmem:[#allocation2 + $0x78] sm:$0xff] %vm572_vm1, %v571_v16 }
 0x10a   : > { %v616_v17 = vld [vmem:[%s1450_s2 + $0x38] sm:$0xff]  ;;  %v615_v18 = vld [vmem:[%s1450_s2 + $0x30] sm:$0xff]  ;;  %v614_v19 = vld [vmem:[%s1450_s2 + $0x28] sm:$0xff] }
 0x10b   : > { %993 = vmatpush.msra.mxu2 %v616_v17  ;;  %994 = vmatpush.msra.mxu3 %v616_v17  ;;  %v613_v20 = vld [vmem:[%s1450_s2 + $0x20] sm:$0xff]  ;;  %v612_v21 = vld [vmem:[%s1450_s2 + $0x18] sm:$0xff]  ;;  %v611_v22 = vld [vmem:[%s1450_s2 + $0x10] sm:$0xff] }
 0x10c   : > { %677 = vmatpush.msra.mxu0 %v616_v17  ;;  %992 = vmatpush.msra.mxu1 %v616_v17  ;;  %v610_v23 = vld [vmem:[%s1450_s2 + $0x8] sm:$0xff]  ;;  %v609_v24 = vld [vmem:[%s1450_s2] sm:$0xff]  ;;  %v603_v33 = vld [vmem:[#allocation2 + $0x50] sm:$0xff] }
 0x10d   : > { %996 = vmatpush.msra.mxu2 %v615_v18  ;;  %997 = vmatpush.msra.mxu3 %v615_v18  ;;  %v601_v25 = vld [vmem:[#allocation2 + $0x40] sm:$0xff]  ;;  %v602_v29 = vld [vmem:[#allocation2 + $0x48] sm:$0xff]  ;;  %v607_v34 = vld [vmem:[#allocation2 + $0x70] sm:$0xff] }
 0x10e   : > { %678 = vmatpush.msra.mxu0 %v615_v18  ;;  %995 = vmatpush.msra.mxu1 %v615_v18  ;;  %v605_v26 = vld [vmem:[#allocation2 + $0x60] sm:$0xff]  ;;  %v606_v30 = vld [vmem:[#allocation2 + $0x68] sm:$0xff]  ;;  %v595_v35 = vld [vmem:[#allocation2 + $0x10] sm:$0xff] }
 0x10f   : > { %999 = vmatpush.msra.mxu2 %v614_v19  ;;  %1000 = vmatpush.msra.mxu3 %v614_v19  ;;  %v593_v27 = vld [vmem:[#allocation2] sm:$0xff]  ;;  %v594_v31 = vld [vmem:[#allocation2 + $0x8] sm:$0xff]  ;;  %v599_v36 = vld [vmem:[#allocation2 + $0x30] sm:$0xff] }
 0x110   : > { %679 = vmatpush.msra.mxu0 %v614_v19  ;;  %998 = vmatpush.msra.mxu1 %v614_v19  ;;  %v597_v28 = vld [vmem:[#allocation2 + $0x20] sm:$0xff]  ;;  %v598_v32 = vld [vmem:[#allocation2 + $0x28] sm:$0xff]  ;;  %v604_v37 = vld [vmem:[#allocation2 + $0x58] sm:$0xff] }
 0x111   : > { %1002 = vmatpush.msra.mxu2 %v613_v20  ;;  %1003 = vmatpush.msra.mxu3 %v613_v20  ;;  %v608_v38 = vld [vmem:[#allocation2 + $0x78] sm:$0xff]  ;;  %v1377_v41 = vld [vmem:[%s1451_s3] ss:$0 sm:$0xff] }
 0x112   : > { %680 = vmatpush.msra.mxu0 %v613_v20  ;;  %1001 = vmatpush.msra.mxu1 %v613_v20  ;;  %v596_v39 = vld [vmem:[#allocation2 + $0x18] sm:$0xff] }
 0x113   : > { %1005 = vmatpush.msra.mxu2 %v612_v21  ;;  %1006 = vmatpush.msra.mxu3 %v612_v21  ;;  %v600_v40 = vld [vmem:[#allocation2 + $0x38] sm:$0xff] }
 0x114   : > { %681 = vmatpush.msra.mxu0 %v612_v21  ;;  %1004 = vmatpush.msra.mxu1 %v612_v21 }
 0x115   : > { %1008 = vmatpush.msra.mxu2 %v611_v22  ;;  %1009 = vmatpush.msra.mxu3 %v611_v22 }
 0x116   : > { %682 = vmatpush.msra.mxu0 %v611_v22  ;;  %1007 = vmatpush.msra.mxu1 %v611_v22 }
 0x117   : > { %1011 = vmatpush.msra.mxu2 %v610_v23  ;;  %1012 = vmatpush.msra.mxu3 %v610_v23 }
 0x118   : > { %683 = vmatpush.msra.mxu0 %v610_v23  ;;  %1010 = vmatpush.msra.mxu1 %v610_v23 }
 0x119   : > { %1014 = vmatpush.msra.mxu2 %v609_v24  ;;  %1015 = vmatpush.msra.mxu3 %v609_v24 }
 0x11a   : > { %942 = vmatmul.msk.f32.vlgmr.msra.gmra.mxu2 %vm572_vm1, %v601_v25  ;;  %946 = vmatmul.msk.f32.vlgmr.msra.gmra.mxu3 %vm572_vm1, %v605_v26 }
 0x11b   : > { %684 = vmatpush.msra.mxu0 %v609_v24  ;;  %1013 = vmatpush.msra.mxu1 %v609_v24 }
 0x11c   : > { %934 = vmatmul.msk.f32.vlgmr.msra.gmra.mxu0 %vm572_vm1, %v593_v27  ;;  %938 = vmatmul.msk.f32.vlgmr.msra.gmra.mxu1 %vm572_vm1, %v597_v28 }
 0x122   : > { %943 = vmatmul.msk.f32.gmra.mxu2 %vm572_vm1, %v602_v29  ;;  %947 = vmatmul.msk.f32.gmra.mxu3 %vm572_vm1, %v606_v30 }
 0x124   : > { %935 = vmatmul.msk.f32.gmra.mxu0 %vm572_vm1, %v594_v31  ;;  %939 = vmatmul.msk.f32.gmra.mxu1 %vm572_vm1, %v598_v32 }
 0x12a   : > { %944 = vmatmul.msk.f32.gmra.mxu2 %vm572_vm1, %v603_v33  ;;  %948 = vmatmul.msk.f32.gmra.mxu3 %vm572_vm1, %v607_v34 }
 0x12c   : > { %936 = vmatmul.msk.f32.gmra.mxu0 %vm572_vm1, %v595_v35  ;;  %940 = vmatmul.msk.f32.gmra.mxu1 %vm572_vm1, %v599_v36 }
 0x132   : > { %945 = vmatmul.msk.f32.gmra.mxu2 %vm572_vm1, %v604_v37  ;;  %949 = vmatmul.msk.f32.gmra.mxu3 %vm572_vm1, %v608_v38 }
 0x134   : > { %937 = vmatmul.msk.f32.gmra.mxu0 %vm572_vm1, %v596_v39  ;;  %941 = vmatmul.msk.f32.gmra.mxu1 %vm572_vm1, %v600_v40 }
 0x199   : > { %v686_v42 = vpop.f32.mrf.mxu0  ;;  %v698_v43 = vpop.f32.mrf.mxu1 }
 0x19a   : > { %v687_v44 = vadd.f32 %v1377_v41, %v686_v42  ;;  %v699_v45 = vadd.f32 %v1377_v41, %v698_v43 }
 0x19c   : > { %1075 = vtanh.f32 %v687_v44 }
 0x19d   : > { %1077 = vtanh.f32 %v699_v45  ;;  %v710_v46 = vpop.f32.mrf.mxu2  ;;  %v722_v47 = vpop.f32.mrf.mxu3 }
 0x19e   : > { %v711_v48 = vadd.f32 %v1377_v41, %v710_v46  ;;  %v723_v49 = vadd.f32 %v1377_v41, %v722_v47 }
 0x1a0   : > { %1079 = vtanh.f32 %v711_v48 }
 0x1a1   : > { %1081 = vtanh.f32 %v723_v49  ;;  %v689_v50 = vpop.f32.mrf.mxu0  ;;  %v701_v51 = vpop.f32.mrf.mxu1 }
 0x1a2   : > { %v1076_v52 = vpop.eup %1075  ;;  %v690_v53 = vadd.f32 %v1377_v41, %v689_v50  ;;  %v702_v54 = vadd.f32 %v1377_v41, %v701_v51 }
 0x1a3   : > { %v1078_v55 = vpop.eup %1077  ;;  %750 = vst.msk [vmem:[%s1280_s7] sm:$0xff] %vm572_vm1, %v1076_v52 }
 0x1a4   : > { %754 = vst.msk [vmem:[%s1280_s7 + $0x20] sm:$0xff] %vm572_vm1, %v1078_v55  ;;  %1083 = vtanh.f32 %v690_v53 }
 0x1a5   : > { %1085 = vtanh.f32 %v702_v54  ;;  %v713_v56 = vpop.f32.mrf.mxu2  ;;  %v725_v57 = vpop.f32.mrf.mxu3 }
 0x1a6   : > { %v1080_v58 = vpop.eup %1079  ;;  %v714_v59 = vadd.f32 %v1377_v41, %v713_v56  ;;  %v726_v60 = vadd.f32 %v1377_v41, %v725_v57 }
 0x1a7   : > { %v1082_v61 = vpop.eup %1081  ;;  %758 = vst.msk [vmem:[%s1280_s7 + $0x40] sm:$0xff] %vm572_vm1, %v1080_v58 }
 0x1a8   : > { %762 = vst.msk [vmem:[%s1280_s7 + $0x60] sm:$0xff] %vm572_vm1, %v1082_v61  ;;  %1087 = vtanh.f32 %v714_v59 }
 0x1a9   : > { %1089 = vtanh.f32 %v726_v60  ;;  %v692_v62 = vpop.f32.mrf.mxu0  ;;  %v704_v63 = vpop.f32.mrf.mxu1 }
 0x1aa   : > { %v1084_v0 = vpop.eup %1083  ;;  %v693_v1 = vadd.f32 %v1377_v41, %v692_v62  ;;  %v705_v2 = vadd.f32 %v1377_v41, %v704_v63 }
 0x1ab   : > { %v1086_v3 = vpop.eup %1085  ;;  %751 = vst.msk [vmem:[%s1280_s7 + $0x8] sm:$0xff] %vm572_vm1, %v1084_v0 }
 0x1ac   : > { %755 = vst.msk [vmem:[%s1280_s7 + $0x28] sm:$0xff] %vm572_vm1, %v1086_v3  ;;  %1091 = vtanh.f32 %v693_v1 }
 0x1ad   : > { %1093 = vtanh.f32 %v705_v2  ;;  %v716_v4 = vpop.f32.mrf.mxu2  ;;  %v728_v5 = vpop.f32.mrf.mxu3 }
 0x1ae   : > { %v1088_v6 = vpop.eup %1087  ;;  %v717_v7 = vadd.f32 %v1377_v41, %v716_v4  ;;  %v729_v8 = vadd.f32 %v1377_v41, %v728_v5 }
 0x1af   : > { %v1090_v9 = vpop.eup %1089  ;;  %759 = vst.msk [vmem:[%s1280_s7 + $0x48] sm:$0xff] %vm572_vm1, %v1088_v6 }
 0x1b0   : > { %763 = vst.msk [vmem:[%s1280_s7 + $0x68] sm:$0xff] %vm572_vm1, %v1090_v9  ;;  %1095 = vtanh.f32 %v717_v7 }
 0x1b1   : > { %1097 = vtanh.f32 %v729_v8  ;;  %v695_v10 = vpop.f32.mrf.mxu0  ;;  %v707_v11 = vpop.f32.mrf.mxu1 }
 0x1b2   : > { %v1092_v12 = vpop.eup %1091  ;;  %v696_v13 = vadd.f32 %v1377_v41, %v695_v10  ;;  %v708_v14 = vadd.f32 %v1377_v41, %v707_v11 }
 0x1b3   : > { %v1094_v15 = vpop.eup %1093  ;;  %752 = vst.msk [vmem:[%s1280_s7 + $0x10] sm:$0xff] %vm572_vm1, %v1092_v12 }
 0x1b4   : > { %756 = vst.msk [vmem:[%s1280_s7 + $0x30] sm:$0xff] %vm572_vm1, %v1094_v15  ;;  %1099 = vtanh.f32 %v696_v13 }
 0x1b5   : > { %1101 = vtanh.f32 %v708_v14  ;;  %v719_v16 = vpop.f32.mrf.mxu2  ;;  %v731_v17 = vpop.f32.mrf.mxu3 }
 0x1b6   : > { %v1096_v18 = vpop.eup %1095  ;;  %v720_v19 = vadd.f32 %v1377_v41, %v719_v16  ;;  %v732_v20 = vadd.f32 %v1377_v41, %v731_v17 }
 0x1b7   : > { %v1098_v21 = vpop.eup %1097  ;;  %760 = vst.msk [vmem:[%s1280_s7 + $0x50] sm:$0xff] %vm572_vm1, %v1096_v18 }
 0x1b8   : > { %764 = vst.msk [vmem:[%s1280_s7 + $0x70] sm:$0xff] %vm572_vm1, %v1098_v21  ;;  %1103 = vtanh.f32 %v720_v19 }
 0x1b9   : > { %1105 = vtanh.f32 %v732_v20 }
 0x1ba   : > { %v1100_v22 = vpop.eup %1099 }
 0x1bb   : > { %v1102_v23 = vpop.eup %1101  ;;  %753 = vst.msk [vmem:[%s1280_s7 + $0x18] sm:$0xff] %vm572_vm1, %v1100_v22 }
 0x1bc   : > { %757 = vst.msk [vmem:[%s1280_s7 + $0x38] sm:$0xff] %vm572_vm1, %v1102_v23 }
 0x1be   : > { %v1104_v24 = vpop.eup %1103 }
 0x1bf   : > { %v1106_v25 = vpop.eup %1105  ;;  %761 = vst.msk [vmem:[%s1280_s7 + $0x58] sm:$0xff] %vm572_vm1, %v1104_v24 }
 0x1c0   : > { %765 = vst.msk [vmem:[%s1280_s7 + $0x78] sm:$0xff] %vm572_vm1, %v1106_v25 }
 0x1c1 PF: > { %s14_s21 = sadd.s32 1, %s1161_s21   ;;  %s1453_s15 = smov %s1141_s16 }
 0x1c2   : > { %p11_p0 = scmp.ge.s32.totalorder %s14_s21, 11   ;;  %s1454_s16 = smov %s1240_s28 }
 0x1c3   : > { %s1455_s17 = smov %s1153_s19  ;;  %s1456_s18 = smov %s1157_s20 }
 0x1c4   : > { %s1457_s19 = smov %s1460_s22  ;;  %s1458_s20 = smov %s1464_s23 }
 0x1c5   :  { %13 = sbr.rel (!%p11_p0) target bundleno = 4 (0x4), region = 123 }

// kernel: gcn_forward.9
= control target key start
LH: loop header
LB: loop body
LE: loop exit
PB: predicated region body
PF: predicated region fallthrough
CT: control target
= control target key end

     0   :  { %s748_s21 = smov [#allocation3]   ;;  %s749_s22 = smov [#allocation4]   ;;  %s2443_s0 = inlined_call_operand.vmem [shape: s32[3], index: 0, kind: input, shape index: {}]   ;;  %s2444_s2 = inlined_call_operand.vmem [shape: f32[384,64], index: 2, kind: input, shape index: {}]   ;;  %s2445_s3 = inlined_call_operand.vmem [shape: f32[2,64], index: 3, kind: output, shape index: {0}]   ;;  %s2446_s4 = inlined_call_operand.vmem [shape: f32[2,64], index: 4, kind: output, shape index: {1}]   ;;  %s2447_s1 = inlined_call_operand.vmem [shape: f32[2], index: 1, kind: input, shape index: {}]  }
   0x1   :  { %s11_s17 = sshll.u32 %s2443_s0, 4  ;;  %s16_s20 = sshll.u32 %s2447_s1, 4  ;;  %s12_s17 = int_to_ptr.vmem [resolvable:$true] %s11_s17  ;;  %s17_s20 = int_to_ptr.vmem [resolvable:$true] %s16_s20 }
   0x2   :  { %14 = dma.vmem_to_smem %s12_s17, 16, %s748_s21, [#allocation2] }
   0x3   :  { %19 = dma.vmem_to_smem %s17_s20, 16, %s749_s22, [#allocation2] }
   0x4   :  { %742 = dma.done.wait [#allocation2], 32 }
   0x5   :  { %743 = vsyncadd [#allocation2], 4294967264 }
   0x6   :  { %22 = sfence }
   0x7   :  { %s781_s23 = smov 0  }
   0x8 LB: > { %s787_s0 = sadd.s32 4294967295, %s746_s23   ;;  %p701_p0 = scmp.ge.s32.totalorder %s746_s23, 1  ;;  %s746_s23 = sphi %s781_s23, %s28_s23  }
   0x9   : > { %p110_p1 = scmp.lt.s32.totalorder %s746_s23, 3 }
   0xb   : > { %p111_p2 = pnand %p701_p0, %p110_p1 }
   0xd   : > { %114 = sbr.rel (%p111_p2) target bundleno = 243 (0xf3), region = 24 }
  0x12   : > { %s122_s1 = sld [smem:[#allocation3 + %s787_s0]]  ;;  %v173_v0 = vlaneseq  ;;  %s123_s24 = sadd.s32 1, %s787_s0  ;;  %v2597_v47 = vmov 0  ;;  %v2600_v49 = vmov 0  ;;  %v2605_v52 = vmov 0  ;;  %v1120_v62 = vld [vmem:[%s2444_s2] sm:$0xff] }
  0x13   : > { %s795_s25 = sld [smem:[#allocation3 + %s123_s24]]  ;;  %v2609_v54 = vmov 0  ;;  %v2612_v55 = vmov 0  ;;  %v2616_v56 = vmov 0  ;;  %v2620_v57 = vmov 0  ;;  %2641 = vst [vmem:[#allocation20_spill] sm:$0xff] %v1120_v62  ;;  %s518_s20 = scalar_lea.vmem %s2445_s3, %s787_s0 }
  0x14   : > { %v792_v1 = vshrl.u32 %v173_v0, 7  ;;  %v2624_v58 = vmov 0  ;;  %v2628_v59 = vmov 0  ;;  %v2633_v60 = vmov 0  ;;  %v1125_v63 = vld [vmem:[%s2444_s2 + $0x8] sm:$0xff]  ;;  %s670_s21 = sld [smem:[#allocation4 + %s787_s0]]  ;;  %s673_s24 = scalar_lea.vmem %s2446_s4, %s787_s0 }
  0x15   : > { %v2638_v61 = vmov 0  ;;  %2642 = vst [vmem:[#allocation21_spill] sm:$0xff] %v1125_v63  ;;  %v2645_v0 = vmov 0 }
  0x16   : > { %v798_v2 = vadd.s32 8, %v792_v1  ;;  %v801_v3 = vadd.s32 16, %v792_v1  ;;  %v804_v4 = vadd.s32 24, %v792_v1  ;;  %v809_v6 = vadd.s32 32, %v792_v1 }
  0x17   : > { %v812_v7 = vadd.s32 40, %v792_v1  ;;  %v815_v8 = vadd.s32 48, %v792_v1  ;;  %v818_v9 = vadd.s32 56, %v792_v1  ;;  %v821_v10 = vadd.s32 64, %v792_v1 }
  0x18   : > { %v806_v5 = vstv %s122_s1  ;;  %v824_v11 = vadd.s32 72, %v792_v1  ;;  %v827_v12 = vadd.s32 80, %v792_v1  ;;  %v830_v13 = vadd.s32 88, %v792_v1 }
  0x19   : > { %v833_v14 = vadd.s32 96, %v792_v1  ;;  %v836_v15 = vadd.s32 104, %v792_v1  ;;  %v839_v16 = vadd.s32 112, %v792_v1  ;;  %vm223_vm0 = vcmp.ge.s32.totalorder %v792_v1, %v806_v5 }
  0x1a   : > { %v844_v17 = vadd.s32 120, %v792_v1  ;;  %v847_v18 = vadd.s32 128, %v792_v1  ;;  %v850_v19 = vadd.s32 136, %v792_v1  ;;  %vm224_vm1 = vcmp.ge.s32.totalorder %v798_v2, %v806_v5 }
  0x1b   : > { %v855_v20 = vadd.s32 144, %v792_v1  ;;  %v858_v21 = vadd.s32 152, %v792_v1  ;;  %v861_v22 = vadd.s32 160, %v792_v1  ;;  %vm225_vm2 = vcmp.ge.s32.totalorder %v801_v3, %v806_v5 }
  0x1c   : > { %v866_v23 = vadd.s32 168, %v792_v1  ;;  %v869_v24 = vadd.s32 176, %v792_v1  ;;  %v872_v25 = vadd.s32 184, %v792_v1  ;;  %vm226_vm3 = vcmp.ge.s32.totalorder %v804_v4, %v806_v5 }
  0x1d   : > { %v877_v26 = vadd.s32 192, %v792_v1  ;;  %v880_v27 = vadd.s32 200, %v792_v1  ;;  %v883_v28 = vadd.s32 208, %v792_v1  ;;  %vm227_vm4 = vcmp.ge.s32.totalorder %v809_v6, %v806_v5 }
  0x1e   : > { %v888_v29 = vadd.s32 216, %v792_v1  ;;  %v891_v30 = vadd.s32 224, %v792_v1  ;;  %v896_v31 = vstv %s795_s25  ;;  %v899_v32 = vadd.s32 232, %v792_v1 }
  0x1f   : > { %v902_v33 = vadd.s32 240, %v792_v1  ;;  %v905_v34 = vadd.s32 248, %v792_v1  ;;  %v910_v35 = vadd.s32 256, %v792_v1  ;;  %v913_v36 = vadd.s32 264, %v792_v1 }
  0x20   : > { %v916_v37 = vadd.s32 272, %v792_v1  ;;  %v921_v38 = vadd.s32 280, %v792_v1  ;;  %v924_v39 = vadd.s32 288, %v792_v1  ;;  %vm272_vm9 = vcmp.lt.s32.totalorder %v792_v1, %v896_v31 }
  0x21   : > { %v931_v40 = vadd.s32 296, %v792_v1  ;;  %v934_v41 = vadd.s32 304, %v792_v1  ;;  %v937_v42 = vadd.s32 312, %v792_v1  ;;  %vm273_vm10 = vcmp.lt.s32.totalorder %v798_v2, %v896_v31  ;;  %vm964_vm15 = vmand %vm223_vm0, %vm272_vm9 }
  0x22   : > { %v942_v43 = vadd.s32 320, %v792_v1  ;;  %v945_v44 = vadd.s32 328, %v792_v1  ;;  %v948_v45 = vadd.s32 336, %v792_v1  ;;  %vm274_vm11 = vcmp.lt.s32.totalorder %v801_v3, %v896_v31  ;;  %vm980_vm5 = vmand %vm224_vm1, %vm273_vm10  ;;  %v1173_v3 = vld [vmem:[%s2444_s2 + $0x18] sm:$0xff] }
  0x23   : > { %v953_v46 = vadd.s32 344, %v792_v1  ;;  %vm275_vm12 = vcmp.lt.s32.totalorder %v804_v4, %v896_v31  ;;  %vm276_vm13 = vcmp.lt.s32.totalorder %v809_v6, %v896_v31  ;;  %vm277_vm14 = vcmp.lt.s32.totalorder %v812_v7, %v896_v31  ;;  %vm1000_vm1 = vmand %vm225_vm2, %vm274_vm11  ;;  %2654 = vst [vmem:[#allocation25_spill] sm:$0xff] %v1173_v3  ;;  %v1178_v4 = vld [vmem:[%s2444_s2 + $0x20] sm:$0xff]  ;;  %v1183_v6 = vld [vmem:[%s2444_s2 + $0x28] sm:$0xff] }
  0x24   : > { %v2598_v47 = vsel %vm964_vm15, 4294967295, %v2597_v47  ;;  %v969_v48 = vadd.s32 352, %v792_v1  ;;  %vm278_vm8 = vcmp.lt.s32.totalorder %v815_v8, %v896_v31  ;;  %vm279_vm7 = vcmp.lt.s32.totalorder %v818_v9, %v896_v31  ;;  %vm1019_vm2 = vmand %vm226_vm3, %vm275_vm12  ;;  %2655 = vst [vmem:[#allocation26_spill] sm:$0xff] %v1178_v4 }
  0x25   : > { %2599 = vst [vmem:[#allocation6_spill] sm:$0xff] %v2598_v47  ;;  %vm280_vm6 = vcmp.lt.s32.totalorder %v821_v10, %v896_v31  ;;  %v2601_v49 = vsel %vm980_vm5, 4294967295, %v2600_v49  ;;  %v985_v50 = vadd.s32 360, %v792_v1  ;;  %v988_v51 = vadd.s32 368, %v792_v1  ;;  %vm1029_vm11 = vmand %vm227_vm4, %vm276_vm13  ;;  %v1326_v47 = vld [vmem:[%s2444_s2 + $0x80] sm:$0xff] }
  0x26   : > { %2602 = vst [vmem:[#allocation7_spill] sm:$0xff] %v2601_v49  ;;  %v2606_v52 = vsel %vm1000_vm1, 4294967295, %v2605_v52  ;;  %v1005_v53 = vadd.s32 376, %v792_v1  ;;  %v2610_v54 = vsel %vm1019_vm2, 4294967295, %v2609_v54  ;;  %v2613_v55 = vsel %vm1029_vm11, 4294967295, %v2612_v55  ;;  %v1148_v1 = vld [vmem:[%s2444_s2 + $0x10] sm:$0xff] }
  0x27   : > { %2603 = vst [vmem:[#allocation8_spill] sm:$0xff] %v985_v50  ;;  %vm2615_vm0 = vcmp.ge.s32.totalorder %v812_v7, %v806_v5  ;;  %vm2623_vm10 = vcmp.ge.s32.totalorder %v818_v9, %v806_v5  ;;  %vm2627_vm12 = vcmp.ge.s32.totalorder %v821_v10, %v806_v5  ;;  %vm2631_vm9 = vcmp.lt.s32.totalorder %v824_v11, %v896_v31  ;;  %v1213_v9 = vld [vmem:[%s2444_s2 + $0x38] sm:$0xff]  ;;  %v1218_v10 = vld [vmem:[%s2444_s2 + $0x40] sm:$0xff]  ;;  %v1288_v50 = vld [vmem:[%s2444_s2 + $0x68] sm:$0xff] }
  0x28   : > { %2604 = vst [vmem:[#allocation9_spill] sm:$0xff] %v988_v51  ;;  %vm1039_vm3 = vmand %vm2615_vm0, %vm277_vm14  ;;  %vm2619_vm14 = vcmp.ge.s32.totalorder %v815_v8, %v806_v5  ;;  %v2651_v2 = vmov 0  ;;  %v2659_v7 = vmov 0  ;;  %v1208_v8 = vld [vmem:[%s2444_s2 + $0x30] sm:$0xff]  ;;  %v370_v51 = vsel %vm1000_vm1, %v1148_v1, -1e+30 }
  0x29   : > { %2607 = vst [vmem:[#allocation10_spill] sm:$0xff] %v2606_v52  ;;  %v2617_v56 = vsel %vm1039_vm3, 4294967295, %v2616_v56  ;;  %vm1057_vm0 = vmand %vm2619_vm14, %vm278_vm8  ;;  %vm2643_vm14 = vcmp.lt.s32.totalorder %v830_v13, %v896_v31  ;;  %v2683_v52 = vmov 0  ;;  %v373_v49 = vsel %vm1039_vm3, %v1183_v6, -1e+30 }
  0x2a   : > { %2608 = vst [vmem:[#allocation11_spill] sm:$0xff] %v1005_v53  ;;  %v2621_v57 = vsel %vm1057_vm0, 4294967295, %v2620_v57  ;;  %vm1067_vm4 = vmand %vm2623_vm10, %vm279_vm7  ;;  %vm2644_vm10 = vcmp.ge.s32.totalorder %v830_v13, %v806_v5  ;;  %vm2658_vm7 = vcmp.ge.s32.totalorder %v836_v15, %v806_v5  ;;  %v2675_v13 = vmov 0 }
  0x2b   : > { %2611 = vst [vmem:[#allocation12_spill] sm:$0xff] %v2610_v54  ;;  %v2625_v58 = vsel %vm1067_vm4, 4294967295, %v2624_v58  ;;  %vm1077_vm8 = vmand %vm2627_vm12, %vm280_vm6  ;;  %vm2632_vm6 = vcmp.ge.s32.totalorder %v824_v11, %v806_v5  ;;  %v2667_v11 = vmov 0  ;;  %v369_v53 = vsel %vm980_vm5, %v1125_v63, -1e+30  ;;  %v1331_v54 = vld [vmem:[%s2444_s2 + $0x88] sm:$0xff] }
  0x2c   : > { %2614 = vst [vmem:[#allocation13_spill] sm:$0xff] %v2613_v55  ;;  %v2629_v59 = vsel %vm1077_vm8, 4294967295, %v2628_v59  ;;  %vm1095_vm12 = vmand %vm2632_vm6, %vm2631_vm9  ;;  %vm2636_vm8 = vcmp.lt.s32.totalorder %v827_v12, %v896_v31  ;;  %vm2637_vm9 = vcmp.ge.s32.totalorder %v827_v12, %v806_v5  ;;  %v368_v12 = vsel %vm964_vm15, %v1120_v62, -1e+30  ;;  %v1293_v62 = vld [vmem:[%s2444_s2 + $0x70] sm:$0xff] }
  0x2d   : > { %2618 = vst [vmem:[#allocation14_spill] sm:$0xff] %v2617_v56  ;;  %v2634_v60 = vsel %vm1095_vm12, 4294967295, %v2633_v60  ;;  %vm1113_vm6 = vmand %vm2637_vm9, %vm2636_vm8  ;;  %vm2649_vm8 = vcmp.lt.s32.totalorder %v833_v14, %v896_v31  ;;  %vm2657_vm9 = vcmp.lt.s32.totalorder %v836_v15, %v896_v31  ;;  %v1250_v15 = vld [vmem:[%s2444_s2 + $0x50] sm:$0xff]  ;;  %v372_v63 = vsel %vm1029_vm11, %v1178_v4, -1e+30 }
  0x2e   : > { %2622 = vst [vmem:[#allocation15_spill] sm:$0xff] %v2621_v57  ;;  %v2639_v61 = vsel %vm1113_vm6, 4294967295, %v2638_v61  ;;  %vm1141_vm6 = vmand %vm2644_vm10, %vm2643_vm14  ;;  %vm2666_vm10 = vcmp.ge.s32.totalorder %v839_v16, %v806_v5  ;;  %vm2674_vm14 = vcmp.ge.s32.totalorder %v844_v17, %v806_v5  ;;  %v2691_v56 = vmov 0  ;;  %v1369_v57 = vld [vmem:[%s2444_s2 + $0xa0] sm:$0xff] }
  0x2f   : > { %2626 = vst [vmem:[#allocation16_spill] sm:$0xff] %v2625_v58  ;;  %v2646_v0 = vsel %vm1141_vm6, 4294967295, %v2645_v0  ;;  %vm2650_vm6 = vcmp.ge.s32.totalorder %v833_v14, %v806_v5  ;;  %v1245_v14 = vld [vmem:[%s2444_s2 + $0x48] sm:$0xff]  ;;  %v375_v55 = vsel %vm1067_vm4, %v1213_v9, -1e+30  ;;  %vm2708_vm11 = vcmp.ge.s32.totalorder %v858_v21, %v806_v5 }
  0x30   : > { %2630 = vst [vmem:[#allocation17_spill] sm:$0xff] %v2629_v59  ;;  %vm1166_vm12 = vmand %vm2650_vm6, %vm2649_vm8  ;;  %vm2665_vm6 = vcmp.lt.s32.totalorder %v839_v16, %v896_v31  ;;  %v1255_v16 = vld [vmem:[%s2444_s2 + $0x58] sm:$0xff]  ;;  %v2709_v58 = vmov 0 }
  0x31   : > { %2635 = vst [vmem:[#allocation18_spill] sm:$0xff] %v2634_v60  ;;  %v2652_v2 = vsel %vm1166_vm12, 4294967295, %v2651_v2  ;;  %vm1201_vm12 = vmand %vm2658_vm7, %vm2657_vm9  ;;  %vm2673_vm7 = vcmp.lt.s32.totalorder %v844_v17, %v896_v31  ;;  %v1283_v17 = vld [vmem:[%s2444_s2 + $0x60] sm:$0xff] }
  0x32   : > { %2640 = vst [vmem:[#allocation19_spill] sm:$0xff] %v2639_v61  ;;  %v2660_v7 = vsel %vm1201_vm12, 4294967295, %v2659_v7  ;;  %vm1232_vm13 = vmand %vm2666_vm10, %vm2665_vm6  ;;  %vm2681_vm10 = vcmp.lt.s32.totalorder %v847_v18, %v896_v31  ;;  %vm2682_vm6 = vcmp.ge.s32.totalorder %v847_v18, %v806_v5  ;;  %v1321_v18 = vld [vmem:[%s2444_s2 + $0x78] sm:$0xff]  ;;  %vm2712_vm1 = vnez %v2652_v2 }
  0x33   : > { %2647 = vst [vmem:[#allocation22_spill] sm:$0xff] %v2646_v0  ;;  %v2668_v11 = vsel %vm1232_vm13, 4294967295, %v2667_v11  ;;  %vm1267_vm9 = vmand %vm2674_vm14, %vm2673_vm7  ;;  %vm2689_vm14 = vcmp.lt.s32.totalorder %v850_v19, %v896_v31  ;;  %vm2690_vm7 = vcmp.ge.s32.totalorder %v850_v19, %v806_v5  ;;  %v1359_v19 = vld [vmem:[%s2444_s2 + $0x90] sm:$0xff] }
  0x34   : > { %2648 = vst [vmem:[#allocation23_spill] sm:$0xff] %v1148_v1  ;;  %v2676_v13 = vsel %vm1267_vm9, 4294967295, %v2675_v13  ;;  %vm1305_vm8 = vmand %vm2682_vm6, %vm2681_vm10  ;;  %v371_v1 = vsel %vm1019_vm2, %v1173_v3, -1e+30  ;;  %vm2694_vm10 = vnez %v2629_v59  ;;  %v1364_v3 = vld [vmem:[%s2444_s2 + $0x98] sm:$0xff]  ;;  %vm2698_vm6 = vcmp.lt.s32.totalorder %v855_v20, %v896_v31 }
  0x35   : > { %2653 = vst [vmem:[#allocation24_spill] sm:$0xff] %v2652_v2  ;;  %v2684_v52 = vsel %vm1305_vm8, 4294967295, %v2683_v52  ;;  %vm1343_vm3 = vmand %vm2690_vm7, %vm2689_vm14  ;;  %v376_v4 = vsel %vm2694_vm10, %v1218_v10, -1e+30  ;;  %vm2699_vm10 = vcmp.ge.s32.totalorder %v855_v20, %v806_v5  ;;  %v2700_v59 = vmov 0  ;;  %v1397_v20 = vld [vmem:[%s2444_s2 + $0xa8] sm:$0xff] }
  0x36   : > { %2656 = vst [vmem:[#allocation27_spill] sm:$0xff] %v1183_v6  ;;  %v2692_v56 = vsel %vm1343_vm3, 4294967295, %v2691_v56  ;;  %v374_v6 = vsel %vm1057_vm0, %v1208_v8, -1e+30  ;;  %vm1381_vm4 = vmand %vm2699_vm10, %vm2698_vm6  ;;  %vm2703_vm0 = vnez %v2634_v60  ;;  %vm2704_vm14 = vnez %v2639_v61  ;;  %v1682_v2 = vld [vmem:[%s2444_s2 + $0xf0] sm:$0xff] }
  0x37   : > { %2661 = vst [vmem:[#allocation28_spill] sm:$0xff] %v2660_v7  ;;  %v2701_v59 = vsel %vm1381_vm4, 4294967295, %v2700_v59  ;;  %vm2705_vm7 = vnez %v2646_v0  ;;  %vm2714_vm6 = vcmp.ge.s32.totalorder %v861_v22, %v806_v5  ;;  %vm2724_vm10 = vcmp.lt.s32.totalorder %v869_v24, %v896_v31  ;;  %v1914_v7 = vld [vmem:[%s2444_s2 + $0x130] sm:$0xff] }
  0x38   : > { %2662 = vst [vmem:[#allocation29_spill] sm:$0xff] %v1208_v8  ;;  %v2726_v60 = vmov 0 }
  0x39   : > { %2663 = vst [vmem:[#allocation30_spill] sm:$0xff] %v1213_v9 }
  0x3a   : > { %2664 = vst [vmem:[#allocation31_spill] sm:$0xff] %v1218_v10  ;;  %v377_v10 = vsel %vm2703_vm0, %v1245_v14, -1e+30  ;;  %vm2707_vm0 = vcmp.lt.s32.totalorder %v858_v21, %v896_v31  ;;  %v2715_v21 = vmov 0 }
  0x3b   : > { %2669 = vst [vmem:[#allocation32_spill] sm:$0xff] %v2668_v11  ;;  %vm1409_vm2 = vmand %vm2708_vm11, %vm2707_vm0  ;;  %vm2713_vm0 = vcmp.lt.s32.totalorder %v861_v22, %v896_v31  ;;  %vm2719_vm11 = vcmp.ge.s32.totalorder %v866_v23, %v806_v5  ;;  %v2720_v22 = vmov 0 }
  0x3c   : > { %2670 = vst [vmem:[#allocation33_spill] sm:$0xff] %v1245_v14  ;;  %v2710_v58 = vsel %vm1409_vm2, 4294967295, %v2709_v58  ;;  %vm1432_vm5 = vmand %vm2714_vm6, %vm2713_vm0  ;;  %vm2718_vm0 = vcmp.lt.s32.totalorder %v866_v23, %v896_v31  ;;  %v1471_v23 = vld [vmem:[%s2444_s2 + $0xb0] sm:$0xff]  ;;  %vm2725_vm6 = vcmp.ge.s32.totalorder %v869_v24, %v806_v5  ;;  %v2734_v24 = vmov 0 }
  0x3d   : > { %2671 = vst [vmem:[#allocation34_spill] sm:$0xff] %v1250_v15  ;;  %v2716_v21 = vsel %vm1432_vm5, 4294967295, %v2715_v21  ;;  %vm1455_vm15 = vmand %vm2719_vm11, %vm2718_vm0  ;;  %vm2729_vm5 = vcmask 523264   ;;  %vm2732_vm0 = vcmp.lt.s32.totalorder %v872_v25, %v896_v31 }
  0x3e   : > { %2672 = vst [vmem:[#allocation35_spill] sm:$0xff] %v1255_v16  ;;  %v2721_v22 = vsel %vm1455_vm15, 4294967295, %v2720_v22  ;;  %vm1483_vm2 = vmand %vm2725_vm6, %vm2724_vm10  ;;  %v417_v9 = vsel %vm2729_vm5, %v368_v12, -inf  ;;  %vm2738_vm6 = vcmp.lt.s32.totalorder %v877_v26, %v896_v31 }
  0x3f   : > { %2677 = vst [vmem:[#allocation36_spill] sm:$0xff] %v2676_v13  ;;  %v2727_v60 = vsel %vm1483_vm2, 4294967295, %v2726_v60  ;;  %vm2730_vm11 = vmmov %vm2729_vm5  ;;  %v1741_v13 = vld [vmem:[%s2444_s2 + $0x100] sm:$0xff] }
  0x40   : > { %2678 = vst [vmem:[#allocation37_spill] sm:$0xff] %v1283_v17  ;;  %v418_v8 = vsel %vm2730_vm11, %v369_v53, -inf  ;;  %vm2731_vm4 = vmmov %vm2729_vm5  ;;  %vm2733_vm5 = vcmp.ge.s32.totalorder %v872_v25, %v806_v5  ;;  %v2740_v25 = vmov 0 }
  0x41   : > { %2679 = vst [vmem:[#allocation38_spill] sm:$0xff] %v1288_v50  ;;  %vm1508_vm11 = vmand %vm2733_vm5, %vm2732_vm0  ;;  %v420_v53 = vsel %vm2731_vm4, %v371_v1, -inf  ;;  %vm2743_vm5 = vcmp.ge.s32.totalorder %v880_v27, %v806_v5 }
  0x42   : > { %2680 = vst [vmem:[#allocation39_spill] sm:$0xff] %v1293_v62  ;;  %v2735_v24 = vsel %vm1508_vm11, 4294967295, %v2734_v24  ;;  %vm2736_vm10 = vmmov %vm2731_vm4 }
  0x43   : > { %2685 = vst [vmem:[#allocation40_spill] sm:$0xff] %v2684_v52  ;;  %v421_v12 = vsel %vm2736_vm10, %v372_v63, -inf  ;;  %vm2737_vm15 = vmmov %vm2731_vm4  ;;  %v2801_v52 = vld [vmem:[#allocation8_spill] sm:$0xff] }
  0x44   : > { %2686 = vst [vmem:[#allocation41_spill] sm:$0xff] %v1321_v18  ;;  %v423_v14 = vsel %vm2737_vm15, %v373_v49, -inf  ;;  %v422_v63 = vmax.f32 %v417_v9, %v421_v12  ;;  %v427_v9 = vsel %vm2737_vm15, %v375_v55, -inf  ;;  %vm2746_vm0 = vmmov %vm2737_vm15  ;;  %v1568_v12 = vld [vmem:[%s2444_s2 + $0xd0] sm:$0xff]  ;;  %v1623_v55 = vld [vmem:[%s2444_s2 + $0xe0] sm:$0xff] }
  0x45   : > { %2687 = vst [vmem:[#allocation42_spill] sm:$0xff] %v1326_v47  ;;  %v424_v1 = vmax.f32 %v418_v8, %v423_v14  ;;  %v429_v14 = vsel %vm2746_vm0, %v376_v4, -inf }
  0x46   : > { %2688 = vst [vmem:[#allocation43_spill] sm:$0xff] %v1331_v54  ;;  %v430_v4 = vmax.f32 %v422_v63, %v429_v14  ;;  %v2755_v63 = vsel %vm2704_vm14, %v1250_v15, -1e+30  ;;  %v2756_v14 = vsel %vm2705_vm7, %v1255_v16, -1e+30  ;;  %vm2812_vm14 = vcmp.ge.s32.totalorder %v921_v38, %v806_v5  ;;  %v1965_v16 = vld [vmem:[%s2444_s2 + $0x140] sm:$0xff] }
  0x47   : > { %2693 = vst [vmem:[#allocation44_spill] sm:$0xff] %v2692_v56 }
  0x48   : > { %2695 = vst [vmem:[#allocation45_spill] sm:$0xff] %v1359_v19 }
  0x49   : > { %2696 = vst [vmem:[#allocation46_spill] sm:$0xff] %v1364_v3 }
  0x4a   : > { %2697 = vst [vmem:[#allocation47_spill] sm:$0xff] %v1369_v57  ;;  %v419_v57 = vsel %vm2731_vm4, %v370_v51, -inf  ;;  %vm2739_vm4 = vcmp.ge.s32.totalorder %v877_v26, %v806_v5  ;;  %v425_v51 = vsel %vm2737_vm15, %v374_v6, -inf  ;;  %v2744_v26 = vmov 0  ;;  %v1591_v6 = vld [vmem:[%s2444_s2 + $0xd8] sm:$0xff] }
  0x4b   : > { %2702 = vst [vmem:[#allocation48_spill] sm:$0xff] %v2701_v59  ;;  %vm1533_vm10 = vmand %vm2739_vm4, %vm2738_vm6  ;;  %vm2742_vm4 = vcmp.lt.s32.totalorder %v880_v27, %v896_v31  ;;  %v426_v8 = vmax.f32 %v419_v57, %v425_v51  ;;  %vm2747_vm6 = vcmp.lt.s32.totalorder %v883_v28, %v896_v31  ;;  %v428_v57 = vmax.f32 %v420_v53, %v427_v9 }
  0x4c   : > { %2706 = vst [vmem:[#allocation49_spill] sm:$0xff] %v1397_v20  ;;  %v1521_v20 = vld [vmem:[%s2444_s2 + $0xc0] sm:$0xff]  ;;  %v2741_v25 = vsel %vm1533_vm10, 4294967295, %v2740_v25  ;;  %vm1556_vm11 = vmand %vm2743_vm5, %vm2742_vm4  ;;  %vm2748_vm10 = vcmp.ge.s32.totalorder %v883_v28, %v806_v5  ;;  %v431_v51 = vsel %vm2746_vm0, %v377_v10, -inf  ;;  %vm2752_vm4 = vcmp.ge.s32.totalorder %v888_v29, %v806_v5 }
  0x4d   : > { %2711 = vst [vmem:[#allocation50_spill] sm:$0xff] %v2710_v58  ;;  %v2745_v26 = vsel %vm1556_vm11, 4294967295, %v2744_v26  ;;  %vm1580_vm15 = vmand %vm2748_vm10, %vm2747_vm6  ;;  %vm2751_vm6 = vcmp.lt.s32.totalorder %v888_v29, %v896_v31  ;;  %v432_v53 = vmax.f32 %v424_v1, %v431_v51  ;;  %v433_v9 = vsel %vm2746_vm0, %v2755_v63, -inf }
  0x4e   : > { %2717 = vst [vmem:[#allocation51_spill] sm:$0xff] %v2716_v21  ;;  %v1496_v21 = vld [vmem:[%s2444_s2 + $0xb8] sm:$0xff]  ;;  %vm1603_vm11 = vmand %vm2752_vm4, %vm2751_vm6  ;;  %vm2759_vm10 = vcmp.ge.s32.totalorder %v891_v30, %v806_v5  ;;  %v434_v63 = vmax.f32 %v426_v8, %v433_v9  ;;  %v2762_v10 = vsel %vm2712_vm1, %v1283_v17, -1e+30  ;;  %vm2763_vm4 = vcmp.lt.s32.totalorder %v899_v32, %v896_v31 }
  0x4f   : > { %2722 = vst [vmem:[#allocation52_spill] sm:$0xff] %v2721_v22  ;;  %vm2757_vm5 = vmmov %vm2746_vm0  ;;  %vm2758_vm0 = vcmp.lt.s32.totalorder %v891_v30, %v896_v31  ;;  %v1650_v30 = vld [vmem:[%s2444_s2 + $0xe8] sm:$0xff]  ;;  %vm2764_vm6 = vcmp.ge.s32.totalorder %v899_v32, %v806_v5  ;;  %v2767_v9 = vsel %vm1201_vm12, %v1288_v50, -1e+30  ;;  %v2768_v51 = vsel %vm1232_vm13, %v1293_v62, -1e+30 }
  0x50   : > { %2723 = vst [vmem:[#allocation53_spill] sm:$0xff] %v1471_v23  ;;  %v1544_v23 = vld [vmem:[%s2444_s2 + $0xc8] sm:$0xff]  ;;  %v435_v29 = vsel %vm2757_vm5, %v2756_v14, -inf  ;;  %vm1635_vm7 = vmand %vm2759_vm10, %vm2758_vm0  ;;  %v437_v49 = vsel %vm2757_vm5, %v2762_v10, -inf  ;;  %vm2771_vm0 = vcmp.ge.s32.totalorder %v902_v33, %v806_v5  ;;  %v2835_v62 = vsel %vm1580_vm15, %v1568_v12, -1e+30 }
  0x51   : > { %2728 = vst [vmem:[#allocation54_spill] sm:$0xff] %v2727_v60  ;;  %v436_v14 = vmax.f32 %v428_v57, %v435_v29  ;;  %vm1662_vm1 = vmand %vm2764_vm6, %vm2763_vm4  ;;  %v438_v10 = vmax.f32 %v430_v4, %v437_v49  ;;  %v439_v29 = vsel %vm2757_vm5, %v2767_v9, -inf  ;;  %v2772_v49 = vmov 0 }
  0x52   : > { %vm2769_vm10 = vmmov %vm2757_vm5  ;;  %vm2770_vm5 = vcmp.lt.s32.totalorder %v902_v33, %v896_v31  ;;  %v2774_v57 = vsel %vm1267_vm9, %v1321_v18, -1e+30  ;;  %v1709_v33 = vld [vmem:[%s2444_s2 + $0xf8] sm:$0xff]  ;;  %vm2775_vm4 = vcmp.lt.s32.totalorder %v905_v34, %v896_v31  ;;  %vm2776_vm6 = vcmp.ge.s32.totalorder %v905_v34, %v806_v5  ;;  %v2820_v18 = vld [vmem:[#allocation11_spill] sm:$0xff] }
  0x53   : > { %v441_v32 = vsel %vm2769_vm10, %v2768_v51, -inf  ;;  %vm1694_vm13 = vmand %vm2771_vm0, %vm2770_vm5  ;;  %v440_v51 = vmax.f32 %v432_v53, %v439_v29  ;;  %v443_v11 = vsel %vm2769_vm10, %v2774_v57, -inf  ;;  %v2777_v53 = vmov 0 }
  0x54   : > { %v2773_v49 = vsel %vm1694_vm13, 4294967295, %v2772_v49  ;;  %v442_v9 = vmax.f32 %v434_v63, %v441_v32  ;;  %vm1721_vm9 = vmand %vm2776_vm6, %vm2775_vm4  ;;  %v444_v57 = vmax.f32 %v436_v14, %v443_v11  ;;  %v2779_v29 = vsel %vm1305_vm8, %v1326_v47, -1e+30  ;;  %v1859_v47 = vld [vmem:[%s2444_s2 + $0x120] sm:$0xff] }
  0x55   : > { %v2778_v53 = vsel %vm1721_vm9, 4294967295, %v2777_v53  ;;  %v445_v32 = vsel %vm2769_vm10, %v2779_v29, -inf  ;;  %v2780_v4 = vsel %vm1343_vm3, %v1331_v54, -1e+30  ;;  %vm2781_vm0 = vmmov %vm2769_vm10  ;;  %vm2782_vm10 = vcmp.lt.s32.totalorder %v910_v35, %v896_v31  ;;  %v2796_v14 = vld [vmem:[#allocation51_spill] sm:$0xff]  ;;  %v1800_v54 = vld [vmem:[%s2444_s2 + $0x110] sm:$0xff] }
  0x56   : > { %v447_v34 = vsel %vm2781_vm0, %v2780_v4, -inf  ;;  %vm2783_vm5 = vcmp.ge.s32.totalorder %v910_v35, %v806_v5  ;;  %v2784_v11 = vmov 0  ;;  %v446_v4 = vmax.f32 %v438_v10, %v445_v32  ;;  %v1768_v35 = vld [vmem:[%s2444_s2 + $0x108] sm:$0xff] }
  0x57   : > { %vm1753_vm3 = vmand %vm2783_vm5, %vm2782_vm10  ;;  %v448_v29 = vmax.f32 %v440_v51, %v447_v34  ;;  %vm2786_vm0 = vnez %v2701_v59  ;;  %vm2788_vm4 = vcmask 523264   ;;  %vm2789_vm6 = vcmp.lt.s32.totalorder %v913_v36, %v896_v31  ;;  %v2798_v59 = vld [vmem:[#allocation47_spill] sm:$0xff] }
  0x58   : > { %v2785_v11 = vsel %vm1753_vm3, 4294967295, %v2784_v11  ;;  %v2787_v63 = vsel %vm2786_vm0, %v1359_v19, -1e+30  ;;  %vm2790_vm8 = vcmp.ge.s32.totalorder %v913_v36, %v806_v5  ;;  %v2791_v10 = vmov 0 }
  0x59   : > { %v449_v56 = vsel %vm2788_vm4, %v2787_v63, -inf  ;;  %vm1780_vm0 = vmand %vm2790_vm8, %vm2789_vm6  ;;  %v400_v51 = vsel %vm1753_vm3, %v1741_v13, -1e+30  ;;  %vm2793_vm4 = vnez %v2710_v58  ;;  %vm2795_vm5 = vcmask 523264  }
  0x5a   : > { %v2792_v10 = vsel %vm1780_vm0, 4294967295, %v2791_v10  ;;  %v450_v63 = vmax.f32 %v442_v9, %v449_v56  ;;  %v2794_v32 = vsel %vm2793_vm4, %v1364_v3, -1e+30  ;;  %vm2797_vm10 = vnez %v2796_v14  ;;  %vm2800_vm12 = vmmov %vm2795_vm5  ;;  %v2807_v14 = vld [vmem:[#allocation49_spill] sm:$0xff] }
  0x5b   : > { %v451_v34 = vsel %vm2795_vm5, %v2794_v32, -inf  ;;  %v2799_v19 = vsel %vm2797_vm10, %v2798_v59, -1e+30  ;;  %vm2802_vm5 = vcmp.lt.s32.totalorder %v916_v37, %v896_v31  ;;  %vm2803_vm4 = vcmp.ge.s32.totalorder %v916_v37, %v806_v5  ;;  %v1827_v37 = vld [vmem:[%s2444_s2 + $0x118] sm:$0xff] }
  0x5c   : > { %v453_v36 = vsel %vm2800_vm12, %v2799_v19, -inf  ;;  %vm1812_vm10 = vmand %vm2803_vm4, %vm2802_vm5  ;;  %v2804_v56 = vmov 0  ;;  %v401_v19 = vsel %vm1780_vm0, %v1768_v35, -1e+30  ;;  %v452_v9 = vmax.f32 %v444_v57, %v451_v34  ;;  %v2810_v3 = vld [vmem:[#allocation9_spill] sm:$0xff] }
  0x5d   : > { %v2805_v56 = vsel %vm1812_vm10, 4294967295, %v2804_v56  ;;  %v454_v32 = vmax.f32 %v446_v4, %v453_v36  ;;  %vm2806_vm12 = vnez %v2721_v22  ;;  %vm2809_vm8 = vcmask 523264   ;;  %v2815_v34 = vld [vmem:[#allocation53_spill] sm:$0xff]  ;;  %2850 = vst [vmem:[#allocation9_spill] sm:$0xff] %v1965_v16 }
  0x5e   : > { %v2808_v59 = vsel %vm2806_vm12, %v2807_v14, -1e+30  ;;  %vm2811_vm6 = vcmp.lt.s32.totalorder %v921_v38, %v896_v31  ;;  %v2813_v57 = vmov 0  ;;  %v2816_v36 = vsel %vm1483_vm2, %v2815_v34, -1e+30  ;;  %vm2819_vm5 = vmmov %vm2809_vm8 }
  0x5f   : > { %v455_v58 = vsel %vm2809_vm8, %v2808_v59, -inf  ;;  %vm1839_vm12 = vmand %vm2812_vm14, %vm2811_vm6  ;;  %v402_v59 = vsel %vm1812_vm10, %v1800_v54, -1e+30  ;;  %v457_v22 = vsel %vm2809_vm8, %v2816_v36, -inf  ;;  %vm2817_vm4 = vnez %v2735_v24 }
  0x60   : > { %v2814_v57 = vsel %vm1839_vm12, 4294967295, %v2813_v57  ;;  %v456_v4 = vmax.f32 %v448_v29, %v455_v58  ;;  %v2818_v14 = vsel %vm2817_vm4, %v1496_v21, -1e+30  ;;  %vm2821_vm8 = vcmp.lt.s32.totalorder %v924_v39, %v896_v31 }
  0x61   : > { %v459_v38 = vsel %vm2819_vm5, %v2818_v14, -inf  ;;  %vm2822_vm2 = vcmp.ge.s32.totalorder %v924_v39, %v806_v5  ;;  %v2823_v58 = vmov 0  ;;  %v403_v14 = vsel %vm1839_vm12, %v1827_v37, -1e+30  ;;  %v1886_v39 = vld [vmem:[%s2444_s2 + $0x128] sm:$0xff] }
  0x62   : > { %vm1871_vm10 = vmand %vm2822_vm2, %vm2821_vm8  ;;  %v458_v29 = vmax.f32 %v450_v63, %v457_v22  ;;  %v460_v36 = vmax.f32 %v452_v9, %v459_v38  ;;  %vm2825_vm5 = vnez %v2741_v25  ;;  %vm2827_vm14 = vcmask 523264  }
  0x63   : > { %v2824_v58 = vsel %vm1871_vm10, 4294967295, %v2823_v58  ;;  %v2826_v60 = vsel %vm2825_vm5, %v1521_v20, -1e+30  ;;  %vm2828_vm2 = vcmp.lt.s32.totalorder %v931_v40, %v896_v31  ;;  %vm2829_vm8 = vcmp.ge.s32.totalorder %v931_v40, %v806_v5 }
  0x64   : > { %v461_v34 = vsel %vm2827_vm14, %v2826_v60, -inf  ;;  %vm1894_vm6 = vmand %vm2829_vm8, %vm2828_vm2  ;;  %v2830_v22 = vmov 0  ;;  %v404_v63 = vsel %vm1871_vm10, %v1859_v47, -1e+30  ;;  %vm2832_vm14 = vnez %v2745_v26 }
  0x65   : > { %v2831_v22 = vsel %vm1894_vm6, 4294967295, %v2830_v22  ;;  %v462_v60 = vmax.f32 %v454_v32, %v461_v34  ;;  %v2833_v9 = vsel %vm2832_vm14, %v1544_v23, -1e+30  ;;  %vm2834_vm12 = vcmask 523264  }
  0x66   : > { %v463_v38 = vsel %vm2834_vm12, %v2833_v9, -inf  ;;  %vm2836_vm0 = vmmov %vm2834_vm12  ;;  %vm2837_vm2 = vcmp.lt.s32.totalorder %v934_v41, %v896_v31  ;;  %vm2838_vm8 = vcmp.ge.s32.totalorder %v934_v41, %v806_v5  ;;  %v2839_v32 = vmov 0  ;;  %v1937_v41 = vld [vmem:[%s2444_s2 + $0x138] sm:$0xff] }
  0x67   : > { %v465_v40 = vsel %vm2836_vm0, %v2835_v62, -inf  ;;  %vm1922_vm10 = vmand %vm2838_vm8, %vm2837_vm2  ;;  %v405_v34 = vsel %vm1894_vm6, %v1886_v39, -1e+30  ;;  %v464_v62 = vmax.f32 %v456_v4, %v463_v38  ;;  %v2841_v50 = vsel %vm1603_vm11, %v1591_v6, -1e+30 }
  0x68   : > { %v2840_v32 = vsel %vm1922_vm10, 4294967295, %v2839_v32  ;;  %v466_v9 = vmax.f32 %v458_v29, %v465_v40  ;;  %v467_v17 = vsel %vm2836_vm0, %v2841_v50, -inf  ;;  %vm2842_vm12 = vcmp.lt.s32.totalorder %v937_v42, %v896_v31  ;;  %vm2849_vm6 = vmmov %vm2836_vm0 }
  0x69   : > { %vm2843_vm2 = vcmp.ge.s32.totalorder %v937_v42, %v806_v5  ;;  %v2844_v4 = vmov 0  ;;  %v406_v29 = vsel %vm1922_vm10, %v1914_v7, -1e+30  ;;  %v468_v50 = vmax.f32 %v460_v36, %v467_v17 }
  0x6a   : > { %vm1945_vm8 = vmand %vm2843_vm2, %vm2842_vm12  ;;  %v2847_v38 = vsel %vm1635_vm7, %v1623_v55, -1e+30  ;;  %v2848_v0 = vsel %vm1662_vm1, %v1650_v30, -1e+30  ;;  %vm2851_vm12 = vcmp.lt.s32.totalorder %v942_v43, %v896_v31  ;;  %vm2852_vm2 = vcmp.ge.s32.totalorder %v942_v43, %v806_v5  ;;  %v1988_v43 = vld [vmem:[%s2444_s2 + $0x148] sm:$0xff] }
  0x6b   : > { %v2845_v4 = vsel %vm1945_vm8, 4294967295, %v2844_v4  ;;  %v469_v40 = vsel %vm2836_vm0, %v2847_v38, -inf  ;;  %v471_v42 = vsel %vm2849_vm6, %v2848_v0, -inf  ;;  %vm1973_vm10 = vmand %vm2852_vm2, %vm2851_vm12  ;;  %v2853_v17 = vmov 0 }
  0x6c   : > { %2846 = vst [vmem:[#allocation8_spill] sm:$0xff] %v2845_v4  ;;  %v2854_v17 = vsel %vm1973_vm10, 4294967295, %v2853_v17  ;;  %v407_v36 = vsel %vm1945_vm8, %v1937_v41, -1e+30  ;;  %v470_v0 = vmax.f32 %v462_v60, %v469_v40  ;;  %v472_v38 = vmax.f32 %v464_v62, %v471_v42  ;;  %vm2857_vm6 = vmmov %vm2836_vm0 }
  0x6d   : > { %2855 = vst [vmem:[#allocation11_spill] sm:$0xff] %v2854_v17  ;;  %v2856_v61 = vsel %vm1694_vm13, %v1682_v2, -1e+30  ;;  %vm2858_vm0 = vcmp.lt.s32.totalorder %v945_v44, %v896_v31  ;;  %vm2859_vm12 = vcmp.ge.s32.totalorder %v945_v44, %v806_v5  ;;  %v2860_v60 = vmov 0  ;;  %vm2863_vm8 = vmmov %vm2857_vm6  ;;  %v2012_v44 = vld [vmem:[%s2444_s2 + $0x150] sm:$0xff] }
  0x6e   : > { %v473_v15 = vsel %vm2857_vm6, %v2856_v61, -inf  ;;  %vm1996_vm2 = vmand %vm2859_vm12, %vm2858_vm0  ;;  %v408_v62 = vsel %vm1973_vm10, %v1965_v16, -1e+30  ;;  %v2862_v40 = vsel %vm1721_vm9, %v1709_v33, -1e+30  ;;  %v477_v4 = vsel %vm2863_vm8, %v400_v51, -inf }
  0x6f   : > { %v2861_v60 = vsel %vm1996_vm2, 4294967295, %v2860_v60  ;;  %v474_v61 = vmax.f32 %v466_v9, %v473_v15  ;;  %v475_v42 = vsel %vm2857_vm6, %v2862_v40, -inf  ;;  %2864 = vst [vmem:[#allocation55_spill] sm:$0xff] %v2012_v44  ;;  %vm2865_vm0 = vcmp.lt.s32.totalorder %v948_v45, %v896_v31  ;;  %vm2870_vm8 = vmmov %vm2857_vm6  ;;  %v2031_v16 = vld [vmem:[%s2444_s2 + $0x158] sm:$0xff] }
  0x70   : > { %vm2866_vm12 = vcmp.ge.s32.totalorder %v948_v45, %v806_v5  ;;  %v2867_v15 = vmov 0  ;;  %v409_v9 = vsel %vm1996_vm2, %v1988_v43, -1e+30  ;;  %v476_v51 = vmax.f32 %v468_v50, %v475_v42  ;;  %vm2875_vm2 = vmmov %vm2870_vm8  ;;  %v2051_v42 = vld [vmem:[%s2444_s2 + $0x160] sm:$0xff] }
  0x71   : > { %vm2020_vm10 = vmand %vm2866_vm12, %vm2865_vm0  ;;  %v478_v40 = vmax.f32 %v470_v0, %v477_v4  ;;  %v479_v17 = vsel %vm2870_vm8, %v401_v19, -inf  ;;  %vm2871_vm6 = vcmp.lt.s32.totalorder %v953_v46, %v896_v31  ;;  %vm2872_vm0 = vcmp.ge.s32.totalorder %v953_v46, %v806_v5  ;;  %2876 = vst [vmem:[#allocation57_spill] sm:$0xff] %v2051_v42  ;;  %v2056_v46 = vld [vmem:[%s2444_s2 + $0x170] sm:$0xff] }
  0x72   : > { %v2868_v15 = vsel %vm2020_vm10, 4294967295, %v2867_v15  ;;  %vm2039_vm12 = vmand %vm2872_vm0, %vm2871_vm6  ;;  %v2873_v45 = vmov 0  ;;  %v410_v4 = vsel %vm2020_vm10, %v2012_v44, -1e+30  ;;  %v480_v19 = vmax.f32 %v472_v38, %v479_v17  ;;  %2877 = vst [vmem:[#allocation58_spill] sm:$0xff] %v2056_v46  ;;  %v2075_v44 = vld [vmem:[%s2444_s2 + $0x168] sm:$0xff] }
  0x73   : > { %2869 = vst [vmem:[#allocation56_spill] sm:$0xff] %v2868_v15  ;;  %v2874_v45 = vsel %vm2039_vm12, 4294967295, %v2873_v45  ;;  %v481_v50 = vsel %vm2870_vm8, %v402_v59, -inf  ;;  %v483_v0 = vsel %vm2875_vm2, %v403_v14, -inf  ;;  %vm2878_vm6 = vcmp.lt.s32.totalorder %v969_v48, %v896_v31 }
  0x74   : > { %vm2879_vm0 = vcmp.ge.s32.totalorder %v969_v48, %v806_v5  ;;  %v2880_v59 = vmov 0  ;;  %v411_v14 = vsel %vm2039_vm12, %v2031_v16, -1e+30  ;;  %v482_v17 = vmax.f32 %v474_v61, %v481_v50  ;;  %2883 = vst [vmem:[#allocation60_spill] sm:$0xff] %v2075_v44  ;;  %v2080_v48 = vld [vmem:[%s2444_s2 + $0x178] sm:$0xff]  ;;  %vm2890_vm12 = vmmov %vm2875_vm2 }
  0x75   : > { %vm2064_vm10 = vmand %vm2879_vm0, %vm2878_vm6  ;;  %v484_v38 = vmax.f32 %v476_v51, %v483_v0  ;;  %v485_v15 = vsel %vm2875_vm2, %v404_v63, -inf  ;;  %2884 = vst [vmem:[#allocation61_spill] sm:$0xff] %v2080_v48  ;;  %vm2885_vm8 = vcmp.lt.s32.totalorder %v2801_v52, %v896_v31  ;;  %vm2886_vm6 = vcmp.ge.s32.totalorder %v2801_v52, %v806_v5 }
  0x76   : > { %v2881_v59 = vsel %vm2064_vm10, 4294967295, %v2880_v59  ;;  %vm2088_vm0 = vmand %vm2886_vm6, %vm2885_vm8  ;;  %v2887_v61 = vmov 0  ;;  %v412_v63 = vsel %vm2064_vm10, %v2051_v42, -1e+30  ;;  %v486_v51 = vmax.f32 %v478_v40, %v485_v15 }
  0x77   : > { %2882 = vst [vmem:[#allocation59_spill] sm:$0xff] %v2881_v59  ;;  %v2888_v61 = vsel %vm2088_vm0, 4294967295, %v2887_v61  ;;  %v487_v50 = vsel %vm2875_vm2, %v405_v34, -inf  ;;  %v489_v0 = vsel %vm2890_vm12, %v406_v29, -inf  ;;  %vm2891_vm3 = vcmp.lt.s32.totalorder %v2810_v3, %v896_v31  ;;  %vm2896_vm8 = vmmov %vm2875_vm2 }
  0x78   : > { %2889 = vst [vmem:[#allocation62_spill] sm:$0xff] %v2888_v61  ;;  %vm2892_vm9 = vcmp.ge.s32.totalorder %v2810_v3, %v806_v5  ;;  %v2893_v52 = vmov 0  ;;  %v413_v59 = vsel %vm2088_vm0, %v2075_v44, -1e+30  ;;  %v488_v42 = vmax.f32 %v480_v19, %v487_v50 }
  0x79   : > { %vm2103_vm13 = vmand %vm2892_vm9, %vm2891_vm3  ;;  %v490_v15 = vmax.f32 %v482_v17, %v489_v0  ;;  %v491_v34 = vsel %vm2896_vm8, %v407_v36, -inf  ;;  %vm2897_vm12 = vcmp.lt.s32.totalorder %v2820_v18, %v896_v31  ;;  %vm2898_vm6 = vcmp.ge.s32.totalorder %v2820_v18, %v806_v5 }
  0x7a   : > { %v2894_v52 = vsel %vm2103_vm13, 4294967295, %v2893_v52  ;;  %vm2117_vm2 = vmand %vm2898_vm6, %vm2897_vm12  ;;  %v2899_v3 = vmov 0  ;;  %v414_v29 = vsel %vm2103_vm13, %v2056_v46, -1e+30  ;;  %v492_v40 = vmax.f32 %v484_v38, %v491_v34 }
  0x7b   : > { %2895 = vst [vmem:[#allocation63_spill] sm:$0xff] %v2894_v52  ;;  %v2900_v3 = vsel %vm2117_vm2, 4294967295, %v2899_v3  ;;  %vm2902_vm3 = vmmov %vm2896_vm8  ;;  %v415_v31 = vsel %vm2117_vm2, %v2080_v48, -1e+30  ;;  %v2910_v48 = vld [vmem:[#allocation6_spill] sm:$0xff] }
  0x7c   : > { %2901 = vst [vmem:[#allocation64_spill] sm:$0xff] %v2900_v3  ;;  %v493_v19 = vsel %vm2902_vm3, %v408_v62, -inf  ;;  %vm2903_vm9 = vmmov %vm2902_vm3  ;;  %vm2911_vm2 = vnez %v2910_v48 }
  0x7d   : > { %v495_v17 = vsel %vm2903_vm9, %v409_v9, -inf  ;;  %v494_v36 = vmax.f32 %v486_v51, %v493_v19  ;;  %vm2904_vm8 = vmmov %vm2902_vm3  ;;  %v2921_v19 = vld [vmem:[#allocation10_spill] sm:$0xff] }
  0x7e   : > { %v496_v50 = vmax.f32 %v488_v42, %v495_v17  ;;  %v497_v5 = vsel %vm2904_vm8, %v410_v4, -inf  ;;  %vm2905_vm12 = vmmov %vm2902_vm3  ;;  %v2912_v42 = vld [vmem:[#allocation20_spill] sm:$0xff]  ;;  %v2923_v17 = vld [vmem:[#allocation25_spill] sm:$0xff] }
  0x7f   : > { %v498_v18 = vmax.f32 %v490_v15, %v497_v5  ;;  %v499_v0 = vsel %vm2905_vm12, %v411_v14, -inf  ;;  %vm2906_vm6 = vmmov %vm2902_vm3  ;;  %v2913_v51 = vsel %vm2911_vm2, %v2912_v42, 0.0  ;;  %v2915_v15 = vld [vmem:[#allocation7_spill] sm:$0xff]  ;;  %v2917_v14 = vld [vmem:[#allocation21_spill] sm:$0xff] }
  0x80   : > { %v501_v61 = vsel %vm2906_vm6, %v412_v63, -inf  ;;  %vm2907_vm0 = vmmov %vm2902_vm3  ;;  %v500_v38 = vmax.f32 %v492_v40, %v499_v0  ;;  %vm2916_vm12 = vnez %v2915_v15  ;;  %v2927_v5 = vld [vmem:[#allocation13_spill] sm:$0xff]  ;;  %v2964_v15 = vld [vmem:[#allocation15_spill] sm:$0xff] }
  0x81   : > { %v503_v52 = vsel %vm2907_vm0, %v413_v59, -inf  ;;  %v502_v34 = vmax.f32 %v494_v36, %v501_v61  ;;  %vm2908_vm3 = vmmov %vm2907_vm0  ;;  %v2918_v63 = vsel %vm2916_vm12, %v2917_v14, 0.0  ;;  %vm2928_vm2 = vnez %v2927_v5  ;;  %v2941_v5 = vld [vmem:[#allocation11_spill] sm:$0xff]  ;;  %v2945_v14 = vld [vmem:[#allocation56_spill] sm:$0xff] }
  0x82   : > { %v504_v62 = vmax.f32 %v496_v50, %v503_v52  ;;  %v505_v9 = vsel %vm2908_vm3, %v414_v29, -inf  ;;  %vm2909_vm9 = vmmov %vm2907_vm0  ;;  %v2920_v52 = vld [vmem:[#allocation23_spill] sm:$0xff]  ;;  %v2926_v50 = vld [vmem:[#allocation26_spill] sm:$0xff]  ;;  %vm2965_vm13 = vnez %v2964_v15 }
  0x83   : > { %v506_v46 = vmax.f32 %v498_v18, %v505_v9  ;;  %v507_v3 = vsel %vm2909_vm9, %v415_v31, -inf  ;;  %vm2914_vm8 = vmmov %vm2907_vm0  ;;  %v2924_v31 = vld [vmem:[#allocation12_spill] sm:$0xff]  ;;  %v525_v18 = vsel %vm2928_vm2, %v2926_v50, 0.0  ;;  %vm2929_vm9 = vnez %v2773_v49  ;;  %v2940_v50 = vld [vmem:[#allocation9_spill] sm:$0xff] }
  0x84   : > { %v569_v4 = vsel %vm2914_vm8, %v2913_v51, 0.0  ;;  %vm2919_vm6 = vmmov %vm2907_vm0  ;;  %v508_v40 = vmax.f32 %v500_v38, %v507_v3  ;;  %v509_v61 = vmax.f32 %v502_v34, %v504_v62  ;;  %vm2922_vm0 = vnez %v2921_v19  ;;  %v2958_v38 = vld [vmem:[#allocation27_spill] sm:$0xff]  ;;  %v2959_v3 = vld [vmem:[#allocation14_spill] sm:$0xff] }
  0x85   : > { %v570_v59 = vsel %vm2919_vm6, %v2918_v63, 0.0  ;;  %v523_v29 = vsel %vm2922_vm0, %v2920_v52, 0.0  ;;  %vm2925_vm3 = vnez %v2924_v31  ;;  %vm2935_vm2 = vnez %v2824_v58  ;;  %v2938_v31 = vld [vmem:[#allocation8_spill] sm:$0xff]  ;;  %v2944_v63 = vld [vmem:[#allocation55_spill] sm:$0xff]  ;;  %v2963_v34 = vld [vmem:[#allocation29_spill] sm:$0xff] }
  0x86   : > { %v524_v48 = vsel %vm2925_vm3, %v2923_v17, 0.0  ;;  %v510_v36 = vmax.f32 %v506_v46, %v508_v40  ;;  %v571_v9 = vadd.f32 %v570_v59, %v569_v4  ;;  %vm2957_vm3 = vcmask 523264   ;;  %v2968_v52 = vld [vmem:[#allocation16_spill] sm:$0xff]  ;;  %v2976_v15 = vld [vmem:[#allocation18_spill] sm:$0xff] }
  0x87   : > { %v572_v46 = vsel %vm2957_vm3, %v523_v29, 0.0  ;;  %vm2960_vm6 = vnez %v2959_v3  ;;  %vm2961_vm10 = vmmov %vm2957_vm3  ;;  %v2967_v29 = vld [vmem:[#allocation30_spill] sm:$0xff] }
  0x88   : > { %v511_v62 = vmax.f32 %v509_v61, %v510_v36  ;;  %v526_v36 = vsel %vm2960_vm6, %v2958_v38, 0.0  ;;  %v573_v0 = vadd.f32 %v572_v46, %v571_v9  ;;  %v574_v51 = vsel %vm2961_vm10, %v524_v48, 0.0  ;;  %vm2962_vm8 = vmmov %vm2957_vm3  ;;  %v2971_v9 = vld [vmem:[#allocation31_spill] sm:$0xff]  ;;  %v2972_v38 = vld [vmem:[#allocation17_spill] sm:$0xff] }
  0x89   : > { %v576_v61 = vsel %vm2962_vm8, %v525_v18, 0.0  ;;  %vm2966_vm0 = vmmov %vm2957_vm3  ;;  %vm2969_vm3 = vnez %v2968_v52  ;;  %vm2596_vm10 = vcmask 516096   ;;  %v2979_v52 = vld [vmem:[#allocation34_spill] sm:$0xff] }
  0x8a   : > { %v512_v40 = vrot.slane %v511_v62, 4  ;;  %v575_v42 = vadd.f32 %v574_v51, %v573_v0  ;;  %v578_v19 = vsel %vm2966_vm0, %v526_v36, 0.0  ;;  %v528_v4 = vsel %vm2969_vm3, %v2967_v29, 0.0  ;;  %vm2970_vm8 = vmmov %vm2966_vm0  ;;  %v2975_v51 = vld [vmem:[#allocation33_spill] sm:$0xff] }
  0x8b   : > { %vm2974_vm6 = vmmov %vm2966_vm0  ;;  %vm2977_vm0 = vnez %v2976_v15 }
  0x8c   : > { %v513_v59 = vmax.f32 %v511_v62, %v512_v40  ;;  %v527_v62 = vsel %vm2965_vm13, %v2963_v34, 0.0  ;;  %v577_v3 = vadd.f32 %v576_v61, %v575_v42  ;;  %vm2973_vm13 = vnez %v2972_v38  ;;  %vm2978_vm3 = vmmov %vm2974_vm6 }
  0x8d   : > { %v580_v48 = vsel %vm2970_vm8, %v527_v62, 0.0  ;;  %v529_v0 = vsel %vm2973_vm13, %v2971_v9, 0.0  ;;  %v582_v34 = vsel %vm2974_vm6, %v528_v4, 0.0  ;;  %v530_v42 = vsel %vm2977_vm0, %v2975_v51, 0.0  ;;  %vm2982_vm12 = vmmov %vm2978_vm3  ;;  %v2988_v9 = vld [vmem:[#allocation24_spill] sm:$0xff] }
  0x8e   : > { %v514_v17 = vrot.slane %v513_v59, 2  ;;  %v579_v46 = vadd.f32 %v578_v19, %v577_v3  ;;  %v584_v61 = vsel %vm2978_vm3, %v529_v0, 0.0  ;;  %v586_v62 = vsel %vm2982_vm12, %v530_v42, 0.0  ;;  %v2984_v19 = vld [vmem:[#allocation22_spill] sm:$0xff]  ;;  %vm2986_vm6 = vmmov %vm2978_vm3  ;;  %v2991_v51 = vld [vmem:[#allocation28_spill] sm:$0xff] }
  0x8f   : > { %vm2985_vm13 = vnez %v2984_v19  ;;  %vm2989_vm0 = vnez %v2988_v9  ;;  %vm2993_vm12 = vmmov %vm2978_vm3 }
  0x90   : > { %v515_v44 = vmax.f32 %v513_v59, %v514_v17  ;;  %v581_v59 = vadd.f32 %v580_v48, %v579_v46  ;;  %v2980_v17 = vld [vmem:[#allocation19_spill] sm:$0xff]  ;;  %v2990_v46 = vld [vmem:[#allocation38_spill] sm:$0xff] }
  0x91   : > { %vm2981_vm8 = vnez %v2980_v17 }
  0x92   : > { %v516_v40 = vrot.slane %v515_v44, 1  ;;  %v583_v36 = vadd.f32 %v582_v34, %v581_v59  ;;  %v2994_v59 = vld [vmem:[#allocation39_spill] sm:$0xff] }
  0x94   : > { %v517_v18 = vmax.f32 %v515_v44, %v516_v40  ;;  %v531_v44 = vsel %vm2981_vm8, %v2979_v52, 0.0  ;;  %v2983_v40 = vld [vmem:[#allocation35_spill] sm:$0xff]  ;;  %v585_v29 = vadd.f32 %v584_v61, %v583_v36  ;;  %vm2992_vm8 = vnez %v2991_v51  ;;  %v2995_v52 = vld [vmem:[#allocation32_spill] sm:$0xff]  ;;  %v2998_v36 = vld [vmem:[#allocation41_spill] sm:$0xff] }
  0x95   : > { %v532_v4 = vsel %vm2985_vm13, %v2983_v40, 0.0  ;;  %v588_v3 = vsel %vm2986_vm6, %v531_v44, 0.0  ;;  %v534_v34 = vsel %vm2992_vm8, %v2990_v46, 0.0  ;;  %vm2996_vm13 = vnez %v2995_v52  ;;  %vm2997_vm6 = vmmov %vm2978_vm3  ;;  %v2999_v40 = vld [vmem:[#allocation36_spill] sm:$0xff] }
  0x96   : > { %520 = vst.msk [vmem:[%s518_s20] sm:$0x1] %vm2596_vm10, %v517_v18  ;;  %v2987_v18 = vld [vmem:[#allocation37_spill] sm:$0xff]  ;;  %v587_v38 = vadd.f32 %v586_v62, %v585_v29  ;;  %v590_v0 = vsel %vm2978_vm3, %v532_v4, 0.0  ;;  %v535_v61 = vsel %vm2996_vm13, %v2994_v59, 0.0  ;;  %v594_v44 = vsel %vm2997_vm6, %v534_v34, 0.0  ;;  %vm3008_vm6 = vmmov %vm2978_vm3 }
  0x97   : > { %v533_v48 = vsel %vm2989_vm0, %v2987_v18, 0.0  ;;  %vm3000_vm0 = vnez %v2999_v40  ;;  %v596_v4 = vsel %vm2978_vm3, %v535_v61, 0.0  ;;  %v3001_v29 = vld [vmem:[#allocation42_spill] sm:$0xff]  ;;  %v3002_v18 = vld [vmem:[#allocation40_spill] sm:$0xff]  ;;  %vm3027_vm10 = vmmov %vm2978_vm3 }
  0x98   : > { %v589_v15 = vadd.f32 %v588_v3, %v587_v38  ;;  %v592_v42 = vsel %vm2993_vm12, %v533_v48, 0.0  ;;  %v536_v62 = vsel %vm3000_vm0, %v2998_v36, 0.0  ;;  %vm3003_vm8 = vnez %v3002_v18  ;;  %vm3004_vm12 = vmmov %vm2978_vm3  ;;  %v3005_v38 = vld [vmem:[#allocation43_spill] sm:$0xff]  ;;  %v3006_v46 = vld [vmem:[#allocation44_spill] sm:$0xff] }
  0x99   : > { %v537_v3 = vsel %vm3003_vm8, %v3001_v29, 0.0  ;;  %v598_v48 = vsel %vm3004_vm12, %v536_v62, 0.0  ;;  %vm3007_vm13 = vnez %v3006_v46  ;;  %v3010_v59 = vld [vmem:[#allocation48_spill] sm:$0xff]  ;;  %v3013_v36 = vld [vmem:[#allocation50_spill] sm:$0xff]  ;;  %vm3015_vm12 = vmmov %vm2978_vm3 }
  0x9a   : > { %v591_v17 = vadd.f32 %v590_v0, %v589_v15  ;;  %v538_v0 = vsel %vm3007_vm13, %v3005_v38, 0.0  ;;  %v600_v34 = vsel %vm3008_vm6, %v537_v3, 0.0  ;;  %v3009_v15 = vld [vmem:[#allocation45_spill] sm:$0xff]  ;;  %vm3011_vm0 = vnez %v3010_v59  ;;  %v3017_v29 = vld [vmem:[#allocation51_spill] sm:$0xff]  ;;  %vm3019_vm6 = vmmov %vm2978_vm3 }
  0x9b   : > { %v602_v61 = vsel %vm2978_vm3, %v538_v0, 0.0  ;;  %vm3014_vm8 = vnez %v3013_v36  ;;  %vm3018_vm13 = vnez %v3017_v29  ;;  %v3021_v38 = vld [vmem:[#allocation52_spill] sm:$0xff]  ;;  %v3028_v36 = vsel %vm2817_vm4, %v1496_v21, 0.0  ;;  %vm3035_vm4 = vmmov %vm2978_vm3 }
  0x9c   : > { %v593_v19 = vadd.f32 %v592_v42, %v591_v17  ;;  %v539_v42 = vsel %vm3011_vm0, %v3009_v15, 0.0  ;;  %v3012_v17 = vld [vmem:[#allocation46_spill] sm:$0xff]  ;;  %vm3022_vm0 = vnez %v3021_v38  ;;  %v3034_v21 = vsel %vm1580_vm15, %v1568_v12, 0.0  ;;  %vm3041_vm15 = vmmov %vm2978_vm3 }
  0x9d   : > { %v604_v62 = vsel %vm3015_vm12, %v539_v42, 0.0  ;;  %v3024_v15 = vld [vmem:[#allocation54_spill] sm:$0xff]  ;;  %vm3026_vm12 = vmmov %vm2978_vm3  ;;  %v620_v24 = vsel %vm3035_vm4, %v3034_v21, 0.0  ;;  %v3040_v12 = vsel %vm1662_vm1, %v1650_v30, 0.0 }
  0x9e   : > { %v595_v9 = vadd.f32 %v594_v44, %v593_v19  ;;  %v540_v44 = vsel %vm3014_vm8, %v3012_v17, 0.0  ;;  %v3016_v19 = vld [vmem:[#allocation47_spill] sm:$0xff]  ;;  %vm3025_vm8 = vnez %v3024_v15  ;;  %v626_v27 = vsel %vm3041_vm15, %v3040_v12, 0.0  ;;  %vm3049_vm1 = vmmov %vm3035_vm4 }
  0x9f   : > { %v606_v3 = vsel %vm3019_vm6, %v540_v44, 0.0  ;;  %vm3031_vm6 = vmmov %vm2978_vm3  ;;  %vm3064_vm15 = vnez %v2840_v32 }
  0xa0   : > { %v597_v51 = vadd.f32 %v596_v4, %v595_v9  ;;  %v541_v4 = vsel %vm3018_vm13, %v3016_v19, 0.0  ;;  %v3020_v9 = vld [vmem:[#allocation49_spill] sm:$0xff]  ;;  %vm3029_vm13 = vmmov %vm2978_vm3 }
  0xa1   : > { %v608_v0 = vsel %vm2978_vm3, %v541_v4, 0.0  ;;  %v614_v44 = vsel %vm3029_vm13, %v3028_v36, 0.0  ;;  %v3032_v4 = vsel %vm2832_vm14, %v1544_v23, 0.0  ;;  %v3038_v23 = vsel %vm1635_vm7, %v1623_v55, 0.0  ;;  %vm3039_vm14 = vmmov %vm2978_vm3 }
  0xa2   : > { %v599_v52 = vadd.f32 %v598_v48, %v597_v51  ;;  %v542_v48 = vsel %vm3022_vm0, %v3020_v9, 0.0  ;;  %v3023_v51 = vld [vmem:[#allocation53_spill] sm:$0xff]  ;;  %v624_v26 = vsel %vm3039_vm14, %v3038_v23, 0.0  ;;  %vm3044_vm0 = vnez %v2778_v53  ;;  %vm3046_vm7 = vmmov %vm2978_vm3 }
  0xa3   : > { %v610_v42 = vsel %vm3026_vm12, %v542_v48, 0.0  ;;  %v3045_v55 = vsel %vm3044_vm0, %v1709_v33, 0.0  ;;  %vm3053_vm12 = vnez %v2805_v56  ;;  %vm3055_vm13 = vmmov %vm3049_vm1  ;;  %vm3067_vm0 = vnez %v2938_v31  ;;  %v3099_v23 = vld [vmem:[#allocation61_spill] sm:$0xff] }
  0xa4   : > { %v601_v40 = vadd.f32 %v600_v34, %v599_v52  ;;  %v543_v34 = vsel %vm3025_vm8, %v3023_v51, 0.0  ;;  %v630_v1 = vsel %vm3046_vm7, %v3045_v55, 0.0  ;;  %vm3050_vm8 = vnez %v2792_v10  ;;  %vm3060_vm4 = vmmov %vm3049_vm1 }
  0xa5   : > { %v612_v17 = vsel %vm3027_vm10, %v543_v34, 0.0  ;;  %vm3033_vm10 = vmmov %vm2978_vm3  ;;  %v3054_v33 = vsel %vm3053_vm12, %v1800_v54, 0.0  ;;  %vm3070_vm7 = vnez %v2941_v5 }
  0xa6   : > { %v603_v18 = vadd.f32 %v602_v61, %v601_v40  ;;  %v636_v53 = vsel %vm3055_vm13, %v3054_v33, 0.0  ;;  %vm3063_vm14 = vmmov %vm3049_vm1  ;;  %vm3079_vm13 = vnez %v2874_v45 }
  0xa8   : > { %v605_v46 = vadd.f32 %v604_v62, %v603_v18  ;;  %v3030_v62 = vsel %vm2825_vm5, %v1521_v20, 0.0  ;;  %v618_v18 = vsel %vm3033_vm10, %v3032_v4, 0.0  ;;  %v3036_v20 = vsel %vm1603_vm11, %v1591_v6, 0.0  ;;  %vm3037_vm5 = vmmov %vm2978_vm3 }
  0xa9   : > { %v616_v19 = vsel %vm3031_vm6, %v3030_v62, 0.0  ;;  %v622_v25 = vsel %vm3037_vm5, %v3036_v20, 0.0  ;;  %v3042_v6 = vsel %vm2929_vm9, %v1682_v2, 0.0  ;;  %vm3043_vm11 = vmmov %vm2978_vm3  ;;  %vm3047_vm3 = vnez %v2785_v11 }
  0xaa   : > { %v607_v59 = vadd.f32 %v606_v3, %v605_v46  ;;  %v628_v28 = vsel %vm3043_vm11, %v3042_v6, 0.0  ;;  %v3048_v30 = vsel %vm3047_vm3, %v1741_v13, 0.0  ;;  %v3051_v2 = vsel %vm3050_vm8, %v1768_v35, 0.0  ;;  %vm3052_vm9 = vmmov %vm3049_vm1 }
  0xab   : > { %v632_v8 = vsel %vm3049_vm1, %v3048_v30, 0.0  ;;  %v634_v49 = vsel %vm3052_vm9, %v3051_v2, 0.0  ;;  %vm3056_vm6 = vnez %v2814_v57  ;;  %vm3058_vm10 = vmmov %vm3049_vm1  ;;  %v3059_v35 = vsel %vm2935_vm2, %v1859_v47, 0.0 }
  0xac   : > { %v609_v52 = vadd.f32 %v608_v0, %v607_v59  ;;  %v3057_v13 = vsel %vm3056_vm6, %v1827_v37, 0.0  ;;  %v640_v10 = vsel %vm3060_vm4, %v3059_v35, 0.0  ;;  %vm3061_vm5 = vnez %v2831_v22  ;;  %vm3066_vm11 = vmmov %vm3049_vm1 }
  0xad   : > { %v638_v11 = vsel %vm3058_vm10, %v3057_v13, 0.0  ;;  %v3062_v54 = vsel %vm3061_vm5, %v1886_v39, 0.0  ;;  %v3065_v37 = vsel %vm3064_vm15, %v1914_v7, 0.0  ;;  %v3068_v47 = vsel %vm3067_vm0, %v1937_v41, 0.0  ;;  %vm3069_vm2 = vmmov %vm3049_vm1 }
  0xae   : > { %v611_v61 = vadd.f32 %v610_v42, %v609_v52  ;;  %v642_v56 = vsel %vm3063_vm14, %v3062_v54, 0.0  ;;  %v644_v57 = vsel %vm3066_vm11, %v3065_v37, 0.0  ;;  %v646_v58 = vsel %vm3069_vm2, %v3068_v47, 0.0  ;;  %vm3072_vm3 = vmmov %vm3049_vm1 }
  0xaf   : > { %v3071_v39 = vsel %vm3070_vm7, %v2940_v50, 0.0  ;;  %vm3073_vm1 = vnez %v2861_v60  ;;  %vm3075_vm8 = vmmov %vm3069_vm2  ;;  %vm3076_vm9 = vnez %v2945_v14  ;;  %v3080_v50 = vsel %vm3079_vm13, %v2031_v16, 0.0  ;;  %v3087_v14 = vld [vmem:[#allocation62_spill] sm:$0xff] }
  0xb0   : > { %v613_v40 = vadd.f32 %v612_v17, %v611_v61  ;;  %v648_v22 = vsel %vm3072_vm3, %v3071_v39, 0.0  ;;  %v3074_v7 = vsel %vm3073_vm1, %v1988_v43, 0.0  ;;  %v3077_v41 = vsel %vm3076_vm9, %v2944_v63, 0.0  ;;  %vm3078_vm12 = vmmov %vm3069_vm2  ;;  %v3084_v43 = vld [vmem:[#allocation57_spill] sm:$0xff]  ;;  %v3089_v63 = vld [vmem:[#allocation60_spill] sm:$0xff] }
  0xb1   : > { %v650_v32 = vsel %vm3075_vm8, %v3074_v7, 0.0  ;;  %vm3081_vm6 = vmmov %vm3069_vm2  ;;  %vm3088_vm5 = vnez %v3087_v14  ;;  %v3094_v16 = vld [vmem:[#allocation58_spill] sm:$0xff]  ;;  %vm3101_vm7 = vcmask 516096  }
  0xb2   : > { %v615_v29 = vadd.f32 %v614_v44, %v613_v40  ;;  %v652_v40 = vsel %vm3078_vm12, %v3077_v41, 0.0  ;;  %v654_v62 = vsel %vm3081_vm6, %v3080_v50, 0.0  ;;  %vm3086_vm4 = vmmov %vm3069_vm2 }
  0xb3   : > { %vm3091_vm14 = vmmov %vm3069_vm2 }
  0xb4   : > { %v617_v3 = vadd.f32 %v616_v19, %v615_v29  ;;  %v3082_v19 = vld [vmem:[#allocation59_spill] sm:$0xff]  ;;  %vm3096_vm11 = vmmov %vm3069_vm2 }
  0xb5   : > { %vm3083_vm10 = vnez %v3082_v19 }
  0xb6   : > { %v619_v9 = vadd.f32 %v618_v18, %v617_v3  ;;  %v3085_v29 = vsel %vm3083_vm10, %v3084_v43, 0.0  ;;  %v3090_v3 = vsel %vm3088_vm5, %v3089_v63, 0.0 }
  0xb7   : > { %v656_v4 = vsel %vm3086_vm4, %v3085_v29, 0.0  ;;  %v658_v21 = vsel %vm3091_vm14, %v3090_v3, 0.0 }
  0xb8   : > { %v621_v38 = vadd.f32 %v620_v24, %v619_v9  ;;  %v3092_v24 = vld [vmem:[#allocation63_spill] sm:$0xff] }
  0xb9   : > { %vm3093_vm15 = vnez %v3092_v24 }
  0xba   : > { %v623_v48 = vadd.f32 %v622_v25, %v621_v38  ;;  %v3095_v9 = vsel %vm3093_vm15, %v3094_v16, 0.0  ;;  %v3097_v38 = vld [vmem:[#allocation64_spill] sm:$0xff] }
  0xbb   : > { %v660_v20 = vsel %vm3096_vm11, %v3095_v9, 0.0  ;;  %vm3098_vm0 = vnez %v3097_v38 }
  0xbc   : > { %v625_v46 = vadd.f32 %v624_v26, %v623_v48  ;;  %v3100_v26 = vsel %vm3098_vm0, %v3099_v23, 0.0 }
  0xbd   : > { %v662_v48 = vsel %vm3069_vm2, %v3100_v26, 0.0 }
  0xbe   : > { %v627_v0 = vadd.f32 %v626_v27, %v625_v46 }
  0xc0   : > { %v629_v51 = vadd.f32 %v628_v28, %v627_v0 }
  0xc2   : > { %v631_v15 = vadd.f32 %v630_v1, %v629_v51  ;;  %v671_v1 = vstv %s670_s21 }
  0xc4   : > { %v633_v34 = vadd.f32 %v632_v8, %v631_v15 }
  0xc6   : > { %v635_v59 = vadd.f32 %v634_v49, %v633_v34 }
  0xc8   : > { %v637_v42 = vadd.f32 %v636_v53, %v635_v59 }
  0xca   : > { %v639_v52 = vadd.f32 %v638_v11, %v637_v42 }
  0xcc   : > { %v641_v17 = vadd.f32 %v640_v10, %v639_v52 }
  0xce   : > { %v643_v61 = vadd.f32 %v642_v56, %v641_v17 }
  0xd0   : > { %v645_v36 = vadd.f32 %v644_v57, %v643_v61 }
  0xd2   : > { %v647_v44 = vadd.f32 %v646_v58, %v645_v36 }
  0xd4   : > { %v649_v31 = vadd.f32 %v648_v22, %v647_v44 }
  0xd6   : > { %v651_v5 = vadd.f32 %v650_v32, %v649_v31 }
  0xd8   : > { %v653_v60 = vadd.f32 %v652_v40, %v651_v5 }
  0xda   : > { %v655_v18 = vadd.f32 %v654_v62, %v653_v60 }
  0xdc   : > { %v657_v45 = vadd.f32 %v656_v4, %v655_v18 }
  0xde   : > { %v659_v25 = vadd.f32 %v658_v21, %v657_v45 }
  0xe0   : > { %v661_v12 = vadd.f32 %v660_v20, %v659_v25 }
  0xe2   : > { %v663_v27 = vadd.f32 %v662_v48, %v661_v12 }
  0xe4   : > { %v664_v46 = vrot.slane %v663_v27, 4 }
  0xe6   : > { %v665_v6 = vadd.f32 %v664_v46, %v663_v27 }
  0xe8   : > { %v666_v28 = vrot.slane %v665_v6, 2 }
  0xea   : > { %v667_v0 = vadd.f32 %v666_v28, %v665_v6 }
  0xec   : > { %v668_v55 = vrot.slane %v667_v0, 1 }
  0xee   : > { %v669_v51 = vadd.f32 %v668_v55, %v667_v0 }
  0xf0   : > { %v672_v30 = vmul.f32 %v671_v1, %v669_v51 }
  0xf2   : > { %674 = vst.msk [vmem:[%s673_s24] sm:$0x1] %vm3101_vm7, %v672_v30 }
  0xf3 PF: > { %s28_s23 = sadd.s32 1, %s746_s23  }
  0xf4   : > { %p25_p3 = scmp.ge.s32.totalorder %s28_s23, 4  }
  0xf6   :  { %27 = sbr.rel (!%p25_p3) target bundleno = 8 (0x8), region = 57 }

</bundles_post_ra>
